<compile_context>
chip_gen: v7x
topology: tpu7x:2x2x1
jax: 0.10.0
libtpu: 0.0.40
codegen_flags: <defaults>
</compile_context>

<pallas_src>
import functools

import jax
import jax.numpy as jnp
from jax import lax
from jax.experimental import pallas as pl
from jax.experimental.pallas import tpu as pltpu


def _make_layer_kernel(mode, eps=1e-5):
    """mode: 'lrelu_in' -> LeakyReLU(0.2) then InstanceNorm2d; 'sigmoid' -> Sigmoid."""

    def kernel(x_ref, w_ref, o_ref):
        # x_ref : [K, HW]    bf16  im2col of ONE sample (K = KH*KW*Cin, HW = Hout*Wout)
        # w_ref : [Cout, K]  bf16  flattened conv weight (large dim on lanes)
        # o_ref : [Cout, HW] f32   channels on sublanes, spatial on lanes
        y = jnp.dot(w_ref[...], x_ref[...], preferred_element_type=jnp.float32)
        if mode == "lrelu_in":
            y = jnp.where(y >= 0, y, 0.2 * y)              # LeakyReLU(0.2), f32 VPU
            mean = jnp.mean(y, axis=1, keepdims=True)      # lane-axis reduce (XLU)
            var = jnp.mean(jnp.square(y - mean), axis=1, keepdims=True)
            y = (y - mean) * lax.rsqrt(var + eps)          # rsqrt on EUP
        else:
            y = jax.nn.sigmoid(y)
        o_ref[...] = y

    return kernel


def _im2col_stride2(x, KH, KW, pad, dtype=jnp.bfloat16):
    """x: [N, C, H, W] -> (cols [N, KH*KW*C, Hout*Wout], Hout, Wout).

    cols[n, (kh*KW + kw)*C + c, h*Wout + w] = x_pad[n, c, 2*h + kh, 2*w + kw]
    """
    N, C, H, W = x.shape
    Hout = (H + 2 * pad - KH) // 2 + 1
    Wout = (W + 2 * pad - KW) // 2 + 1
    xp = jnp.pad(x, ((0, 0), (0, 0), (pad, pad), (pad, pad))).astype(dtype)
    taps = []
    for kh in range(KH):
        for kw in range(KW):
            taps.append(
                lax.slice(xp,
                          (0, 0, kh, kw),
                          (N, C, kh + 2 * Hout - 1, kw + 2 * Wout - 1),
                          (1, 1, 2, 2)))
    cols = jnp.stack(taps, axis=1)                 # [N, KH*KW, C, Hout, Wout]
    return cols.reshape(N, KH * KW * C, Hout * Wout), Hout, Wout


def conv_layer(cols, w_flat, mode):
    """One netD block: stride-2 conv (single im2col matmul) + fused act/norm.

    cols:   [N, K, HW]  bf16
    w_flat: [Cout, K]   bf16
    returns [N, Cout, HW] f32
    """
    N, K, HW = cols.shape
    Cout = w_flat.shape[0]
    return pl.pallas_call(
        _make_layer_kernel(mode),
        out_shape=jax.ShapeDtypeStruct((N, Cout, HW), jnp.float32),
        grid=(N,),
        in_specs=[
            pl.BlockSpec((None, K, HW), lambda b: (b, 0, 0)),
            pl.BlockSpec((Cout, K), lambda b: (0, 0)),   # weight resident across steps
        ],
        out_specs=pl.BlockSpec((None, Cout, HW), lambda b: (b, 0, 0)),
        compiler_params=pltpu.CompilerParams(dimension_semantics=("parallel",)),
    )(cols, w_flat)


def init_netD_params(key, nc=1, ndf=8, dfs=9):
    """Deterministic synthetic weights, PyTorch layout [Cout, Cin, KH, KW]."""
    chans = [(nc, ndf), (ndf, ndf * 2), (ndf * 2, ndf * 4),
             (ndf * 4, ndf * 8), (ndf * 8, 1)]
    weights = []
    for cin, cout in chans:
        key, sub = jax.random.split(key)
        scale = 1.0 / jnp.sqrt(float(cin * dfs * dfs))
        weights.append(scale * jax.random.normal(sub, (cout, cin, dfs, dfs),
                                                 jnp.float32))
    return weights


def netD_forward(x_nchw, weights, dfs=9):
    """Matches netD.forward: 4x [conv/2 -> LeakyReLU(0.2) -> InstanceNorm2d],
    then conv/2 (padding=2) -> Sigmoid, then .view(-1, 1).squeeze(1).
    (Module order in the spec really is Conv -> LeakyReLU -> InstanceNorm.)"""
    x = x_nchw.astype(jnp.float32)
    pads = [dfs // 2] * 4 + [2]
    modes = ["lrelu_in"] * 4 + ["sigmoid"]
    for w, pad, mode in zip(weights, pads, modes):
        cout, cin, kh, kw = w.shape
        cols, Hout, Wout = _im2col_stride2(x, kh, kw, pad)
        # [Cout, Cin, KH, KW] -> [Cout, KH*KW*Cin] : matches cols' K ordering
        w_flat = jnp.transpose(w, (0, 2, 3, 1)).reshape(cout, kh * kw * cin)
        y = conv_layer(cols, w_flat.astype(jnp.bfloat16), mode)   # [N, Cout, HW]
        x = y.reshape(y.shape[0], cout, Hout, Wout)               # NCHW for next layer
    # final Cout == 1, so NCHW flatten order matches output.view(-1,1).squeeze(1)
    return x.reshape(-1)


def _reference_forward(x_nchw, weights, dfs=9, eps=1e-5, bf16_matmul=True):
    """Pure-JAX reference (lax.conv). bf16_matmul=True mirrors the kernel's
    bf16-operand / f32-accumulate MXU path so a tight tolerance can be used."""
    x = x_nchw.astype(jnp.float32)
    pads = [dfs // 2] * 4 + [2]
    for i, (w, pad) in enumerate(zip(weights, pads)):
        lhs, rhs = x, w
        if bf16_matmul:
            lhs, rhs = lhs.astype(jnp.bfloat16), rhs.astype(jnp.bfloat16)
        x = lax.conv_general_dilated(
            lhs, rhs, (2, 2), [(pad, pad), (pad, pad)],
            dimension_numbers=("NCHW", "OIHW", "NCHW"),
            preferred_element_type=jnp.float32)
        if i < 4:
            x = jnp.where(x >= 0, x, 0.2 * x)
            m = jnp.mean(x, axis=(2, 3), keepdims=True)
            v = jnp.mean((x - m) ** 2, axis=(2, 3), keepdims=True)
            x = (x - m) * lax.rsqrt(v + eps)
        else:
            x = jax.nn.sigmoid(x)
    return x.reshape(-1)


if __name__ == "__main__":
    key = jax.random.PRNGKey(0)
    k_w, k_x = jax.random.split(key)

    nc, ndf, dfs = 1, 8, 9          # small ndf; shapes consistent with netD(nc, ndf, dfs)
    N, H, W = 2, 80, 80             # 80 -> 40 -> 20 -> 10 -> 5 -> 1 (last conv pad=2)

    weights = init_netD_params(k_w, nc=nc, ndf=ndf, dfs=dfs)
    x = jax.random.normal(k_x, (N, nc, H, W), jnp.float32)   # PyTorch NCHW input

    fwd = jax.jit(functools.partial(netD_forward, dfs=dfs))
    out = jax.block_until_ready(fwd(x, weights))

    ref_bf16 = jax.block_until_ready(
        jax.jit(functools.partial(_reference_forward, dfs=dfs, bf16_matmul=True))(x, weights))
    ref_f32 = jax.block_until_ready(
        jax.jit(functools.partial(_reference_forward, dfs=dfs, bf16_matmul=False))(x, weights))

    assert out.shape == (N,), out.shape            # view(-1,1).squeeze(1) with 1x1 maps
    # tight check vs a reference using the same bf16-operand / f32-accumulate math
    assert jnp.allclose(out, ref_bf16, atol=5e-3, rtol=1e-2), (out, ref_bf16)
    # looser sanity check vs the full-f32 reference (bounds total bf16 error)
    assert jnp.allclose(out, ref_f32, atol=3e-2, rtol=3e-2), (out, ref_f32)

    print("KERNEL_OK")
</pallas_src>

<mosaic_0001>
module attributes {stable_mosaic.version = 11 : i64} {
  func.func @kernel(%arg0: i32, %arg1: memref<1x81x1600xbf16, #tpu.memory_space<vmem>>, %arg2: memref<8x81xbf16, #tpu.memory_space<vmem>>, %arg3: memref<1x8x1600xf32, #tpu.memory_space<vmem>>) attributes {dimension_semantics = [#tpu.dimension_semantics<parallel>], iteration_bounds = array<i64: 2>, scalar_prefetch = 0 : i64, scratch_operands = 0 : i64, tpu.core_type = #tpu.core_type<tc>, window_params = [{transform_indices = @transform_0, window_bounds = array<i64: 1, 81, 1600>}, {pipeline_mode = #tpu.pipeline_mode<synchronous>, transform_indices = @transform_1, window_bounds = array<i64: 8, 81>}, {transform_indices = @transform_2, window_bounds = array<i64: 1, 8, 1600>}]} {
    %c0 = arith.constant 0 : index
    %c0_0 = arith.constant 0 : index
    %0 = vector.load %arg2[%c0, %c0_0] : memref<8x81xbf16, #tpu.memory_space<vmem>>, vector<8x81xbf16>
    %c0_1 = arith.constant 0 : index
    %c0_2 = arith.constant 0 : index
    %c0_3 = arith.constant 0 : index
    %1 = vector.load %arg1[%c0_1, %c0_2, %c0_3] : memref<1x81x1600xbf16, #tpu.memory_space<vmem>>, vector<1x81x1600xbf16>
    %2 = vector.shape_cast %1 : vector<1x81x1600xbf16> to vector<81x1600xbf16>
    %cst = arith.constant dense<0.000000e+00> : vector<8x1600xf32>
    %3 = tpu.matmul %0, %2, %cst {dimension_numbers = #tpu.dot_dimension_numbers<[1], [0], [0], [1], [0, 0, 1, 1], [], []>} : vector<8x81xbf16>, vector<81x1600xbf16>, vector<8x1600xf32> -> vector<8x1600xf32>
    %cst_4 = arith.constant 0.000000e+00 : f32
    %4 = vector.broadcast %cst_4 : f32 to vector<8x1600xf32>
    %5 = arith.cmpf oge, %3, %4 : vector<8x1600xf32>
    %cst_5 = arith.constant 2.000000e-01 : f32
    %6 = vector.broadcast %cst_5 : f32 to vector<8x1600xf32>
    %7 = arith.mulf %6, %3 : vector<8x1600xf32>
    %8 = arith.select %5, %3, %7 : vector<8x1600xi1>, vector<8x1600xf32>
    %cst_6 = arith.constant dense<0.000000e+00> : vector<8xf32>
    %9 = vector.multi_reduction <add>, %8, %cst_6 [1] : vector<8x1600xf32> to vector<8xf32>
    %10 = vector.shape_cast %9 : vector<8xf32> to vector<8x1xf32>
    %cst_7 = arith.constant 1.600000e+03 : f32
    %11 = vector.broadcast %cst_7 : f32 to vector<8x1xf32>
    %12 = arith.divf %10, %11 : vector<8x1xf32>
    %13 = vector.broadcast %12 : vector<8x1xf32> to vector<8x1600xf32>
    %14 = arith.subf %8, %13 : vector<8x1600xf32>
    %15 = arith.mulf %14, %14 : vector<8x1600xf32>
    %cst_8 = arith.constant dense<0.000000e+00> : vector<8xf32>
    %16 = vector.multi_reduction <add>, %15, %cst_8 [1] : vector<8x1600xf32> to vector<8xf32>
    %17 = vector.shape_cast %16 : vector<8xf32> to vector<8x1xf32>
    %cst_9 = arith.constant 1.600000e+03 : f32
    %18 = vector.broadcast %cst_9 : f32 to vector<8x1xf32>
    %19 = arith.divf %17, %18 : vector<8x1xf32>
    %20 = vector.broadcast %12 : vector<8x1xf32> to vector<8x1600xf32>
    %21 = arith.subf %8, %20 : vector<8x1600xf32>
    %cst_10 = arith.constant 9.99999974E-6 : f32
    %22 = vector.broadcast %cst_10 : f32 to vector<8x1xf32>
    %23 = arith.addf %19, %22 : vector<8x1xf32>
    %24 = math.rsqrt %23 : vector<8x1xf32>
    %25 = vector.broadcast %24 : vector<8x1xf32> to vector<8x1600xf32>
    %26 = arith.mulf %21, %25 : vector<8x1600xf32>
    %c0_11 = arith.constant 0 : index
    %c0_12 = arith.constant 0 : index
    %c0_13 = arith.constant 0 : index
    %27 = vector.load %arg3[%c0_11, %c0_12, %c0_13] : memref<1x8x1600xf32, #tpu.memory_space<vmem>>, vector<1x8x1600xf32>
    %28 = vector.shape_cast %27 : vector<1x8x1600xf32> to vector<8x1600xf32>
    %29 = vector.shape_cast %26 : vector<8x1600xf32> to vector<1x8x1600xf32>
    tpu.vector_store %arg3[%c0_11, %c0_12, %c0_13], %29 {strides = array<i32>} : memref<1x8x1600xf32, #tpu.memory_space<vmem>>, vector<1x8x1600xf32>,
    return
  }
  func.func @transform_0(%arg0: i32) -> (i32, i32, i32) {
    %c0_i32 = arith.constant 0 : i32
    %c0_i32_0 = arith.constant 0 : i32
    %c0_i32_1 = arith.constant 0 : i32
    return %arg0, %c0_i32, %c0_i32_0 : i32, i32, i32
  }
  func.func @transform_1(%arg0: i32) -> (i32, i32) {
    %c0_i32 = arith.constant 0 : i32
    %c0_i32_0 = arith.constant 0 : i32
    %c0_i32_1 = arith.constant 0 : i32
    return %c0_i32, %c0_i32_0 : i32, i32
  }
  func.func @transform_2(%arg0: i32) -> (i32, i32, i32) {
    %c0_i32 = arith.constant 0 : i32
    %c0_i32_0 = arith.constant 0 : i32
    %c0_i32_1 = arith.constant 0 : i32
    return %arg0, %c0_i32, %c0_i32_0 : i32, i32, i32
  }
}

module attributes {stable_mosaic.version = 11 : i64} {
  func.func @kernel(%arg0: i32, %arg1: memref<1x648x400xbf16, #tpu.memory_space<vmem>>, %arg2: memref<16x648xbf16, #tpu.memory_space<vmem>>, %arg3: memref<1x16x400xf32, #tpu.memory_space<vmem>>) attributes {dimension_semantics = [#tpu.dimension_semantics<parallel>], iteration_bounds = array<i64: 2>, scalar_prefetch = 0 : i64, scratch_operands = 0 : i64, tpu.core_type = #tpu.core_type<tc>, window_params = [{transform_indices = @transform_0, window_bounds = array<i64: 1, 648, 400>}, {pipeline_mode = #tpu.pipeline_mode<synchronous>, transform_indices = @transform_1, window_bounds = array<i64: 16, 648>}, {transform_indices = @transform_2, window_bounds = array<i64: 1, 16, 400>}]} {
    %c0 = arith.constant 0 : index
    %c0_0 = arith.constant 0 : index
    %0 = vector.load %arg2[%c0, %c0_0] : memref<16x648xbf16, #tpu.memory_space<vmem>>, vector<16x648xbf16>
    %c0_1 = arith.constant 0 : index
    %c0_2 = arith.constant 0 : index
    %c0_3 = arith.constant 0 : index
    %1 = vector.load %arg1[%c0_1, %c0_2, %c0_3] : memref<1x648x400xbf16, #tpu.memory_space<vmem>>, vector<1x648x400xbf16>
    %2 = vector.shape_cast %1 : vector<1x648x400xbf16> to vector<648x400xbf16>
    %cst = arith.constant dense<0.000000e+00> : vector<16x400xf32>
    %3 = tpu.matmul %0, %2, %cst {dimension_numbers = #tpu.dot_dimension_numbers<[1], [0], [0], [1], [0, 0, 1, 1], [], []>} : vector<16x648xbf16>, vector<648x400xbf16>, vector<16x400xf32> -> vector<16x400xf32>
    %cst_4 = arith.constant 0.000000e+00 : f32
    %4 = vector.broadcast %cst_4 : f32 to vector<16x400xf32>
    %5 = arith.cmpf oge, %3, %4 : vector<16x400xf32>
    %cst_5 = arith.constant 2.000000e-01 : f32
    %6 = vector.broadcast %cst_5 : f32 to vector<16x400xf32>
    %7 = arith.mulf %6, %3 : vector<16x400xf32>
    %8 = arith.select %5, %3, %7 : vector<16x400xi1>, vector<16x400xf32>
    %cst_6 = arith.constant dense<0.000000e+00> : vector<16xf32>
    %9 = vector.multi_reduction <add>, %8, %cst_6 [1] : vector<16x400xf32> to vector<16xf32>
    %10 = vector.shape_cast %9 : vector<16xf32> to vector<16x1xf32>
    %cst_7 = arith.constant 4.000000e+02 : f32
    %11 = vector.broadcast %cst_7 : f32 to vector<16x1xf32>
    %12 = arith.divf %10, %11 : vector<16x1xf32>
    %13 = vector.broadcast %12 : vector<16x1xf32> to vector<16x400xf32>
    %14 = arith.subf %8, %13 : vector<16x400xf32>
    %15 = arith.mulf %14, %14 : vector<16x400xf32>
    %cst_8 = arith.constant dense<0.000000e+00> : vector<16xf32>
    %16 = vector.multi_reduction <add>, %15, %cst_8 [1] : vector<16x400xf32> to vector<16xf32>
    %17 = vector.shape_cast %16 : vector<16xf32> to vector<16x1xf32>
    %cst_9 = arith.constant 4.000000e+02 : f32
    %18 = vector.broadcast %cst_9 : f32 to vector<16x1xf32>
    %19 = arith.divf %17, %18 : vector<16x1xf32>
    %20 = vector.broadcast %12 : vector<16x1xf32> to vector<16x400xf32>
    %21 = arith.subf %8, %20 : vector<16x400xf32>
    %cst_10 = arith.constant 9.99999974E-6 : f32
    %22 = vector.broadcast %cst_10 : f32 to vector<16x1xf32>
    %23 = arith.addf %19, %22 : vector<16x1xf32>
    %24 = math.rsqrt %23 : vector<16x1xf32>
    %25 = vector.broadcast %24 : vector<16x1xf32> to vector<16x400xf32>
    %26 = arith.mulf %21, %25 : vector<16x400xf32>
    %c0_11 = arith.constant 0 : index
    %c0_12 = arith.constant 0 : index
    %c0_13 = arith.constant 0 : index
    %27 = vector.load %arg3[%c0_11, %c0_12, %c0_13] : memref<1x16x400xf32, #tpu.memory_space<vmem>>, vector<1x16x400xf32>
    %28 = vector.shape_cast %27 : vector<1x16x400xf32> to vector<16x400xf32>
    %29 = vector.shape_cast %26 : vector<16x400xf32> to vector<1x16x400xf32>
    tpu.vector_store %arg3[%c0_11, %c0_12, %c0_13], %29 {strides = array<i32>} : memref<1x16x400xf32, #tpu.memory_space<vmem>>, vector<1x16x400xf32>,
    return
  }
  func.func @transform_0(%arg0: i32) -> (i32, i32, i32) {
    %c0_i32 = arith.constant 0 : i32
    %c0_i32_0 = arith.constant 0 : i32
    %c0_i32_1 = arith.constant 0 : i32
    return %arg0, %c0_i32, %c0_i32_0 : i32, i32, i32
  }
  func.func @transform_1(%arg0: i32) -> (i32, i32) {
    %c0_i32 = arith.constant 0 : i32
    %c0_i32_0 = arith.constant 0 : i32
    %c0_i32_1 = arith.constant 0 : i32
    return %c0_i32, %c0_i32_0 : i32, i32
  }
  func.func @transform_2(%arg0: i32) -> (i32, i32, i32) {
    %c0_i32 = arith.constant 0 : i32
    %c0_i32_0 = arith.constant 0 : i32
    %c0_i32_1 = arith.constant 0 : i32
    return %arg0, %c0_i32, %c0_i32_0 : i32, i32, i32
  }
}

module attributes {stable_mosaic.version = 11 : i64} {
  func.func @kernel(%arg0: i32, %arg1: memref<1x1296x100xbf16, #tpu.memory_space<vmem>>, %arg2: memref<32x1296xbf16, #tpu.memory_space<vmem>>, %arg3: memref<1x32x100xf32, #tpu.memory_space<vmem>>) attributes {dimension_semantics = [#tpu.dimension_semantics<parallel>], iteration_bounds = array<i64: 2>, scalar_prefetch = 0 : i64, scratch_operands = 0 : i64, tpu.core_type = #tpu.core_type<tc>, window_params = [{transform_indices = @transform_0, window_bounds = array<i64: 1, 1296, 100>}, {pipeline_mode = #tpu.pipeline_mode<synchronous>, transform_indices = @transform_1, window_bounds = array<i64: 32, 1296>}, {transform_indices = @transform_2, window_bounds = array<i64: 1, 32, 100>}]} {
    %c0 = arith.constant 0 : index
    %c0_0 = arith.constant 0 : index
    %0 = vector.load %arg2[%c0, %c0_0] : memref<32x1296xbf16, #tpu.memory_space<vmem>>, vector<32x1296xbf16>
    %c0_1 = arith.constant 0 : index
    %c0_2 = arith.constant 0 : index
    %c0_3 = arith.constant 0 : index
    %1 = vector.load %arg1[%c0_1, %c0_2, %c0_3] : memref<1x1296x100xbf16, #tpu.memory_space<vmem>>, vector<1x1296x100xbf16>
    %2 = vector.shape_cast %1 : vector<1x1296x100xbf16> to vector<1296x100xbf16>
    %cst = arith.constant dense<0.000000e+00> : vector<32x100xf32>
    %3 = tpu.matmul %0, %2, %cst {dimension_numbers = #tpu.dot_dimension_numbers<[1], [0], [0], [1], [0, 0, 1, 1], [], []>} : vector<32x1296xbf16>, vector<1296x100xbf16>, vector<32x100xf32> -> vector<32x100xf32>
    %cst_4 = arith.constant 0.000000e+00 : f32
    %4 = vector.broadcast %cst_4 : f32 to vector<32x100xf32>
    %5 = arith.cmpf oge, %3, %4 : vector<32x100xf32>
    %cst_5 = arith.constant 2.000000e-01 : f32
    %6 = vector.broadcast %cst_5 : f32 to vector<32x100xf32>
    %7 = arith.mulf %6, %3 : vector<32x100xf32>
    %8 = arith.select %5, %3, %7 : vector<32x100xi1>, vector<32x100xf32>
    %cst_6 = arith.constant dense<0.000000e+00> : vector<32xf32>
    %9 = vector.multi_reduction <add>, %8, %cst_6 [1] : vector<32x100xf32> to vector<32xf32>
    %10 = vector.shape_cast %9 : vector<32xf32> to vector<32x1xf32>
    %cst_7 = arith.constant 1.000000e+02 : f32
    %11 = vector.broadcast %cst_7 : f32 to vector<32x1xf32>
    %12 = arith.divf %10, %11 : vector<32x1xf32>
    %13 = vector.broadcast %12 : vector<32x1xf32> to vector<32x100xf32>
    %14 = arith.subf %8, %13 : vector<32x100xf32>
    %15 = arith.mulf %14, %14 : vector<32x100xf32>
    %cst_8 = arith.constant dense<0.000000e+00> : vector<32xf32>
    %16 = vector.multi_reduction <add>, %15, %cst_8 [1] : vector<32x100xf32> to vector<32xf32>
    %17 = vector.shape_cast %16 : vector<32xf32> to vector<32x1xf32>
    %cst_9 = arith.constant 1.000000e+02 : f32
    %18 = vector.broadcast %cst_9 : f32 to vector<32x1xf32>
    %19 = arith.divf %17, %18 : vector<32x1xf32>
    %20 = vector.broadcast %12 : vector<32x1xf32> to vector<32x100xf32>
    %21 = arith.subf %8, %20 : vector<32x100xf32>
    %cst_10 = arith.constant 9.99999974E-6 : f32
    %22 = vector.broadcast %cst_10 : f32 to vector<32x1xf32>
    %23 = arith.addf %19, %22 : vector<32x1xf32>
    %24 = math.rsqrt %23 : vector<32x1xf32>
    %25 = vector.broadcast %24 : vector<32x1xf32> to vector<32x100xf32>
    %26 = arith.mulf %21, %25 : vector<32x100xf32>
    %c0_11 = arith.constant 0 : index
    %c0_12 = arith.constant 0 : index
    %c0_13 = arith.constant 0 : index
    %27 = vector.load %arg3[%c0_11, %c0_12, %c0_13] : memref<1x32x100xf32, #tpu.memory_space<vmem>>, vector<1x32x100xf32>
    %28 = vector.shape_cast %27 : vector<1x32x100xf32> to vector<32x100xf32>
    %29 = vector.shape_cast %26 : vector<32x100xf32> to vector<1x32x100xf32>
    tpu.vector_store %arg3[%c0_11, %c0_12, %c0_13], %29 {strides = array<i32>} : memref<1x32x100xf32, #tpu.memory_space<vmem>>, vector<1x32x100xf32>,
    return
  }
  func.func @transform_0(%arg0: i32) -> (i32, i32, i32) {
    %c0_i32 = arith.constant 0 : i32
    %c0_i32_0 = arith.constant 0 : i32
    %c0_i32_1 = arith.constant 0 : i32
    return %arg0, %c0_i32, %c0_i32_0 : i32, i32, i32
  }
  func.func @transform_1(%arg0: i32) -> (i32, i32) {
    %c0_i32 = arith.constant 0 : i32
    %c0_i32_0 = arith.constant 0 : i32
    %c0_i32_1 = arith.constant 0 : i32
    return %c0_i32, %c0_i32_0 : i32, i32
  }
  func.func @transform_2(%arg0: i32) -> (i32, i32, i32) {
    %c0_i32 = arith.constant 0 : i32
    %c0_i32_0 = arith.constant 0 : i32
    %c0_i32_1 = arith.constant 0 : i32
    return %arg0, %c0_i32, %c0_i32_0 : i32, i32, i32
  }
}

module attributes {stable_mosaic.version = 11 : i64} {
  func.func @kernel(%arg0: i32, %arg1: memref<1x2592x25xbf16, #tpu.memory_space<vmem>>, %arg2: memref<64x2592xbf16, #tpu.memory_space<vmem>>, %arg3: memref<1x64x25xf32, #tpu.memory_space<vmem>>) attributes {dimension_semantics = [#tpu.dimension_semantics<parallel>], iteration_bounds = array<i64: 2>, scalar_prefetch = 0 : i64, scratch_operands = 0 : i64, tpu.core_type = #tpu.core_type<tc>, window_params = [{transform_indices = @transform_0, window_bounds = array<i64: 1, 2592, 25>}, {pipeline_mode = #tpu.pipeline_mode<synchronous>, transform_indices = @transform_1, window_bounds = array<i64: 64, 2592>}, {transform_indices = @transform_2, window_bounds = array<i64: 1, 64, 25>}]} {
    %c0 = arith.constant 0 : index
    %c0_0 = arith.constant 0 : index
    %0 = vector.load %arg2[%c0, %c0_0] : memref<64x2592xbf16, #tpu.memory_space<vmem>>, vector<64x2592xbf16>
    %c0_1 = arith.constant 0 : index
    %c0_2 = arith.constant 0 : index
    %c0_3 = arith.constant 0 : index
    %1 = vector.load %arg1[%c0_1, %c0_2, %c0_3] : memref<1x2592x25xbf16, #tpu.memory_space<vmem>>, vector<1x2592x25xbf16>
    %2 = vector.shape_cast %1 : vector<1x2592x25xbf16> to vector<2592x25xbf16>
    %cst = arith.constant dense<0.000000e+00> : vector<64x25xf32>
    %3 = tpu.matmul %0, %2, %cst {dimension_numbers = #tpu.dot_dimension_numbers<[1], [0], [0], [1], [0, 0, 1, 1], [], []>} : vector<64x2592xbf16>, vector<2592x25xbf16>, vector<64x25xf32> -> vector<64x25xf32>
    %cst_4 = arith.constant 0.000000e+00 : f32
    %4 = vector.broadcast %cst_4 : f32 to vector<64x25xf32>
    %5 = arith.cmpf oge, %3, %4 : vector<64x25xf32>
    %cst_5 = arith.constant 2.000000e-01 : f32
    %6 = vector.broadcast %cst_5 : f32 to vector<64x25xf32>
    %7 = arith.mulf %6, %3 : vector<64x25xf32>
    %8 = arith.select %5, %3, %7 : vector<64x25xi1>, vector<64x25xf32>
    %cst_6 = arith.constant dense<0.000000e+00> : vector<64xf32>
    %9 = vector.multi_reduction <add>, %8, %cst_6 [1] : vector<64x25xf32> to vector<64xf32>
    %10 = vector.shape_cast %9 : vector<64xf32> to vector<64x1xf32>
    %cst_7 = arith.constant 2.500000e+01 : f32
    %11 = vector.broadcast %cst_7 : f32 to vector<64x1xf32>
    %12 = arith.divf %10, %11 : vector<64x1xf32>
    %13 = vector.broadcast %12 : vector<64x1xf32> to vector<64x25xf32>
    %14 = arith.subf %8, %13 : vector<64x25xf32>
    %15 = arith.mulf %14, %14 : vector<64x25xf32>
    %cst_8 = arith.constant dense<0.000000e+00> : vector<64xf32>
    %16 = vector.multi_reduction <add>, %15, %cst_8 [1] : vector<64x25xf32> to vector<64xf32>
    %17 = vector.shape_cast %16 : vector<64xf32> to vector<64x1xf32>
    %cst_9 = arith.constant 2.500000e+01 : f32
    %18 = vector.broadcast %cst_9 : f32 to vector<64x1xf32>
    %19 = arith.divf %17, %18 : vector<64x1xf32>
    %20 = vector.broadcast %12 : vector<64x1xf32> to vector<64x25xf32>
    %21 = arith.subf %8, %20 : vector<64x25xf32>
    %cst_10 = arith.constant 9.99999974E-6 : f32
    %22 = vector.broadcast %cst_10 : f32 to vector<64x1xf32>
    %23 = arith.addf %19, %22 : vector<64x1xf32>
    %24 = math.rsqrt %23 : vector<64x1xf32>
    %25 = vector.broadcast %24 : vector<64x1xf32> to vector<64x25xf32>
    %26 = arith.mulf %21, %25 : vector<64x25xf32>
    %c0_11 = arith.constant 0 : index
    %c0_12 = arith.constant 0 : index
    %c0_13 = arith.constant 0 : index
    %27 = vector.load %arg3[%c0_11, %c0_12, %c0_13] : memref<1x64x25xf32, #tpu.memory_space<vmem>>, vector<1x64x25xf32>
    %28 = vector.shape_cast %27 : vector<1x64x25xf32> to vector<64x25xf32>
    %29 = vector.shape_cast %26 : vector<64x25xf32> to vector<1x64x25xf32>
    tpu.vector_store %arg3[%c0_11, %c0_12, %c0_13], %29 {strides = array<i32>} : memref<1x64x25xf32, #tpu.memory_space<vmem>>, vector<1x64x25xf32>,
    return
  }
  func.func @transform_0(%arg0: i32) -> (i32, i32, i32) {
    %c0_i32 = arith.constant 0 : i32
    %c0_i32_0 = arith.constant 0 : i32
    %c0_i32_1 = arith.constant 0 : i32
    return %arg0, %c0_i32, %c0_i32_0 : i32, i32, i32
  }
  func.func @transform_1(%arg0: i32) -> (i32, i32) {
    %c0_i32 = arith.constant 0 : i32
    %c0_i32_0 = arith.constant 0 : i32
    %c0_i32_1 = arith.constant 0 : i32
    return %c0_i32, %c0_i32_0 : i32, i32
  }
  func.func @transform_2(%arg0: i32) -> (i32, i32, i32) {
    %c0_i32 = arith.constant 0 : i32
    %c0_i32_0 = arith.constant 0 : i32
    %c0_i32_1 = arith.constant 0 : i32
    return %arg0, %c0_i32, %c0_i32_0 : i32, i32, i32
  }
}

module attributes {stable_mosaic.version = 11 : i64} {
  func.func @kernel(%arg0: i32, %arg1: memref<1x5184x1xbf16, #tpu.memory_space<vmem>>, %arg2: memref<1x5184xbf16, #tpu.memory_space<vmem>>, %arg3: memref<1x1x1xf32, #tpu.memory_space<vmem>>) attributes {dimension_semantics = [#tpu.dimension_semantics<parallel>], iteration_bounds = array<i64: 2>, scalar_prefetch = 0 : i64, scratch_operands = 0 : i64, tpu.core_type = #tpu.core_type<tc>, window_params = [{transform_indices = @transform_0, window_bounds = array<i64: 1, 5184, 1>}, {pipeline_mode = #tpu.pipeline_mode<synchronous>, transform_indices = @transform_1, window_bounds = array<i64: 1, 5184>}, {transform_indices = @transform_2, window_bounds = array<i64: 1, 1, 1>}]} {
    %c0 = arith.constant 0 : index
    %c0_0 = arith.constant 0 : index
    %0 = vector.load %arg2[%c0, %c0_0] : memref<1x5184xbf16, #tpu.memory_space<vmem>>, vector<1x5184xbf16>
    %c0_1 = arith.constant 0 : index
    %c0_2 = arith.constant 0 : index
    %c0_3 = arith.constant 0 : index
    %1 = vector.load %arg1[%c0_1, %c0_2, %c0_3] : memref<1x5184x1xbf16, #tpu.memory_space<vmem>>, vector<1x5184x1xbf16>
    %2 = vector.shape_cast %1 : vector<1x5184x1xbf16> to vector<5184x1xbf16>
    %cst = arith.constant dense<0.000000e+00> : vector<1x1xf32>
    %3 = tpu.matmul %0, %2, %cst {dimension_numbers = #tpu.dot_dimension_numbers<[1], [0], [0], [1], [0, 0, 1, 1], [], []>} : vector<1x5184xbf16>, vector<5184x1xbf16>, vector<1x1xf32> -> vector<1x1xf32>
    %4 = arith.negf %3 : vector<1x1xf32>
    %5 = math.exp %4 : vector<1x1xf32>
    %cst_4 = arith.constant 1.000000e+00 : f32
    %6 = vector.broadcast %cst_4 : f32 to vector<1x1xf32>
    %7 = arith.addf %6, %5 : vector<1x1xf32>
    %8 = arith.divf %6, %7 : vector<1x1xf32>
    %c0_5 = arith.constant 0 : index
    %c0_6 = arith.constant 0 : index
    %c0_7 = arith.constant 0 : index
    %9 = vector.load %arg3[%c0_5, %c0_6, %c0_7] : memref<1x1x1xf32, #tpu.memory_space<vmem>>, vector<1x1x1xf32>
    %10 = vector.shape_cast %9 : vector<1x1x1xf32> to vector<1x1xf32>
    %11 = vector.shape_cast %8 : vector<1x1xf32> to vector<1x1x1xf32>
    tpu.vector_store %arg3[%c0_5, %c0_6, %c0_7], %11 {strides = array<i32>} : memref<1x1x1xf32, #tpu.memory_space<vmem>>, vector<1x1x1xf32>,
    return
  }
  func.func @transform_0(%arg0: i32) -> (i32, i32, i32) {
    %c0_i32 = arith.constant 0 : i32
    %c0_i32_0 = arith.constant 0 : i32
    %c0_i32_1 = arith.constant 0 : i32
    return %arg0, %c0_i32, %c0_i32_0 : i32, i32, i32
  }
  func.func @transform_1(%arg0: i32) -> (i32, i32) {
    %c0_i32 = arith.constant 0 : i32
    %c0_i32_0 = arith.constant 0 : i32
    %c0_i32_1 = arith.constant 0 : i32
    return %c0_i32, %c0_i32_0 : i32, i32
  }
  func.func @transform_2(%arg0: i32) -> (i32, i32, i32) {
    %c0_i32 = arith.constant 0 : i32
    %c0_i32_0 = arith.constant 0 : i32
    %c0_i32_1 = arith.constant 0 : i32
    return %arg0, %c0_i32, %c0_i32_0 : i32, i32, i32
  }
}

</mosaic_0001>

<bundles_post_ra>
// kernel: netD_forward.5
= control target key start
LH: loop header
LB: loop body
LE: loop exit
PB: predicated region body
PF: predicated region fallthrough
CT: control target
= control target key end

     0   :  { %s1366_s9 = smov 0   ;;  %s1519_s0 = inlined_call_operand.vmem [shape: bf16[2,81,1600], index: 0, kind: input, shape index: {}]   ;;  %s1520_s1 = inlined_call_operand.vmem [shape: bf16[8,81], index: 1, kind: input, shape index: {}]   ;;  %s1521_s2 = inlined_call_operand.vmem [shape: f32[2,8,1600], index: 2, kind: output, shape index: {}]  }
   0x1 LB: > { %s1100_s10 = sadd.s32 4294967295, %s1346_s9   ;;  %p1104_p0 = scmp.ge.s32.totalorder %s1346_s9, 1  ;;  %s1346_s9 = sphi %s1366_s9, %s12_s9  }
   0x2   : > { %p112_p1 = scmp.lt.s32.totalorder %s1346_s9, 3 }
   0x4   : > { %p113_p2 = pnand %p1104_p0, %p112_p1 }
   0x5   : > { %p134_p3 = scmp.lt.s32.totalorder (!%p113_p2), %s1100_s10, 1  ;;  %v1348_v0 = vmov (!%p113_p2), 0   ;;  %vm590_vm0 = vcmask (!%p113_p2), 1040384   ;;  %v1416_v32 = vld [vmem:[%s1520_s1] sm:$0xf] (!%p113_p2)  ;;  %vm586_vm1 = vcmask (!%p113_p2), 662528  }
   0x6   : > { %116 = sbr.rel (%p113_p2) target bundleno = 670 (0x29e), region = 28  ;;  %664 = vmatprep.mubr.bf16.mxu0 (!%p113_p2), %v1348_v0  ;;  %705 = vmatprep.mubr.bf16.mxu1 (!%p113_p2), %v1348_v0  ;;  %v1401_v17 = vsel (!%p113_p2), %vm590_vm0, 65535, %v1348_v0  ;;  %vm1350_vm2 = vmmov (!%p113_p2), 0   ;;  %vm968_vm0 = vcmask (!%p113_p2), 523264  }
   0xd   : > { %s1523_s10 = smov (!%p134_p3, %s1100_s10), 1 }
   0xe   : > { %s1217_s11 = smul.u32 572, %s1523_s10 }
   0xf   : > { %s1218_s17 = smul.u32 104, %s1523_s10 }
  0x10   : > { %s1382_s14 = scalar_lea.vmem %s1519_s0, %s1217_s11 }
  0x11   : > { %v1230_v1 = vld [vmem:[%s1382_s14 + $0x4] ss:$52 sps:$4 sm:$0xff]   ;;  %v1232_v2 = vld [vmem:[%s1382_s14] ss:$52 sps:$4 sm:$0xff]   ;;  %v1237_v5 = vld [vmem:[%s1382_s14 + $0x8] ss:$52 sps:$4 sm:$0xff]   ;;  %s143_s20 = scalar_lea.vmem %s1521_s2, %s1218_s17 }
  0x12   : > { %632 = vmatprep.subr.bf16.mxu0 %v1230_v1  ;;  %v1233_v3 = vld [vmem:[%s1382_s14 + $0xc] ss:$52 sps:$4 sm:$0xff]   ;;  %v1238_v6 = vld [vmem:[%s1382_s14 + $0x68] ss:$52 sps:$4 sm:$0xff]   ;;  %v1243_v9 = vld [vmem:[%s1382_s14 + $0x70] ss:$52 sps:$4 sm:$0xff]  }
  0x13   : > { %633 = vmatpush1.bf16.msra.mxu0 %v1232_v2  ;;  %v1235_v4 = vld [vmem:[%s1382_s14 + $0x6c] ss:$52 sps:$4 sm:$0xff]   ;;  %673 = vmatprep.subr.bf16.mxu1 %v1233_v3  ;;  %v1239_v7 = vld [vmem:[%s1382_s14 + $0x74] ss:$52 sps:$4 sm:$0xff]   ;;  %v1244_v10 = vld [vmem:[%s1382_s14 + $0xd0] ss:$52 sps:$4 sm:$0xff]  }
  0x14   : > { %634 = vmatprep.subr.bf16.mxu0 %v1235_v4  ;;  %674 = vmatpush1.bf16.msra.mxu1 %v1237_v5  ;;  %v1241_v8 = vld [vmem:[%s1382_s14 + $0xd4] ss:$52 sps:$4 sm:$0xff]   ;;  %v1245_v11 = vld [vmem:[%s1382_s14 + $0xdc] ss:$52 sps:$4 sm:$0xff]   ;;  %v1249_v13 = vld [vmem:[%s1382_s14 + $0xd8] ss:$52 sps:$4 sm:$0xff]  }
  0x15   : > { %675 = vmatprep.subr.bf16.mxu1 %v1239_v7  ;;  %v1247_v12 = vld [vmem:[%s1382_s14 + $0x13c] ss:$52 sps:$4 sm:$0xff]   ;;  %v1251_v14 = vld [vmem:[%s1382_s14 + $0x144] ss:$52 sps:$4 sm:$0xff]   ;;  %v1255_v18 = vld [vmem:[%s1382_s14 + $0x140] ss:$52 sps:$4 sm:$0xff]  }
  0x16   : > { %v1250_v15 = vld [vmem:[%s1382_s14 + $0x138] ss:$52 sps:$4 sm:$0xff]   ;;  %v217_v20 = vld [vmem:[%s1382_s14 + $0x210] sm:$0x11]  ;;  %v1260_v27 = vld [vmem:[%s1382_s14 + $0x1a8] ss:$52 sps:$4 sm:$0xff]  }
  0x17   : > { %635 = vmatpush1.bf16.msra.mxu0 %v1238_v6  ;;  %v1253_v16 = vld [vmem:[%s1382_s14 + $0x1a4] ss:$52 sps:$4 sm:$0xff]   ;;  %v216_v19 = vld [vmem:[%s1382_s14 + $0x208] sm:$0x11]  ;;  %v1175_v23 = vcombine.high %v217_v20, %v217_v20  ;;  %v1256_v24 = vld [vmem:[%s1382_s14 + $0x1a0] ss:$52 sps:$4 sm:$0xff]   ;;  %v1174_v28 = vcombine.low %v217_v20, %v217_v20 }
  0x18   : > { %636 = vmatprep.subr.bf16.mxu0 %v1241_v8  ;;  %676 = vmatpush1.bf16.msra.mxu1 %v1243_v9  ;;  %v1257_v21 = vld [vmem:[%s1382_s14 + $0x1ac] ss:$52 sps:$4 sm:$0xff]   ;;  %v1173_v22 = vcombine.high %v216_v19, %v216_v19  ;;  %v1172_v25 = vcombine.low %v216_v19, %v216_v19  ;;  %v1266_v31 = vld [vmem:[%s1382_s14 + $0x14] ss:$52 sps:$4 sm:$0xff]   ;;  %v1272_v34 = vld [vmem:[%s1382_s14 + $0x1c] ss:$52 sps:$4 sm:$0xff]  }
  0x19   : > { %677 = vmatprep.subr.bf16.mxu1 %v1245_v11  ;;  %v603_v29 = vand.u32 %v1175_v23, %v1401_v17  ;;  %v600_v33 = vand.u32 %v1174_v28, %v1401_v17  ;;  %v1264_v35 = vld [vmem:[%s1382_s14 + $0x10] ss:$52 sps:$4 sm:$0xff]   ;;  %v1270_v37 = vld [vmem:[%s1382_s14 + $0x18] ss:$52 sps:$4 sm:$0xff]   ;;  %v1276_v41 = vld [vmem:[%s1382_s14 + $0x80] ss:$52 sps:$4 sm:$0xff]  }
  0x1a   : > { %v597_v26 = vand.u32 %v1173_v22, %v1401_v17  ;;  %v594_v30 = vand.u32 %v1172_v25, %v1401_v17  ;;  %v1269_v36 = vld [vmem:[%s1382_s14 + $0x7c] ss:$52 sps:$4 sm:$0xff]   ;;  %v1278_v38 = vld [vmem:[%s1382_s14 + $0x84] ss:$52 sps:$4 sm:$0xff]   ;;  %v1284_v42 = vld [vmem:[%s1382_s14 + $0xec] ss:$52 sps:$4 sm:$0xff]  }
  0x1b   : > { %637 = vmatpush1.bf16.msra.mxu0 %v1244_v10  ;;  %v1267_v39 = vld [vmem:[%s1382_s14 + $0x78] ss:$52 sps:$4 sm:$0xff]   ;;  %v1273_v43 = vld [vmem:[%s1382_s14 + $0xe0] ss:$52 sps:$4 sm:$0xff]   ;;  %v1282_v45 = vld [vmem:[%s1382_s14 + $0xe8] ss:$52 sps:$4 sm:$0xff]  }
  0x1c   : > { %638 = vmatprep.subr.bf16.mxu0 %v1247_v12  ;;  %678 = vmatpush1.bf16.msra.mxu1 %v1249_v13  ;;  %v1275_v40 = vld [vmem:[%s1382_s14 + $0xe4] ss:$52 sps:$4 sm:$0xff]   ;;  %v1281_v44 = vld [vmem:[%s1382_s14 + $0x14c] ss:$52 sps:$4 sm:$0xff]   ;;  %v1290_v47 = vld [vmem:[%s1382_s14 + $0x154] ss:$52 sps:$4 sm:$0xff]  }
  0x1d   : > { %679 = vmatprep.subr.bf16.mxu1 %v1251_v14  ;;  %v218_v46 = vld [vmem:[%s1382_s14 + $0x218] sm:$0x11]  ;;  %v219_v49 = vld [vmem:[%s1382_s14 + $0x220] sm:$0x11]  ;;  %v1287_v50 = vld [vmem:[%s1382_s14 + $0x1b4] ss:$52 sps:$4 sm:$0xff]  }
  0x1e   : > { %v1279_v48 = vld [vmem:[%s1382_s14 + $0x148] ss:$52 sps:$4 sm:$0xff]   ;;  %v1177_v51 = vcombine.high %v218_v46, %v218_v46  ;;  %v1288_v52 = vld [vmem:[%s1382_s14 + $0x150] ss:$52 sps:$4 sm:$0xff]   ;;  %v1179_v54 = vcombine.high %v219_v49, %v219_v49  ;;  %v1176_v56 = vcombine.low %v218_v46, %v218_v46  ;;  %v1293_v58 = vld [vmem:[%s1382_s14 + $0x1b8] ss:$52 sps:$4 sm:$0xff]   ;;  %v1178_v59 = vcombine.low %v219_v49, %v219_v49 }
  0x1f   : > { %639 = vmatpush1.bf16.msra.mxu0 %v1250_v15  ;;  %v1295_v53 = vld [vmem:[%s1382_s14 + $0x1bc] ss:$52 sps:$4 sm:$0xff]   ;;  %v1300_v62 = vld [vmem:[%s1382_s14 + $0x24] ss:$52 sps:$4 sm:$0xff]   ;;  %v1298_v63 = vld [vmem:[%s1382_s14 + $0x20] ss:$52 sps:$4 sm:$0xff]  }
  0x20   : > { %640 = vmatprep.subr.bf16.mxu0 %v1253_v16  ;;  %680 = vmatpush1.bf16.msra.mxu1 %v1255_v18  ;;  %v1285_v55 = vld [vmem:[%s1382_s14 + $0x1b0] ss:$52 sps:$4 sm:$0xff]   ;;  %v609_v57 = vand.u32 %v1177_v51, %v1401_v17  ;;  %v615_v60 = vand.u32 %v1179_v54, %v1401_v17  ;;  %v606_v61 = vand.u32 %v1176_v56, %v1401_v17  ;;  %v1306_v2 = vld [vmem:[%s1382_s14 + $0x2c] ss:$52 sps:$4 sm:$0xff]   ;;  %v1304_v5 = vld [vmem:[%s1382_s14 + $0x28] ss:$52 sps:$4 sm:$0xff]  }
  0x21   : > { %681 = vmatprep.subr.bf16.mxu1 %v1257_v21  ;;  %v612_v1 = vand.u32 %v1178_v59, %v1401_v17  ;;  %v1454_v3 = vld [vmem:[%s1382_s14 + $0x238] ss:$0 sps:$4 sm:$0x11]   ;;  %v1303_v4 = vld [vmem:[%s1382_s14 + $0x8c] ss:$52 sps:$4 sm:$0xff]  }
  0x22   : > { %v630_v6 = vand.u32 %v1454_v3, %v1401_v17  ;;  %v1312_v7 = vld [vmem:[%s1382_s14 + $0x94] ss:$52 sps:$4 sm:$0xff]   ;;  %v1310_v10 = vld [vmem:[%s1382_s14 + $0x90] ss:$52 sps:$4 sm:$0xff]   ;;  %v1316_v14 = vld [vmem:[%s1382_s14 + $0xf8] ss:$52 sps:$4 sm:$0xff]  }
  0x23   : > { %641 = vmatpush1.bf16.msra.mxu0 %v1256_v24  ;;  %v1301_v8 = vld [vmem:[%s1382_s14 + $0x88] ss:$52 sps:$4 sm:$0xff]   ;;  %v1307_v12 = vld [vmem:[%s1382_s14 + $0xf0] ss:$52 sps:$4 sm:$0xff]   ;;  %v1313_v18 = vld [vmem:[%s1382_s14 + $0x158] ss:$52 sps:$4 sm:$0xff]  }
  0x24   : > { %642 = vmatprep.subr.bf16.mxu0 %v597_v26  ;;  %682 = vmatpush1.bf16.msra.mxu1 %v1260_v27  ;;  %v1309_v9 = vld [vmem:[%s1382_s14 + $0xf4] ss:$52 sps:$4 sm:$0xff]   ;;  %v1318_v11 = vld [vmem:[%s1382_s14 + $0xfc] ss:$52 sps:$4 sm:$0xff]   ;;  %v1324_v16 = vld [vmem:[%s1382_s14 + $0x164] ss:$52 sps:$4 sm:$0xff]  }
  0x25   : > { %683 = vmatprep.subr.bf16.mxu1 %v603_v29  ;;  %v1315_v13 = vld [vmem:[%s1382_s14 + $0x15c] ss:$52 sps:$4 sm:$0xff]   ;;  %v220_v15 = vld [vmem:[%s1382_s14 + $0x228] sm:$0x11]  ;;  %v1322_v21 = vld [vmem:[%s1382_s14 + $0x160] ss:$52 sps:$4 sm:$0xff]  }
  0x26   : > { %v221_v19 = vld [vmem:[%s1382_s14 + $0x230] sm:$0x11]  ;;  %v1181_v20 = vcombine.high %v220_v15, %v220_v15  ;;  %v1329_v22 = vld [vmem:[%s1382_s14 + $0x1cc] ss:$52 sps:$4 sm:$0xff]   ;;  %v1180_v25 = vcombine.low %v220_v15, %v220_v15  ;;  %v1327_v27 = vld [vmem:[%s1382_s14 + $0x1c8] ss:$52 sps:$4 sm:$0xff]  }
  0x27   : > { %643 = vmatpush1.bf16.msra.mxu0 %v594_v30  ;;  %v1183_v23 = vcombine.high %v221_v19, %v221_v19  ;;  %v1319_v24 = vld [vmem:[%s1382_s14 + $0x1c0] ss:$52 sps:$4 sm:$0xff]   ;;  %v1182_v28 = vcombine.low %v221_v19, %v221_v19 }
  0x28   : > { %714 = vmatprep.subr.bf16.mxu0 %v1266_v31  ;;  %684 = vmatpush1.bf16.msra.mxu1 %v600_v33  ;;  %v621_v26 = vand.u32 %v1181_v20, %v1401_v17  ;;  %v618_v30 = vand.u32 %v1180_v25, %v1401_v17  ;;  %v1332_v33 = vld [vmem:[%s1382_s14 + $0x30] ss:$52 sps:$4 sm:$0xff]  }
  0x29   : > { %755 = vmatprep.subr.bf16.mxu1 %v1272_v34  ;;  %v627_v29 = vand.u32 %v1183_v23, %v1401_v17  ;;  %v624_v31 = vand.u32 %v1182_v28, %v1401_v17  ;;  %v1349_v34 = vmov 0.0  }
  0x2a   : > { %1185 = vmatmul.mubr.msk.bf16.vlgmr.msra.gmra.mrb[0].mxu0 %vm586_vm1, %v1416_v32 }
  0x2b   : > { %715 = vmatpush1.bf16.msra.mxu0 %v1264_v35  ;;  %746 = vmatprep.mubr.bf16.mxu0 %v1348_v0  ;;  %v1333_v35 = vld [vmem:[%s1382_s14 + $0x98] ss:$52 sps:$4 sm:$0xff]  }
  0x2c   : > { %1186 = vmatmul.mubr.msk.bf16.vlgmr.msra.gmra.mrb[0].mxu1 %vm586_vm1, %v1416_v32  ;;  %716 = vmatprep.subr.bf16.mxu0 %v1269_v36  ;;  %v1334_v36 = vld [vmem:[%s1382_s14 + $0x100] ss:$52 sps:$4 sm:$0xff]  }
  0x2d   : > { %756 = vmatpush1.bf16.msra.mxu1 %v1270_v37  ;;  %787 = vmatprep.mubr.bf16.mxu1 %v1348_v0  ;;  %v1335_v37 = vld [vmem:[%s1382_s14 + $0x168] ss:$52 sps:$4 sm:$0xff]  }
  0x2e   : > { %757 = vmatprep.subr.bf16.mxu1 %v1278_v38  ;;  %v1336_v38 = vld [vmem:[%s1382_s14 + $0x1d0] ss:$52 sps:$4 sm:$0xff]  }
  0x2f   : > { %717 = vmatpush1.bf16.msra.mxu0 %v1267_v39 }
  0x30   : > { %718 = vmatprep.subr.bf16.mxu0 %v1275_v40 }
  0x31   : > { %758 = vmatpush1.bf16.msra.mxu1 %v1276_v41 }
  0x32   : > { %759 = vmatprep.subr.bf16.mxu1 %v1284_v42 }
  0x33   : > { %719 = vmatpush1.bf16.msra.mxu0 %v1273_v43 }
  0x34   : > { %720 = vmatprep.subr.bf16.mxu0 %v1281_v44 }
  0x35   : > { %760 = vmatpush1.bf16.msra.mxu1 %v1282_v45 }
  0x36   : > { %761 = vmatprep.subr.bf16.mxu1 %v1290_v47 }
  0x37   : > { %721 = vmatpush1.bf16.msra.mxu0 %v1279_v48 }
  0x38   : > { %722 = vmatprep.subr.bf16.mxu0 %v1287_v50 }
  0x39   : > { %762 = vmatpush1.bf16.msra.mxu1 %v1288_v52 }
  0x3a   : > { %763 = vmatprep.subr.bf16.mxu1 %v1295_v53 }
  0x3b   : > { %723 = vmatpush1.bf16.msra.mxu0 %v1285_v55 }
  0x3c   : > { %724 = vmatprep.subr.bf16.mxu0 %v609_v57 }
  0x3d   : > { %764 = vmatpush1.bf16.msra.mxu1 %v1293_v58 }
  0x3e   : > { %765 = vmatprep.subr.bf16.mxu1 %v615_v60 }
  0x3f   : > { %725 = vmatpush1.bf16.msra.mxu0 %v606_v61 }
  0x40   : > { %796 = vmatprep.subr.bf16.mxu0 %v1300_v62 }
  0x41   : > { %766 = vmatpush1.bf16.msra.mxu1 %v612_v1 }
  0x42   : > { %1187 = vmatmul.mubr.msk.bf16.vlgmr.msra.gmra.mrb[4].mxu0 %vm586_vm1, %v1416_v32  ;;  %837 = vmatprep.subr.bf16.mxu1 %v1306_v2 }
  0x43   : > { %797 = vmatpush1.bf16.msra.mxu0 %v1298_v63  ;;  %828 = vmatprep.mubr.bf16.mxu0 %v1348_v0 }
  0x44   : > { %1188 = vmatmul.mubr.msk.bf16.vlgmr.msra.gmra.mrb[4].mxu1 %vm586_vm1, %v1416_v32  ;;  %798 = vmatprep.subr.bf16.mxu0 %v1303_v4 }
  0x45   : > { %838 = vmatpush1.bf16.msra.mxu1 %v1304_v5  ;;  %869 = vmatprep.mubr.bf16.mxu1 %v1348_v0  ;;  %v1321_v0 = vld [vmem:[%s1382_s14 + $0x1c4] ss:$52 sps:$4 sm:$0xff]  }
  0x46   : > { %839 = vmatprep.subr.bf16.mxu1 %v1312_v7 }
  0x47   : > { %799 = vmatpush1.bf16.msra.mxu0 %v1301_v8 }
  0x48   : > { %800 = vmatprep.subr.bf16.mxu0 %v1309_v9 }
  0x49   : > { %840 = vmatpush1.bf16.msra.mxu1 %v1310_v10 }
  0x4a   : > { %841 = vmatprep.subr.bf16.mxu1 %v1318_v11 }
  0x4b   : > { %801 = vmatpush1.bf16.msra.mxu0 %v1307_v12 }
  0x4c   : > { %802 = vmatprep.subr.bf16.mxu0 %v1315_v13 }
  0x4d   : > { %842 = vmatpush1.bf16.msra.mxu1 %v1316_v14 }
  0x4e   : > { %843 = vmatprep.subr.bf16.mxu1 %v1324_v16 }
  0x4f   : > { %803 = vmatpush1.bf16.msra.mxu0 %v1313_v18 }
  0x50   : > { %804 = vmatprep.subr.bf16.mxu0 %v1321_v0 }
  0x51   : > { %844 = vmatpush1.bf16.msra.mxu1 %v1322_v21 }
  0x52   : > { %845 = vmatprep.subr.bf16.mxu1 %v1329_v22 }
  0x53   : > { %805 = vmatpush1.bf16.msra.mxu0 %v1319_v24 }
  0x54   : > { %806 = vmatprep.subr.bf16.mxu0 %v621_v26 }
  0x55   : > { %846 = vmatpush1.bf16.msra.mxu1 %v1327_v27 }
  0x56   : > { %847 = vmatprep.subr.bf16.mxu1 %v627_v29 }
  0x57   : > { %807 = vmatpush1.bf16.msra.mxu0 %v618_v30 }
  0x58   : > { %1201 = vmatprep.subr.bf16.mxu0 %v1349_v34 }
  0x59   : > { %848 = vmatpush1.bf16.msra.mxu1 %v624_v31 }
  0x5a   : > { %1189 = vmatmul.mubr.msk.bf16.vlgmr.msra.gmra.mrb[8].mxu0 %vm586_vm1, %v1416_v32 }
  0x5b   : > { %1202 = vmatpush3.bf16.msra.mxu0 %v1332_v33  ;;  %1213 = vmatprep.mubr.msk.bf16.mxu0 %vm1350_vm2, %v1349_v34 }
  0x5c   : > { %1190 = vmatmul.mubr.msk.bf16.vlgmr.msra.gmra.mrb[8].mxu1 %vm586_vm1, %v1416_v32  ;;  %1203 = vmatprep.subr.bf16.mxu0 %v1349_v34 }
  0x5f   : > { %1204 = vmatpush3.bf16.msra.mxu0 %v1333_v35 }
  0x60   : > { %1205 = vmatprep.subr.bf16.mxu0 %v1349_v34 }
  0x63   : > { %1206 = vmatpush3.bf16.msra.mxu0 %v1334_v36 }
  0x64   : > { %1207 = vmatprep.subr.bf16.mxu0 %v1349_v34 }
  0x67   : > { %1208 = vmatpush3.bf16.msra.mxu0 %v1335_v37 }
  0x68   : > { %1209 = vmatprep.subr.bf16.mxu0 %v1349_v34 }
  0x6b   : > { %1210 = vmatpush3.bf16.msra.mxu0 %v1336_v38 }
  0x6c   : > { %1211 = vmatprep.subr.bf16.mxu0 %v1349_v34 }
  0x6f   : > { %1212 = vmatpush3.bf16.msra.mxu0 %v630_v6 }
  0x72   : > { %1214 = vmatmul.mubr.msk.bf16.vlgmr.msra.gmra.mrb[12].mxu0 %vm586_vm1, %v1416_v32 }
  0xfd   : > { %v666_v39 = vpop.f32.mrb[0].mxu0 }
  0xfe   : > { %v668_v40 = vpop.f32.mrb[1].mxu0  ;;  %v931_v54 = vmul.f32 0.2, %v666_v39  ;;  %vm918_vm3 = vcmp.ge.f32.partialorder %v666_v39, 0.0 }
  0xff   : > { %v670_v41 = vpop.f32.mrb[2].mxu0  ;;  %v707_v42 = vpop.f32.mrb[0].mxu1  ;;  %v932_v55 = vmul.f32 0.2, %v668_v40  ;;  %vm919_vm4 = vcmp.ge.f32.partialorder %v668_v40, 0.0 }
 0x100   : > { %v671_v43 = vpop.f32.mrb[3].mxu0  ;;  %v709_v44 = vpop.f32.mrb[1].mxu1  ;;  %v1501_v32 = vsel %vm918_vm3, %v666_v39, %v931_v54  ;;  %v933_v57 = vmul.f32 0.2, %v707_v42  ;;  %vm920_vm5 = vcmp.ge.f32.partialorder %v707_v42, 0.0 }
 0x101   : > { %v711_v45 = vpop.f32.mrb[2].mxu1  ;;  %v1503_v56 = vsel %vm919_vm4, %v668_v40, %v932_v55  ;;  %v934_v60 = vmul.f32 0.2, %v709_v44  ;;  %vm921_vm6 = vcmp.ge.f32.partialorder %v709_v44, 0.0 }
 0x102   : > { %v712_v46 = vpop.f32.mrb[3].mxu1  ;;  %v957_v58 = vadd.f32 %v1503_v56, %v1501_v32  ;;  %v946_v59 = vsel %vm920_vm5, %v707_v42, %v933_v57 }
 0x103   : > { %v947_v63 = vsel %vm921_vm6, %v709_v44, %v934_v60 }
 0x104   : > { %v958_v62 = vadd.f32 %v957_v58, %v946_v59 }
 0x106   : > { %v959_v3 = vadd.f32 %v958_v62, %v947_v63 }
 0x115   : > { %v748_v47 = vpop.f32.mrb[4].mxu0 }
 0x116   : > { %v750_v48 = vpop.f32.mrb[5].mxu0  ;;  %v935_v61 = vmul.f32 0.2, %v748_v47  ;;  %vm922_vm7 = vcmp.ge.f32.partialorder %v748_v47, 0.0 }
 0x117   : > { %v752_v49 = vpop.f32.mrb[6].mxu0  ;;  %v789_v50 = vpop.f32.mrb[4].mxu1  ;;  %v936_v2 = vmul.f32 0.2, %v750_v48  ;;  %vm923_vm8 = vcmp.ge.f32.partialorder %v750_v48, 0.0 }
 0x118   : > { %v753_v51 = vpop.f32.mrb[7].mxu0  ;;  %v791_v52 = vpop.f32.mrb[5].mxu1  ;;  %v948_v1 = vsel %vm922_vm7, %v748_v47, %v935_v61  ;;  %v937_v8 = vmul.f32 0.2, %v789_v50  ;;  %vm924_vm9 = vcmp.ge.f32.partialorder %v789_v50, 0.0 }
 0x119   : > { %v793_v53 = vpop.f32.mrb[6].mxu1  ;;  %v960_v5 = vadd.f32 %v959_v3, %v948_v1  ;;  %v949_v7 = vsel %vm923_vm8, %v750_v48, %v936_v2  ;;  %v938_v18 = vmul.f32 0.2, %v791_v52  ;;  %vm925_vm10 = vcmp.ge.f32.partialorder %v791_v52, 0.0 }
 0x11a   : > { %v794_v17 = vpop.f32.mrb[7].mxu1  ;;  %v950_v16 = vsel %vm924_vm9, %v789_v50, %v937_v8 }
 0x11b   : > { %v961_v14 = vadd.f32 %v960_v5, %v949_v7  ;;  %v951_v20 = vsel %vm925_vm10, %v791_v52, %v938_v18 }
 0x11d   : > { %v962_v0 = vadd.f32 %v961_v14, %v950_v16 }
 0x11f   : > { %v963_v23 = vadd.f32 %v962_v0, %v951_v20 }
 0x12d   : > { %v830_v4 = vpop.f32.mrb[8].mxu0 }
 0x12e   : > { %v832_v6 = vpop.f32.mrb[9].mxu0  ;;  %v939_v19 = vmul.f32 0.2, %v830_v4  ;;  %vm926_vm11 = vcmp.ge.f32.partialorder %v830_v4, 0.0 }
 0x12f   : > { %v834_v9 = vpop.f32.mrb[10].mxu0  ;;  %v871_v10 = vpop.f32.mrb[8].mxu1  ;;  %v940_v22 = vmul.f32 0.2, %v832_v6  ;;  %vm927_vm12 = vcmp.ge.f32.partialorder %v832_v6, 0.0 }
 0x130   : > { %v835_v11 = vpop.f32.mrb[11].mxu0  ;;  %v873_v12 = vpop.f32.mrb[9].mxu1  ;;  %v952_v21 = vsel %vm926_vm11, %v830_v4, %v939_v19  ;;  %v941_v26 = vmul.f32 0.2, %v871_v10  ;;  %vm928_vm13 = vcmp.ge.f32.partialorder %v871_v10, 0.0 }
 0x131   : > { %v875_v13 = vpop.f32.mrb[10].mxu1  ;;  %v964_v24 = vadd.f32 %v963_v23, %v952_v21  ;;  %v953_v25 = vsel %vm927_vm12, %v832_v6, %v940_v22  ;;  %v942_v29 = vmul.f32 0.2, %v873_v12  ;;  %vm929_vm14 = vcmp.ge.f32.partialorder %v873_v12, 0.0 }
 0x132   : > { %v876_v15 = vpop.f32.mrb[11].mxu1  ;;  %v954_v28 = vsel %vm928_vm13, %v871_v10, %v941_v26 }
 0x133   : > { %v965_v27 = vadd.f32 %v964_v24, %v953_v25  ;;  %v955_v33 = vsel %vm929_vm14, %v873_v12, %v942_v29 }
 0x135   : > { %v966_v30 = vadd.f32 %v965_v27, %v954_v28 }
 0x137   : > { %v967_v39 = vadd.f32 %v966_v30, %v955_v33 }
 0x145   : > { %v912_v31 = vpop.f32.mrb[12].mxu0 }
 0x146   : > { %vm930_vm15 = vcmp.ge.f32.partialorder %v912_v31, 0.0  ;;  %v943_v34 = vmul.f32 0.2, %v912_v31  ;;  %v1215_v35 = vpop.f32.mrb[13].mxu0 }
 0x147   : > { %v915_v36 = vpop.f32.mrb[14].mxu0 }
 0x148   : > { %v1216_v37 = vpop.f32.mrb[15].mxu0  ;;  %v956_v38 = vsel %vm930_vm15, %v912_v31, %v943_v34 }
 0x149   : > { %v969_v40 = vsel %vm968_vm0, %v956_v38, 0.0 }
 0x14a   : > { %v970_v41 = vadd.f32 %v969_v40, %v967_v39 }
 0x14c   : > { %971 = vadd.xlane.f32.xlu0 %v970_v41 }
 0x1d9   : > { %v972_v42 = vpop.xlane.xlu0 %971 }
 0x1da   : > { %v974_v43 = vmul.f32 0.000625, %v972_v42 }
 0x1dc   : > { %v975_v44 = vsub.f32 %v1501_v32, %v974_v43  ;;  %v976_v45 = vsub.f32 %v1503_v56, %v974_v43  ;;  %v977_v46 = vsub.f32 %v946_v59, %v974_v43  ;;  %v978_v49 = vsub.f32 %v947_v63, %v974_v43 }
 0x1dd   : > { %v979_v50 = vsub.f32 %v948_v1, %v974_v43  ;;  %v980_v53 = vsub.f32 %v949_v7, %v974_v43  ;;  %v981_v55 = vsub.f32 %v950_v16, %v974_v43  ;;  %v982_v60 = vsub.f32 %v951_v20, %v974_v43 }
 0x1de   : > { %v988_v47 = vmul.f32 %v975_v44, %v975_v44  ;;  %v989_v48 = vmul.f32 %v976_v45, %v976_v45  ;;  %v990_v51 = vmul.f32 %v977_v46, %v977_v46  ;;  %v991_v17 = vmul.f32 %v978_v49, %v978_v49 }
 0x1df   : > { %v992_v57 = vmul.f32 %v979_v50, %v979_v50  ;;  %v993_v61 = vmul.f32 %v980_v53, %v980_v53  ;;  %v983_v2 = vsub.f32 %v952_v21, %v974_v43  ;;  %v994_v32 = vmul.f32 %v981_v55, %v981_v55 }
 0x1e0   : > { %v1001_v52 = vadd.f32 %v989_v48, %v988_v47  ;;  %v984_v56 = vsub.f32 %v953_v25, %v974_v43  ;;  %v995_v59 = vmul.f32 %v982_v60, %v982_v60  ;;  %v985_v5 = vsub.f32 %v954_v28, %v974_v43 }
 0x1e1   : > { %v996_v63 = vmul.f32 %v983_v2, %v983_v2  ;;  %v987_v6 = vsub.f32 %v956_v38, %v974_v43  ;;  %v986_v8 = vsub.f32 %v955_v33, %v974_v43 }
 0x1e2   : > { %v1002_v54 = vadd.f32 %v1001_v52, %v990_v51  ;;  %v997_v7 = vmul.f32 %v984_v56, %v984_v56  ;;  %v998_v10 = vmul.f32 %v985_v5, %v985_v5 }
 0x1e3   : > { %v1000_v12 = vmul.f32 %v987_v6, %v987_v6  ;;  %v999_v13 = vmul.f32 %v986_v8, %v986_v8 }
 0x1e4   : > { %v1003_v58 = vadd.f32 %v1002_v54, %v991_v17 }
 0x1e5   : > { %v1012_v16 = vsel %vm968_vm0, %v1000_v12, 0.0 }
 0x1e6   : > { %v1004_v62 = vadd.f32 %v1003_v58, %v992_v57 }
 0x1e8   : > { %v1005_v3 = vadd.f32 %v1004_v62, %v993_v61 }
 0x1ea   : > { %v1006_v4 = vadd.f32 %v1005_v3, %v994_v32 }
 0x1ec   : > { %v1007_v1 = vadd.f32 %v1006_v4, %v995_v59 }
 0x1ee   : > { %v1008_v9 = vadd.f32 %v1007_v1, %v996_v63 }
 0x1f0   : > { %v1009_v11 = vadd.f32 %v1008_v9, %v997_v7 }
 0x1f2   : > { %v1010_v14 = vadd.f32 %v1009_v11, %v998_v10 }
 0x1f4   : > { %v1011_v15 = vadd.f32 %v1010_v14, %v999_v13 }
 0x1f6   : > { %v1013_v18 = vadd.f32 %v1012_v16, %v1011_v15 }
 0x1f8   : > { %1014 = vadd.xlane.f32.xlu0 %v1013_v18 }
 0x285   : > { %v1015_v19 = vpop.xlane.xlu0 %1014 }
 0x286   : > { %v1016_v0 = vmul.f32 0.000625, %v1015_v19 }
 0x288   : > { %v1017_v20 = vadd.f32 1e-05, %v1016_v0 }
 0x28a   : > { %1338 = vrsqrt.f32 %v1017_v20 }
 0x294   : > { %v1339_v21 = vpop.eup %1338 }
 0x295   : > { %v1019_v22 = vmul.f32 %v1339_v21, %v975_v44  ;;  %v1020_v23 = vmul.f32 %v1339_v21, %v976_v45  ;;  %v1021_v24 = vmul.f32 %v1339_v21, %v977_v46  ;;  %v1022_v25 = vmul.f32 %v1339_v21, %v978_v49 }
 0x296   : > { %v1023_v26 = vmul.f32 %v1339_v21, %v979_v50  ;;  %v1024_v27 = vmul.f32 %v1339_v21, %v980_v53  ;;  %v1025_v28 = vmul.f32 %v1339_v21, %v981_v55  ;;  %v1026_v29 = vmul.f32 %v1339_v21, %v982_v60 }
 0x297   : > { %v1027_v30 = vmul.f32 %v1339_v21, %v983_v2  ;;  %v1028_v31 = vmul.f32 %v1339_v21, %v984_v56  ;;  %v1029_v33 = vmul.f32 %v1339_v21, %v985_v5  ;;  %v1030_v34 = vmul.f32 %v1339_v21, %v986_v8  ;;  %1032 = vst [vmem:[%s143_s20] sm:$0xff] %v1019_v22 }
 0x298   : > { %1033 = vst [vmem:[%s143_s20 + $0x8] sm:$0xff] %v1020_v23  ;;  %1034 = vst [vmem:[%s143_s20 + $0x10] sm:$0xff] %v1021_v24  ;;  %v1031_v35 = vmul.f32 %v1339_v21, %v987_v6 }
 0x299   : > { %1035 = vst [vmem:[%s143_s20 + $0x18] sm:$0xff] %v1022_v25  ;;  %1036 = vst [vmem:[%s143_s20 + $0x20] sm:$0xff] %v1023_v26 }
 0x29a   : > { %1037 = vst [vmem:[%s143_s20 + $0x28] sm:$0xff] %v1024_v27  ;;  %1038 = vst [vmem:[%s143_s20 + $0x30] sm:$0xff] %v1025_v28 }
 0x29b   : > { %1039 = vst [vmem:[%s143_s20 + $0x38] sm:$0xff] %v1026_v29  ;;  %1040 = vst [vmem:[%s143_s20 + $0x40] sm:$0xff] %v1027_v30 }
 0x29c   : > { %1041 = vst [vmem:[%s143_s20 + $0x48] sm:$0xff] %v1028_v31  ;;  %1042 = vst [vmem:[%s143_s20 + $0x50] sm:$0xff] %v1029_v33 }
 0x29d   : > { %1043 = vst [vmem:[%s143_s20 + $0x58] sm:$0xff] %v1030_v34  ;;  %1044 = vst.msk [vmem:[%s143_s20 + $0x60] sm:$0xff] %vm968_vm0, %v1031_v35 }
 0x29e PF: > { %s12_s9 = sadd.s32 1, %s1346_s9  }
 0x29f   : > { %p9_p4 = scmp.ge.s32.totalorder %s12_s9, 4  }
 0x2a1   :  { %11 = sbr.rel (!%p9_p4) target bundleno = 1 (0x1), region = 58 }

// kernel: netD_forward.6
= control target key start
LH: loop header
LB: loop body
LE: loop exit
PB: predicated region body
PF: predicated region fallthrough
CT: control target
= control target key end

     0   :  { %s2062_s9 = smov 0   ;;  %s2271_s0 = inlined_call_operand.vmem [shape: bf16[2,648,400], index: 0, kind: input, shape index: {}]   ;;  %s2272_s1 = inlined_call_operand.vmem [shape: bf16[16,648], index: 1, kind: input, shape index: {}]   ;;  %s2273_s2 = inlined_call_operand.vmem [shape: f32[2,16,400], index: 2, kind: output, shape index: {}]  }
   0x1 LB: > { %s1572_s10 = sadd.s32 4294967295, %s2045_s9   ;;  %p1576_p0 = scmp.ge.s32.totalorder %s2045_s9, 1  ;;  %s2045_s9 = sphi %s2062_s9, %s12_s9  }
   0x2   : > { %p112_p1 = scmp.lt.s32.totalorder %s2045_s9, 3 }
   0x4   : > { %p113_p2 = pnand %p1576_p0, %p112_p1 }
   0x5   : > { %p134_p3 = scmp.lt.s32.totalorder (!%p113_p2), %s1572_s10, 1  ;;  %v1880_v0 = vld [vmem:[%s2272_s1 + $0x4] ss:$24 sps:$4 sm:$0xff] (!%p113_p2)   ;;  %vm1152_vm0 = vcmask (!%p113_p2), 64512   ;;  %vm1156_vm1 = vcmask (!%p113_p2), 1043456   ;;  %vm1453_vm7 = vcmask (!%p113_p2), 130048  }
   0x6   : > { %116 = sbr.rel (%p113_p2) target bundleno = 724 (0x2d4), region = 28  ;;  %1201 = vmatprep.mubr.bf16.mxu0 (!%p113_p2), %v1880_v0  ;;  %1330 = vmatprep.mubr.bf16.mxu1 (!%p113_p2), %v1880_v0 }
   0xd   : > { %s2275_s10 = smov (!%p134_p3, %s1572_s10), 1 }
   0xe   : > { %s1773_s13 = smul.u32 1296, %s2275_s10  ;;  %s1756_s27 = sshll.u32 %s2275_s10, 6 }
   0xf   : > { %s143_s30 = scalar_lea.vmem %s2273_s2, %s1756_s27 }
  0x10   : > { %s2079_s16 = scalar_lea.vmem %s2271_s0, %s1773_s13 }
  0x11   : > { %v1782_v1 = vld [vmem:[%s2079_s16 + $0x4] ss:$16 sps:$4 sm:$0xff]   ;;  %v1784_v2 = vld [vmem:[%s2079_s16 + $0xc] ss:$16 sps:$4 sm:$0xff]   ;;  %v1786_v3 = vld [vmem:[%s2079_s16] ss:$16 sps:$4 sm:$0xff]  }
  0x12   : > { %1169 = vmatprep.subr.bf16.mxu0 %v1782_v1  ;;  %v1787_v4 = vld [vmem:[%s2079_s16 + $0x8] ss:$16 sps:$4 sm:$0xff]   ;;  %1298 = vmatprep.subr.bf16.mxu1 %v1784_v2  ;;  %v1788_v5 = vld [vmem:[%s2079_s16 + $0x24] ss:$16 sps:$4 sm:$0xff]   ;;  %v1790_v6 = vld [vmem:[%s2079_s16 + $0x2c] ss:$16 sps:$4 sm:$0xff]  }
  0x13   : > { %1170 = vmatpush1.bf16.msra.mxu0 %v1786_v3  ;;  %1299 = vmatpush1.bf16.msra.mxu1 %v1787_v4  ;;  %v1792_v7 = vld [vmem:[%s2079_s16 + $0x20] ss:$16 sps:$4 sm:$0xff]   ;;  %v1793_v8 = vld [vmem:[%s2079_s16 + $0x28] ss:$16 sps:$4 sm:$0xff]   ;;  %v1794_v9 = vld [vmem:[%s2079_s16 + $0x44] ss:$16 sps:$4 sm:$0xff]  }
  0x14   : > { %1171 = vmatprep.subr.bf16.mxu0 %v1788_v5  ;;  %1300 = vmatprep.subr.bf16.mxu1 %v1790_v6  ;;  %v1796_v10 = vld [vmem:[%s2079_s16 + $0x4c] ss:$16 sps:$4 sm:$0xff]   ;;  %v1798_v11 = vld [vmem:[%s2079_s16 + $0x40] ss:$16 sps:$4 sm:$0xff]   ;;  %v1799_v12 = vld [vmem:[%s2079_s16 + $0x48] ss:$16 sps:$4 sm:$0xff]  }
  0x15   : > { %v1800_v13 = vld [vmem:[%s2079_s16 + $0x64] ss:$16 sps:$4 sm:$0xff]   ;;  %v1802_v14 = vld [vmem:[%s2079_s16 + $0x6c] ss:$16 sps:$4 sm:$0xff]   ;;  %v1804_v15 = vld [vmem:[%s2079_s16 + $0x60] ss:$16 sps:$4 sm:$0xff]  }
  0x16   : > { %v1805_v16 = vld [vmem:[%s2079_s16 + $0x68] ss:$16 sps:$4 sm:$0xff]   ;;  %v1806_v17 = vld [vmem:[%s2079_s16 + $0x84] ss:$16 sps:$4 sm:$0xff]   ;;  %v1808_v18 = vld [vmem:[%s2079_s16 + $0x8c] ss:$16 sps:$4 sm:$0xff]  }
  0x17   : > { %1172 = vmatpush1.bf16.msra.mxu0 %v1792_v7  ;;  %1301 = vmatpush1.bf16.msra.mxu1 %v1793_v8  ;;  %v1810_v19 = vld [vmem:[%s2079_s16 + $0x80] ss:$16 sps:$4 sm:$0xff]   ;;  %v1811_v20 = vld [vmem:[%s2079_s16 + $0x88] ss:$16 sps:$4 sm:$0xff]   ;;  %v1812_v21 = vld [vmem:[%s2079_s16 + $0xa4] ss:$16 sps:$4 sm:$0xff]  }
  0x18   : > { %1173 = vmatprep.subr.bf16.mxu0 %v1794_v9  ;;  %1302 = vmatprep.subr.bf16.mxu1 %v1796_v10  ;;  %v1814_v22 = vld [vmem:[%s2079_s16 + $0xac] ss:$16 sps:$4 sm:$0xff]   ;;  %v1816_v23 = vld [vmem:[%s2079_s16 + $0xa0] ss:$16 sps:$4 sm:$0xff]   ;;  %v1817_v24 = vld [vmem:[%s2079_s16 + $0xa8] ss:$16 sps:$4 sm:$0xff]  }
  0x19   : > { %v1818_v25 = vld [vmem:[%s2079_s16 + $0xc4] ss:$16 sps:$4 sm:$0xff]   ;;  %v1820_v26 = vld [vmem:[%s2079_s16 + $0xcc] ss:$16 sps:$4 sm:$0xff]   ;;  %v1822_v27 = vld [vmem:[%s2079_s16 + $0xc0] ss:$16 sps:$4 sm:$0xff]  }
  0x1a   : > { %v1823_v28 = vld [vmem:[%s2079_s16 + $0xc8] ss:$16 sps:$4 sm:$0xff]   ;;  %v1824_v29 = vld [vmem:[%s2079_s16 + $0xe4] ss:$16 sps:$4 sm:$0xff]   ;;  %v1826_v30 = vld [vmem:[%s2079_s16 + $0xec] ss:$16 sps:$4 sm:$0xff]  }
  0x1b   : > { %1174 = vmatpush1.bf16.msra.mxu0 %v1798_v11  ;;  %1303 = vmatpush1.bf16.msra.mxu1 %v1799_v12  ;;  %v1828_v31 = vld [vmem:[%s2079_s16 + $0xe0] ss:$16 sps:$4 sm:$0xff]   ;;  %v1829_v32 = vld [vmem:[%s2079_s16 + $0xe8] ss:$16 sps:$4 sm:$0xff]   ;;  %v1830_v33 = vld [vmem:[%s2079_s16 + $0x104] ss:$16 sps:$4 sm:$0xff]  }
  0x1c   : > { %1175 = vmatprep.subr.bf16.mxu0 %v1800_v13  ;;  %1304 = vmatprep.subr.bf16.mxu1 %v1802_v14  ;;  %v1832_v34 = vld [vmem:[%s2079_s16 + $0x10c] ss:$16 sps:$4 sm:$0xff]   ;;  %v1834_v35 = vld [vmem:[%s2079_s16 + $0x100] ss:$16 sps:$4 sm:$0xff]   ;;  %v1835_v36 = vld [vmem:[%s2079_s16 + $0x108] ss:$16 sps:$4 sm:$0xff]  }
  0x1d   : > { %v1836_v37 = vld [vmem:[%s2079_s16 + $0x124] ss:$16 sps:$4 sm:$0xff]   ;;  %v1838_v38 = vld [vmem:[%s2079_s16 + $0x12c] ss:$16 sps:$4 sm:$0xff]   ;;  %v1840_v39 = vld [vmem:[%s2079_s16 + $0x120] ss:$16 sps:$4 sm:$0xff]  }
  0x1e   : > { %v1841_v40 = vld [vmem:[%s2079_s16 + $0x128] ss:$16 sps:$4 sm:$0xff]   ;;  %v1842_v41 = vld [vmem:[%s2079_s16 + $0x144] ss:$16 sps:$4 sm:$0xff]   ;;  %v1844_v42 = vld [vmem:[%s2079_s16 + $0x14c] ss:$16 sps:$4 sm:$0xff]  }
  0x1f   : > { %1176 = vmatpush1.bf16.msra.mxu0 %v1804_v15  ;;  %1305 = vmatpush1.bf16.msra.mxu1 %v1805_v16  ;;  %v1846_v43 = vld [vmem:[%s2079_s16 + $0x140] ss:$16 sps:$4 sm:$0xff]   ;;  %v1847_v44 = vld [vmem:[%s2079_s16 + $0x148] ss:$16 sps:$4 sm:$0xff]   ;;  %v1848_v45 = vld [vmem:[%s2079_s16 + $0x164] ss:$16 sps:$4 sm:$0xff]  }
  0x20   : > { %1177 = vmatprep.subr.bf16.mxu0 %v1806_v17  ;;  %1306 = vmatprep.subr.bf16.mxu1 %v1808_v18  ;;  %v1850_v46 = vld [vmem:[%s2079_s16 + $0x16c] ss:$16 sps:$4 sm:$0xff]   ;;  %v1852_v47 = vld [vmem:[%s2079_s16 + $0x160] ss:$16 sps:$4 sm:$0xff]   ;;  %v1853_v48 = vld [vmem:[%s2079_s16 + $0x168] ss:$16 sps:$4 sm:$0xff]  }
  0x21   : > { %v1854_v49 = vld [vmem:[%s2079_s16 + $0x184] ss:$16 sps:$4 sm:$0xff]   ;;  %v1856_v50 = vld [vmem:[%s2079_s16 + $0x18c] ss:$16 sps:$4 sm:$0xff]   ;;  %v1858_v51 = vld [vmem:[%s2079_s16 + $0x180] ss:$16 sps:$4 sm:$0xff]  }
  0x22   : > { %v1859_v52 = vld [vmem:[%s2079_s16 + $0x188] ss:$16 sps:$4 sm:$0xff]   ;;  %v1860_v53 = vld [vmem:[%s2079_s16 + $0x1a4] ss:$16 sps:$4 sm:$0xff]   ;;  %v1862_v54 = vld [vmem:[%s2079_s16 + $0x1ac] ss:$16 sps:$4 sm:$0xff]  }
  0x23   : > { %1178 = vmatpush1.bf16.msra.mxu0 %v1810_v19  ;;  %1307 = vmatpush1.bf16.msra.mxu1 %v1811_v20  ;;  %v1864_v55 = vld [vmem:[%s2079_s16 + $0x1a0] ss:$16 sps:$4 sm:$0xff]   ;;  %v1865_v56 = vld [vmem:[%s2079_s16 + $0x1a8] ss:$16 sps:$4 sm:$0xff]   ;;  %v1866_v57 = vld [vmem:[%s2079_s16 + $0x1c4] ss:$16 sps:$4 sm:$0xff]  }
  0x24   : > { %1179 = vmatprep.subr.bf16.mxu0 %v1812_v21  ;;  %1308 = vmatprep.subr.bf16.mxu1 %v1814_v22  ;;  %v1868_v58 = vld [vmem:[%s2079_s16 + $0x1cc] ss:$16 sps:$4 sm:$0xff]   ;;  %v1870_v59 = vld [vmem:[%s2079_s16 + $0x1c0] ss:$16 sps:$4 sm:$0xff]   ;;  %v1871_v60 = vld [vmem:[%s2079_s16 + $0x1c8] ss:$16 sps:$4 sm:$0xff]  }
  0x25   : > { %v1872_v61 = vld [vmem:[%s2079_s16 + $0x1e4] ss:$16 sps:$4 sm:$0xff]   ;;  %v1874_v62 = vld [vmem:[%s2079_s16 + $0x1ec] ss:$16 sps:$4 sm:$0xff]   ;;  %v1876_v63 = vld [vmem:[%s2079_s16 + $0x1e0] ss:$16 sps:$4 sm:$0xff]  }
  0x26   : > { %v1877_v0 = vld [vmem:[%s2079_s16 + $0x1e8] ss:$16 sps:$4 sm:$0xff]   ;;  %v1883_v1 = vld [vmem:[%s2079_s16 + $0x204] ss:$16 sps:$4 sm:$0xff]   ;;  %v1886_v2 = vld [vmem:[%s2079_s16 + $0x20c] ss:$16 sps:$4 sm:$0xff]  }
  0x27   : > { %1180 = vmatpush1.bf16.msra.mxu0 %v1816_v23  ;;  %1309 = vmatpush1.bf16.msra.mxu1 %v1817_v24  ;;  %v1878_v3 = vld [vmem:[%s2272_s1] ss:$24 sps:$4 sm:$0xff]   ;;  %v1889_v6 = vld [vmem:[%s2079_s16 + $0x224] ss:$16 sps:$4 sm:$0xff]   ;;  %v1892_v7 = vld [vmem:[%s2079_s16 + $0x22c] ss:$16 sps:$4 sm:$0xff]  }
  0x28   : > { %1181 = vmatprep.subr.bf16.mxu0 %v1818_v25  ;;  %1310 = vmatprep.subr.bf16.mxu1 %v1820_v26  ;;  %v1881_v4 = vld [vmem:[%s2079_s16 + $0x200] ss:$16 sps:$4 sm:$0xff]   ;;  %v1884_v5 = vld [vmem:[%s2079_s16 + $0x208] ss:$16 sps:$4 sm:$0xff]   ;;  %v1895_v10 = vld [vmem:[%s2079_s16 + $0x244] ss:$16 sps:$4 sm:$0xff]  }
  0x29   : > { %v1887_v8 = vld [vmem:[%s2079_s16 + $0x220] ss:$16 sps:$4 sm:$0xff]   ;;  %v1890_v9 = vld [vmem:[%s2079_s16 + $0x228] ss:$16 sps:$4 sm:$0xff]   ;;  %v1898_v11 = vld [vmem:[%s2079_s16 + $0x24c] ss:$16 sps:$4 sm:$0xff]  }
  0x2a   : > { %v1893_v12 = vld [vmem:[%s2079_s16 + $0x240] ss:$16 sps:$4 sm:$0xff]   ;;  %v1896_v13 = vld [vmem:[%s2079_s16 + $0x248] ss:$16 sps:$4 sm:$0xff]   ;;  %v1901_v14 = vld [vmem:[%s2079_s16 + $0x264] ss:$16 sps:$4 sm:$0xff]  }
  0x2b   : > { %1182 = vmatpush1.bf16.msra.mxu0 %v1822_v27  ;;  %1311 = vmatpush1.bf16.msra.mxu1 %v1823_v28  ;;  %v1904_v15 = vld [vmem:[%s2079_s16 + $0x26c] ss:$16 sps:$4 sm:$0xff]   ;;  %v1899_v16 = vld [vmem:[%s2079_s16 + $0x260] ss:$16 sps:$4 sm:$0xff]   ;;  %v1902_v17 = vld [vmem:[%s2079_s16 + $0x268] ss:$16 sps:$4 sm:$0xff]  }
  0x2c   : > { %1183 = vmatprep.subr.bf16.mxu0 %v1824_v29  ;;  %1312 = vmatprep.subr.bf16.mxu1 %v1826_v30  ;;  %v1907_v18 = vld [vmem:[%s2079_s16 + $0x284] ss:$16 sps:$4 sm:$0xff]   ;;  %v1910_v19 = vld [vmem:[%s2079_s16 + $0x28c] ss:$16 sps:$4 sm:$0xff]   ;;  %v1905_v20 = vld [vmem:[%s2079_s16 + $0x280] ss:$16 sps:$4 sm:$0xff]  }
  0x2d   : > { %v1908_v21 = vld [vmem:[%s2079_s16 + $0x288] ss:$16 sps:$4 sm:$0xff]   ;;  %v1913_v22 = vld [vmem:[%s2079_s16 + $0x2a4] ss:$16 sps:$4 sm:$0xff]   ;;  %v1916_v23 = vld [vmem:[%s2079_s16 + $0x2ac] ss:$16 sps:$4 sm:$0xff]  }
  0x2e   : > { %v1911_v24 = vld [vmem:[%s2079_s16 + $0x2a0] ss:$16 sps:$4 sm:$0xff]   ;;  %v1914_v25 = vld [vmem:[%s2079_s16 + $0x2a8] ss:$16 sps:$4 sm:$0xff]   ;;  %v1919_v26 = vld [vmem:[%s2079_s16 + $0x2c4] ss:$16 sps:$4 sm:$0xff]  }
  0x2f   : > { %1184 = vmatpush1.bf16.msra.mxu0 %v1828_v31  ;;  %1313 = vmatpush1.bf16.msra.mxu1 %v1829_v32  ;;  %v1922_v27 = vld [vmem:[%s2079_s16 + $0x2cc] ss:$16 sps:$4 sm:$0xff]   ;;  %v1917_v29 = vld [vmem:[%s2079_s16 + $0x2c0] ss:$16 sps:$4 sm:$0xff]   ;;  %v1920_v30 = vld [vmem:[%s2079_s16 + $0x2c8] ss:$16 sps:$4 sm:$0xff]  }
  0x30   : > { %1185 = vmatprep.subr.bf16.mxu0 %v1830_v33  ;;  %1314 = vmatprep.subr.bf16.mxu1 %v1832_v34  ;;  %v1979_v28 = vld [vmem:[%s2272_s1 + $0xc] ss:$24 sps:$4 sm:$0xff]   ;;  %v1923_v33 = vld [vmem:[%s2079_s16 + $0x2e0] ss:$16 sps:$4 sm:$0xff]   ;;  %v1926_v34 = vld [vmem:[%s2079_s16 + $0x2e8] ss:$16 sps:$4 sm:$0xff]  }
  0x31   : > { %v1925_v31 = vld [vmem:[%s2079_s16 + $0x2e4] ss:$16 sps:$4 sm:$0xff]   ;;  %v1928_v32 = vld [vmem:[%s2079_s16 + $0x2ec] ss:$16 sps:$4 sm:$0xff]  }
  0x33   : > { %1186 = vmatpush1.bf16.msra.mxu0 %v1834_v35  ;;  %1315 = vmatpush1.bf16.msra.mxu1 %v1835_v36  ;;  %v1931_v35 = vld [vmem:[%s2079_s16 + $0x304] ss:$16 sps:$4 sm:$0xff]   ;;  %v1934_v36 = vld [vmem:[%s2079_s16 + $0x30c] ss:$16 sps:$4 sm:$0xff]  }
  0x34   : > { %1187 = vmatprep.subr.bf16.mxu0 %v1836_v37  ;;  %1316 = vmatprep.subr.bf16.mxu1 %v1838_v38  ;;  %v1929_v37 = vld [vmem:[%s2079_s16 + $0x300] ss:$16 sps:$4 sm:$0xff]   ;;  %v1932_v38 = vld [vmem:[%s2079_s16 + $0x308] ss:$16 sps:$4 sm:$0xff]  }
  0x37   : > { %1188 = vmatpush1.bf16.msra.mxu0 %v1840_v39  ;;  %1317 = vmatpush1.bf16.msra.mxu1 %v1841_v40  ;;  %v1937_v39 = vld [vmem:[%s2079_s16 + $0x324] ss:$16 sps:$4 sm:$0xff]   ;;  %v1940_v40 = vld [vmem:[%s2079_s16 + $0x32c] ss:$16 sps:$4 sm:$0xff]  }
  0x38   : > { %1189 = vmatprep.subr.bf16.mxu0 %v1842_v41  ;;  %1318 = vmatprep.subr.bf16.mxu1 %v1844_v42  ;;  %v1935_v41 = vld [vmem:[%s2079_s16 + $0x320] ss:$16 sps:$4 sm:$0xff]   ;;  %v1938_v42 = vld [vmem:[%s2079_s16 + $0x328] ss:$16 sps:$4 sm:$0xff]  }
  0x3b   : > { %1190 = vmatpush1.bf16.msra.mxu0 %v1846_v43  ;;  %1319 = vmatpush1.bf16.msra.mxu1 %v1847_v44  ;;  %v1943_v43 = vld [vmem:[%s2079_s16 + $0x344] ss:$16 sps:$4 sm:$0xff]   ;;  %v1946_v44 = vld [vmem:[%s2079_s16 + $0x34c] ss:$16 sps:$4 sm:$0xff]  }
  0x3c   : > { %1191 = vmatprep.subr.bf16.mxu0 %v1848_v45  ;;  %1320 = vmatprep.subr.bf16.mxu1 %v1850_v46  ;;  %v1941_v45 = vld [vmem:[%s2079_s16 + $0x340] ss:$16 sps:$4 sm:$0xff]   ;;  %v1944_v46 = vld [vmem:[%s2079_s16 + $0x348] ss:$16 sps:$4 sm:$0xff]  }
  0x3f   : > { %1192 = vmatpush1.bf16.msra.mxu0 %v1852_v47  ;;  %1321 = vmatpush1.bf16.msra.mxu1 %v1853_v48  ;;  %v1949_v47 = vld [vmem:[%s2079_s16 + $0x364] ss:$16 sps:$4 sm:$0xff]   ;;  %v1952_v48 = vld [vmem:[%s2079_s16 + $0x36c] ss:$16 sps:$4 sm:$0xff]  }
  0x40   : > { %1193 = vmatprep.subr.bf16.mxu0 %v1854_v49  ;;  %1322 = vmatprep.subr.bf16.mxu1 %v1856_v50  ;;  %v1947_v49 = vld [vmem:[%s2079_s16 + $0x360] ss:$16 sps:$4 sm:$0xff]   ;;  %v1950_v50 = vld [vmem:[%s2079_s16 + $0x368] ss:$16 sps:$4 sm:$0xff]  }
  0x43   : > { %1194 = vmatpush1.bf16.msra.mxu0 %v1858_v51  ;;  %1323 = vmatpush1.bf16.msra.mxu1 %v1859_v52  ;;  %v1955_v51 = vld [vmem:[%s2079_s16 + $0x384] ss:$16 sps:$4 sm:$0xff]   ;;  %v1958_v52 = vld [vmem:[%s2079_s16 + $0x38c] ss:$16 sps:$4 sm:$0xff]  }
  0x44   : > { %1195 = vmatprep.subr.bf16.mxu0 %v1860_v53  ;;  %1324 = vmatprep.subr.bf16.mxu1 %v1862_v54  ;;  %v1953_v53 = vld [vmem:[%s2079_s16 + $0x380] ss:$16 sps:$4 sm:$0xff]   ;;  %v1956_v54 = vld [vmem:[%s2079_s16 + $0x388] ss:$16 sps:$4 sm:$0xff]  }
  0x47   : > { %1196 = vmatpush1.bf16.msra.mxu0 %v1864_v55  ;;  %1325 = vmatpush1.bf16.msra.mxu1 %v1865_v56  ;;  %v1961_v55 = vld [vmem:[%s2079_s16 + $0x3a4] ss:$16 sps:$4 sm:$0xff]   ;;  %v1964_v56 = vld [vmem:[%s2079_s16 + $0x3ac] ss:$16 sps:$4 sm:$0xff]  }
  0x48   : > { %1197 = vmatprep.subr.bf16.mxu0 %v1866_v57  ;;  %1326 = vmatprep.subr.bf16.mxu1 %v1868_v58  ;;  %v1959_v57 = vld [vmem:[%s2079_s16 + $0x3a0] ss:$16 sps:$4 sm:$0xff]   ;;  %v1962_v58 = vld [vmem:[%s2079_s16 + $0x3a8] ss:$16 sps:$4 sm:$0xff]  }
  0x4b   : > { %1198 = vmatpush1.bf16.msra.mxu0 %v1870_v59  ;;  %1327 = vmatpush1.bf16.msra.mxu1 %v1871_v60  ;;  %v1967_v59 = vld [vmem:[%s2079_s16 + $0x3c4] ss:$16 sps:$4 sm:$0xff]   ;;  %v1970_v60 = vld [vmem:[%s2079_s16 + $0x3cc] ss:$16 sps:$4 sm:$0xff]  }
  0x4c   : > { %1199 = vmatprep.subr.bf16.mxu0 %v1872_v61  ;;  %1328 = vmatprep.subr.bf16.mxu1 %v1874_v62  ;;  %v1965_v61 = vld [vmem:[%s2079_s16 + $0x3c0] ss:$16 sps:$4 sm:$0xff]   ;;  %v1968_v62 = vld [vmem:[%s2079_s16 + $0x3c8] ss:$16 sps:$4 sm:$0xff]  }
  0x4f   : > { %1200 = vmatpush1.bf16.msra.mxu0 %v1876_v63  ;;  %1329 = vmatpush1.bf16.msra.mxu1 %v1877_v0  ;;  %v1973_v63 = vld [vmem:[%s2079_s16 + $0x3e4] ss:$16 sps:$4 sm:$0xff]   ;;  %v1976_v0 = vld [vmem:[%s2079_s16 + $0x3ec] ss:$16 sps:$4 sm:$0xff]  }
  0x50   : > { %1212 = vmatprep.subr.bf16.mxu0 %v1883_v1  ;;  %1341 = vmatprep.subr.bf16.mxu1 %v1886_v2  ;;  %v1971_v1 = vld [vmem:[%s2079_s16 + $0x3e0] ss:$16 sps:$4 sm:$0xff]   ;;  %v1974_v2 = vld [vmem:[%s2079_s16 + $0x3e8] ss:$16 sps:$4 sm:$0xff]  }
  0x52   : > { %1202 = vmatmul.mubr.bf16.vlgmr.msra.gmra.mrb[0].mxu0 %v1878_v3  ;;  %1331 = vmatmul.mubr.bf16.vlgmr.msra.gmra.mrb[0].mxu1 %v1878_v3  ;;  %v1982_v3 = vld [vmem:[%s2079_s16 + $0x404] ss:$16 sps:$4 sm:$0xff]  }
  0x53   : > { %1213 = vmatpush1.bf16.msra.mxu0 %v1881_v4  ;;  %1342 = vmatpush1.bf16.msra.mxu1 %v1884_v5  ;;  %v1985_v4 = vld [vmem:[%s2079_s16 + $0x40c] ss:$16 sps:$4 sm:$0xff]   ;;  %v1977_v5 = vld [vmem:[%s2272_s1 + $0x8] ss:$24 sps:$4 sm:$0xff]  }
  0x54   : > { %1214 = vmatprep.subr.bf16.mxu0 %v1889_v6  ;;  %1343 = vmatprep.subr.bf16.mxu1 %v1892_v7  ;;  %v1980_v6 = vld [vmem:[%s2079_s16 + $0x400] ss:$16 sps:$4 sm:$0xff]   ;;  %v1983_v7 = vld [vmem:[%s2079_s16 + $0x408] ss:$16 sps:$4 sm:$0xff]  }
  0x55   : > { %1244 = vmatprep.mubr.bf16.mxu0 %v1979_v28  ;;  %1373 = vmatprep.mubr.bf16.mxu1 %v1979_v28  ;;  %v2013_v28 = vld [vmem:[%s2079_s16 + $0x4a8] ss:$16 sps:$4 sm:$0xff]  }
  0x57   : > { %1215 = vmatpush1.bf16.msra.mxu0 %v1887_v8  ;;  %1344 = vmatpush1.bf16.msra.mxu1 %v1890_v9  ;;  %v1988_v8 = vld [vmem:[%s2079_s16 + $0x424] ss:$16 sps:$4 sm:$0xff]   ;;  %v1991_v9 = vld [vmem:[%s2079_s16 + $0x42c] ss:$16 sps:$4 sm:$0xff]  }
  0x58   : > { %1216 = vmatprep.subr.bf16.mxu0 %v1895_v10  ;;  %1345 = vmatprep.subr.bf16.mxu1 %v1898_v11  ;;  %v2032_v10 = vld [vmem:[%s2272_s1 + $0x14] ss:$24 sps:$4 sm:$0xff]   ;;  %v1986_v11 = vld [vmem:[%s2079_s16 + $0x420] ss:$16 sps:$4 sm:$0xff]  }
  0x5b   : > { %1217 = vmatpush1.bf16.msra.mxu0 %v1893_v12  ;;  %1346 = vmatpush1.bf16.msra.mxu1 %v1896_v13  ;;  %v1989_v12 = vld [vmem:[%s2079_s16 + $0x428] ss:$16 sps:$4 sm:$0xff]   ;;  %v1994_v13 = vld [vmem:[%s2079_s16 + $0x444] ss:$16 sps:$4 sm:$0xff]  }
  0x5c   : > { %1218 = vmatprep.subr.bf16.mxu0 %v1901_v14  ;;  %1347 = vmatprep.subr.bf16.mxu1 %v1904_v15  ;;  %v1997_v14 = vld [vmem:[%s2079_s16 + $0x44c] ss:$16 sps:$4 sm:$0xff]   ;;  %v1992_v15 = vld [vmem:[%s2079_s16 + $0x440] ss:$16 sps:$4 sm:$0xff]  }
  0x5f   : > { %1219 = vmatpush1.bf16.msra.mxu0 %v1899_v16  ;;  %1348 = vmatpush1.bf16.msra.mxu1 %v1902_v17  ;;  %v1995_v16 = vld [vmem:[%s2079_s16 + $0x448] ss:$16 sps:$4 sm:$0xff]   ;;  %v2000_v17 = vld [vmem:[%s2079_s16 + $0x464] ss:$16 sps:$4 sm:$0xff]  }
  0x60   : > { %1220 = vmatprep.subr.bf16.mxu0 %v1907_v18  ;;  %1349 = vmatprep.subr.bf16.mxu1 %v1910_v19  ;;  %v2003_v18 = vld [vmem:[%s2079_s16 + $0x46c] ss:$16 sps:$4 sm:$0xff]   ;;  %v1998_v19 = vld [vmem:[%s2079_s16 + $0x460] ss:$16 sps:$4 sm:$0xff]  }
  0x63   : > { %1221 = vmatpush1.bf16.msra.mxu0 %v1905_v20  ;;  %1350 = vmatpush1.bf16.msra.mxu1 %v1908_v21  ;;  %v2001_v20 = vld [vmem:[%s2079_s16 + $0x468] ss:$16 sps:$4 sm:$0xff]   ;;  %v2006_v21 = vld [vmem:[%s2079_s16 + $0x484] ss:$16 sps:$4 sm:$0xff]  }
  0x64   : > { %1222 = vmatprep.subr.bf16.mxu0 %v1913_v22  ;;  %1351 = vmatprep.subr.bf16.mxu1 %v1916_v23  ;;  %v2009_v22 = vld [vmem:[%s2079_s16 + $0x48c] ss:$16 sps:$4 sm:$0xff]   ;;  %v2004_v23 = vld [vmem:[%s2079_s16 + $0x480] ss:$16 sps:$4 sm:$0xff]  }
  0x67   : > { %1223 = vmatpush1.bf16.msra.mxu0 %v1911_v24  ;;  %1352 = vmatpush1.bf16.msra.mxu1 %v1914_v25  ;;  %v2007_v24 = vld [vmem:[%s2079_s16 + $0x488] ss:$16 sps:$4 sm:$0xff]   ;;  %v2012_v25 = vld [vmem:[%s2079_s16 + $0x4a4] ss:$16 sps:$4 sm:$0xff]  }
  0x68   : > { %1224 = vmatprep.subr.bf16.mxu0 %v1919_v26  ;;  %1353 = vmatprep.subr.bf16.mxu1 %v1922_v27  ;;  %v2015_v26 = vld [vmem:[%s2079_s16 + $0x4ac] ss:$16 sps:$4 sm:$0xff]   ;;  %v2010_v27 = vld [vmem:[%s2079_s16 + $0x4a0] ss:$16 sps:$4 sm:$0xff]  }
  0x6b   : > { %1225 = vmatpush1.bf16.msra.mxu0 %v1917_v29  ;;  %1354 = vmatpush1.bf16.msra.mxu1 %v1920_v30  ;;  %v2018_v29 = vld [vmem:[%s2079_s16 + $0x4c4] ss:$16 sps:$4 sm:$0xff]   ;;  %v2021_v30 = vld [vmem:[%s2079_s16 + $0x4cc] ss:$16 sps:$4 sm:$0xff]  }
  0x6c   : > { %1226 = vmatprep.subr.bf16.mxu0 %v1925_v31  ;;  %1355 = vmatprep.subr.bf16.mxu1 %v1928_v32  ;;  %v2016_v31 = vld [vmem:[%s2079_s16 + $0x4c0] ss:$16 sps:$4 sm:$0xff]   ;;  %v2019_v32 = vld [vmem:[%s2079_s16 + $0x4c8] ss:$16 sps:$4 sm:$0xff]  }
  0x6f   : > { %1227 = vmatpush1.bf16.msra.mxu0 %v1923_v33  ;;  %1356 = vmatpush1.bf16.msra.mxu1 %v1926_v34  ;;  %v2024_v33 = vld [vmem:[%s2079_s16 + $0x4e4] ss:$16 sps:$4 sm:$0xff]   ;;  %v2027_v34 = vld [vmem:[%s2079_s16 + $0x4ec] ss:$16 sps:$4 sm:$0xff]  }
  0x70   : > { %1228 = vmatprep.subr.bf16.mxu0 %v1931_v35  ;;  %1357 = vmatprep.subr.bf16.mxu1 %v1934_v36  ;;  %v311_v35 = vld [vmem:[%s2079_s16 + $0x500] sm:$0xff]  ;;  %v312_v36 = vld [vmem:[%s2079_s16 + $0x508] sm:$0xff] }
  0x73   : > { %1229 = vmatpush1.bf16.msra.mxu0 %v1929_v37  ;;  %1358 = vmatpush1.bf16.msra.mxu1 %v1932_v38  ;;  %v2022_v37 = vld [vmem:[%s2079_s16 + $0x4e0] ss:$16 sps:$4 sm:$0xff]   ;;  %v2025_v38 = vld [vmem:[%s2079_s16 + $0x4e8] ss:$16 sps:$4 sm:$0xff]  }
  0x74   : > { %1230 = vmatprep.subr.bf16.mxu0 %v1937_v39  ;;  %1359 = vmatprep.subr.bf16.mxu1 %v1940_v40  ;;  %v1747_v39 = vcombine.high %v311_v35, %v311_v35  ;;  %v1749_v40 = vcombine.high %v312_v36, %v312_v36 }
  0x77   : > { %1231 = vmatpush1.bf16.msra.mxu0 %v1935_v41  ;;  %1360 = vmatpush1.bf16.msra.mxu1 %v1938_v42  ;;  %v1746_v41 = vcombine.low %v311_v35, %v311_v35  ;;  %v1748_v42 = vcombine.low %v312_v36, %v312_v36 }
  0x78   : > { %1232 = vmatprep.subr.bf16.mxu0 %v1943_v43  ;;  %1361 = vmatprep.subr.bf16.mxu1 %v1946_v44 }
  0x79   : > { %v1158_v43 = vsel %vm1156_vm1, %v1746_v41, 0  ;;  %v1164_v44 = vsel %vm1156_vm1, %v1748_v42, 0 }
  0x7b   : > { %1233 = vmatpush1.bf16.msra.mxu0 %v1941_v45  ;;  %1362 = vmatpush1.bf16.msra.mxu1 %v1944_v46  ;;  %v2034_v45 = vld [vmem:[%s2272_s1 + $0x10] ss:$24 sps:$4 sm:$0xff]  }
  0x7c   : > { %1234 = vmatprep.subr.bf16.mxu0 %v1949_v47  ;;  %1363 = vmatprep.subr.bf16.mxu1 %v1952_v48 }
  0x7f   : > { %1235 = vmatpush1.bf16.msra.mxu0 %v1947_v49  ;;  %1364 = vmatpush1.bf16.msra.mxu1 %v1950_v50 }
  0x80   : > { %1236 = vmatprep.subr.bf16.mxu0 %v1955_v51  ;;  %1365 = vmatprep.subr.bf16.mxu1 %v1958_v52 }
  0x83   : > { %1237 = vmatpush1.bf16.msra.mxu0 %v1953_v53  ;;  %1366 = vmatpush1.bf16.msra.mxu1 %v1956_v54 }
  0x84   : > { %1238 = vmatprep.subr.bf16.mxu0 %v1961_v55  ;;  %1367 = vmatprep.subr.bf16.mxu1 %v1964_v56 }
  0x87   : > { %1239 = vmatpush1.bf16.msra.mxu0 %v1959_v57  ;;  %1368 = vmatpush1.bf16.msra.mxu1 %v1962_v58 }
  0x88   : > { %1240 = vmatprep.subr.bf16.mxu0 %v1967_v59  ;;  %1369 = vmatprep.subr.bf16.mxu1 %v1970_v60 }
  0x8b   : > { %1241 = vmatpush1.bf16.msra.mxu0 %v1965_v61  ;;  %1370 = vmatpush1.bf16.msra.mxu1 %v1968_v62 }
  0x8c   : > { %1242 = vmatprep.subr.bf16.mxu0 %v1973_v63  ;;  %1371 = vmatprep.subr.bf16.mxu1 %v1976_v0 }
  0x8f   : > { %1243 = vmatpush1.bf16.msra.mxu0 %v1971_v1  ;;  %1372 = vmatpush1.bf16.msra.mxu1 %v1974_v2 }
  0x90   : > { %1255 = vmatprep.subr.bf16.mxu0 %v1982_v3  ;;  %1384 = vmatprep.subr.bf16.mxu1 %v1985_v4 }
  0x92   : > { %1245 = vmatmul.mubr.bf16.vlgmr.msra.gmra.mrb[0].mxu0 %v1977_v5  ;;  %1374 = vmatmul.mubr.bf16.vlgmr.msra.gmra.mrb[0].mxu1 %v1977_v5 }
  0x93   : > { %1256 = vmatpush1.bf16.msra.mxu0 %v1980_v6  ;;  %1385 = vmatpush1.bf16.msra.mxu1 %v1983_v7 }
  0x94   : > { %1257 = vmatprep.subr.bf16.mxu0 %v1988_v8  ;;  %1386 = vmatprep.subr.bf16.mxu1 %v1991_v9 }
  0x95   : > { %1751 = vmatprep.mubr.msk.bf16.mxu0 %vm1152_vm0, %v2032_v10  ;;  %1753 = vmatprep.mubr.msk.bf16.mxu1 %vm1152_vm0, %v2032_v10 }
  0x97   : > { %1258 = vmatpush1.bf16.msra.mxu0 %v1986_v11  ;;  %1387 = vmatpush1.bf16.msra.mxu1 %v1989_v12 }
  0x98   : > { %1259 = vmatprep.subr.bf16.mxu0 %v1994_v13  ;;  %1388 = vmatprep.subr.bf16.mxu1 %v1997_v14 }
  0x9b   : > { %1260 = vmatpush1.bf16.msra.mxu0 %v1992_v15  ;;  %1389 = vmatpush1.bf16.msra.mxu1 %v1995_v16 }
  0x9c   : > { %1261 = vmatprep.subr.bf16.mxu0 %v2000_v17  ;;  %1390 = vmatprep.subr.bf16.mxu1 %v2003_v18 }
  0x9f   : > { %1262 = vmatpush1.bf16.msra.mxu0 %v1998_v19  ;;  %1391 = vmatpush1.bf16.msra.mxu1 %v2001_v20 }
  0xa0   : > { %1263 = vmatprep.subr.bf16.mxu0 %v2006_v21  ;;  %1392 = vmatprep.subr.bf16.mxu1 %v2009_v22 }
  0xa3   : > { %1264 = vmatpush1.bf16.msra.mxu0 %v2004_v23  ;;  %1393 = vmatpush1.bf16.msra.mxu1 %v2007_v24 }
  0xa4   : > { %1265 = vmatprep.subr.bf16.mxu0 %v2012_v25  ;;  %1394 = vmatprep.subr.bf16.mxu1 %v2015_v26 }
  0xa7   : > { %1266 = vmatpush1.bf16.msra.mxu0 %v2010_v27  ;;  %1395 = vmatpush1.bf16.msra.mxu1 %v2013_v28 }
  0xa8   : > { %1267 = vmatprep.subr.bf16.mxu0 %v2018_v29  ;;  %1396 = vmatprep.subr.bf16.mxu1 %v2021_v30 }
  0xab   : > { %1268 = vmatpush1.bf16.msra.mxu0 %v2016_v31  ;;  %1397 = vmatpush1.bf16.msra.mxu1 %v2019_v32 }
  0xac   : > { %1269 = vmatprep.subr.bf16.mxu0 %v2024_v33  ;;  %1398 = vmatprep.subr.bf16.mxu1 %v2027_v34 }
  0xaf   : > { %1270 = vmatpush1.bf16.msra.mxu0 %v2022_v37  ;;  %1399 = vmatpush1.bf16.msra.mxu1 %v2025_v38 }
  0xb0   : > { %1750 = vmatprep.subr.msk.bf16.mxu0 %vm1156_vm1, %v1747_v39  ;;  %1752 = vmatprep.subr.msk.bf16.mxu1 %vm1156_vm1, %v1749_v40 }
  0xb3   : > { %1272 = vmatpush1.bf16.msra.mxu0 %v1158_v43  ;;  %1401 = vmatpush1.bf16.msra.mxu1 %v1164_v44 }
  0xb6   : > { %1288 = vmatmul.mubr.bf16.vlgmr.msra.gmra.mrb[0].mxu0 %v2034_v45  ;;  %1417 = vmatmul.mubr.bf16.vlgmr.msra.gmra.mrb[0].mxu1 %v2034_v45 }
 0x189   : > { %v1289_v46 = vpop.f32.mrb[0].mxu0  ;;  %v1418_v47 = vpop.f32.mrb[0].mxu1 }
 0x18a   : > { %vm1427_vm2 = vcmp.ge.f32.partialorder %v1289_v46, 0.0  ;;  %v1435_v48 = vmul.f32 0.2, %v1289_v46  ;;  %v1437_v49 = vmul.f32 0.2, %v1418_v47  ;;  %v1291_v50 = vpop.f32.mrb[1].mxu0 }
 0x18b   : > { %v1420_v51 = vpop.f32.mrb[1].mxu1  ;;  %vm1428_vm3 = vcmp.ge.f32.partialorder %v1291_v50, 0.0  ;;  %v1436_v53 = vmul.f32 0.2, %v1291_v50  ;;  %v1293_v54 = vpop.f32.mrb[2].mxu0  ;;  %vm1429_vm6 = vcmp.ge.f32.partialorder %v1418_v47, 0.0 }
 0x18c   : > { %v1443_v52 = vsel %vm1427_vm2, %v1289_v46, %v1435_v48  ;;  %v1422_v55 = vpop.f32.mrb[2].mxu1  ;;  %vm1430_vm4 = vcmp.ge.f32.partialorder %v1420_v51, 0.0  ;;  %v1438_v56 = vmul.f32 0.2, %v1420_v51  ;;  %vm1431_vm5 = vcmp.ge.f32.partialorder %v1293_v54, 0.0  ;;  %v1295_v59 = vpop.f32.mrb[3].mxu0 }
 0x18d   : > { %v1439_v57 = vmul.f32 0.2, %v1293_v54  ;;  %v1444_v58 = vsel %vm1428_vm3, %v1291_v50, %v1436_v53  ;;  %v1424_v60 = vpop.f32.mrb[3].mxu1  ;;  %v1441_v62 = vmul.f32 0.2, %v1422_v55  ;;  %vm1432_vm8 = vcmp.ge.f32.partialorder %v1295_v59, 0.0 }
 0x18e   : > { %v1440_v63 = vmul.f32 0.2, %v1295_v59  ;;  %vm1433_vm9 = vcmp.ge.f32.partialorder %v1422_v55, 0.0  ;;  %v1442_v0 = vmul.f32 0.2, %v1424_v60  ;;  %v1446_v1 = vsel %vm1430_vm4, %v1420_v51, %v1438_v56 }
 0x18f   : > { %v1447_v61 = vsel %vm1431_vm5, %v1293_v54, %v1439_v57  ;;  %v1451_v2 = vadd.f32 %v1444_v58, %v1443_v52  ;;  %vm1434_vm10 = vcmp.ge.f32.partialorder %v1424_v60, 0.0  ;;  %v1445_v4 = vsel %vm1429_vm6, %v1418_v47, %v1437_v49 }
 0x190   : > { %v1448_v3 = vsel %vm1432_vm8, %v1295_v59, %v1440_v63  ;;  %v1449_v7 = vsel %vm1433_vm9, %v1422_v55, %v1441_v62  ;;  %v1454_v8 = vsel %vm1453_vm7, %v1446_v1, 0.0  ;;  %v1450_v9 = vsel %vm1434_vm10, %v1424_v60, %v1442_v0 }
 0x191   : > { %v1458_v5 = vadd.f32 %v1448_v3, %v1447_v61  ;;  %v1452_v6 = vadd.f32 %v1451_v2, %v1445_v4  ;;  %v1460_v12 = vsel %vm1453_vm7, %v1450_v9, 0.0 }
 0x193   : > { %v1455_v10 = vadd.f32 %v1454_v8, %v1452_v6  ;;  %v1459_v11 = vadd.f32 %v1458_v5, %v1449_v7 }
 0x195   : > { %1456 = vadd.xlane.f32.xlu0 %v1455_v10  ;;  %v1461_v13 = vadd.f32 %v1460_v12, %v1459_v11 }
 0x199   : > { %1462 = vadd.xlane.f32.xlu0 %v1461_v13 }
 0x222   : > { %v1457_v14 = vpop.xlane.xlu0 %1456 }
 0x223   : > { %v1465_v15 = vmul.f32 0.0025, %v1457_v14 }
 0x225   : > { %v1467_v16 = vsub.f32 %v1443_v52, %v1465_v15  ;;  %v1468_v17 = vsub.f32 %v1444_v58, %v1465_v15  ;;  %v1469_v18 = vsub.f32 %v1445_v4, %v1465_v15  ;;  %v1470_v19 = vsub.f32 %v1446_v1, %v1465_v15 }
 0x226   : > { %v1463_v20 = vpop.xlane.xlu0 %1462 }
 0x227   : > { %v1466_v21 = vmul.f32 0.0025, %v1463_v20  ;;  %v1475_v22 = vmul.f32 %v1467_v16, %v1467_v16  ;;  %v1476_v23 = vmul.f32 %v1468_v17, %v1468_v17  ;;  %v1477_v24 = vmul.f32 %v1469_v18, %v1469_v18 }
 0x228   : > { %v1478_v25 = vmul.f32 %v1470_v19, %v1470_v19 }
 0x229   : > { %v1471_v26 = vsub.f32 %v1447_v61, %v1466_v21  ;;  %v1472_v27 = vsub.f32 %v1448_v3, %v1466_v21  ;;  %v1483_v28 = vadd.f32 %v1476_v23, %v1475_v22  ;;  %v1473_v29 = vsub.f32 %v1449_v7, %v1466_v21 }
 0x22a   : > { %v1474_v30 = vsub.f32 %v1450_v9, %v1466_v21  ;;  %v1485_v34 = vsel %vm1453_vm7, %v1478_v25, 0.0 }
 0x22b   : > { %v1484_v31 = vadd.f32 %v1483_v28, %v1477_v24  ;;  %v1479_v32 = vmul.f32 %v1471_v26, %v1471_v26  ;;  %v1480_v33 = vmul.f32 %v1472_v27, %v1472_v27  ;;  %v1481_v37 = vmul.f32 %v1473_v29, %v1473_v29 }
 0x22c   : > { %v1482_v35 = vmul.f32 %v1474_v30, %v1474_v30 }
 0x22d   : > { %v1486_v36 = vadd.f32 %v1485_v34, %v1484_v31  ;;  %v1489_v38 = vadd.f32 %v1480_v33, %v1479_v32 }
 0x22e   : > { %v1491_v40 = vsel %vm1453_vm7, %v1482_v35, 0.0 }
 0x22f   : > { %1487 = vadd.xlane.f32.xlu1 %v1486_v36  ;;  %v1490_v39 = vadd.f32 %v1489_v38, %v1481_v37 }
 0x231   : > { %v1492_v41 = vadd.f32 %v1491_v40, %v1490_v39 }
 0x233   : > { %1493 = vadd.xlane.f32.xlu1 %v1492_v41 }
 0x2bc   : > { %v1488_v42 = vpop.xlane.xlu1 %1487 }
 0x2bd   : > { %v1495_v43 = vmul.f32 0.0025, %v1488_v42 }
 0x2bf   : > { %v1497_v44 = vadd.f32 1e-05, %v1495_v43 }
 0x2c0   : > { %v1494_v45 = vpop.xlane.xlu1 %1493 }
 0x2c1   : > { %2035 = vrsqrt.f32 %v1497_v44  ;;  %v1496_v46 = vmul.f32 0.0025, %v1494_v45 }
 0x2c3   : > { %v1498_v47 = vadd.f32 1e-05, %v1496_v46 }
 0x2c5   : > { %2037 = vrsqrt.f32 %v1498_v47 }
 0x2cb   : > { %v2036_v48 = vpop.eup %2035 }
 0x2cc   : > { %v1501_v49 = vmul.f32 %v2036_v48, %v1467_v16  ;;  %v1502_v50 = vmul.f32 %v2036_v48, %v1468_v17  ;;  %v1503_v51 = vmul.f32 %v2036_v48, %v1469_v18  ;;  %v1504_v52 = vmul.f32 %v2036_v48, %v1470_v19 }
 0x2ce   : > { %1509 = vst [vmem:[%s143_s30] sm:$0xff] %v1501_v49  ;;  %1510 = vst [vmem:[%s143_s30 + $0x8] sm:$0xff] %v1502_v50 }
 0x2cf   : > { %1511 = vst [vmem:[%s143_s30 + $0x10] sm:$0xff] %v1503_v51  ;;  %1512 = vst.msk [vmem:[%s143_s30 + $0x18] sm:$0xff] %vm1453_vm7, %v1504_v52  ;;  %v2038_v53 = vpop.eup %2037 }
 0x2d0   : > { %v1505_v54 = vmul.f32 %v2038_v53, %v1471_v26  ;;  %v1506_v55 = vmul.f32 %v2038_v53, %v1472_v27  ;;  %v1507_v56 = vmul.f32 %v2038_v53, %v1473_v29  ;;  %v1508_v57 = vmul.f32 %v2038_v53, %v1474_v30 }
 0x2d2   : > { %1513 = vst [vmem:[%s143_s30 + $0x20] sm:$0xff] %v1505_v54  ;;  %1514 = vst [vmem:[%s143_s30 + $0x28] sm:$0xff] %v1506_v55 }
 0x2d3   : > { %1515 = vst [vmem:[%s143_s30 + $0x30] sm:$0xff] %v1507_v56  ;;  %1516 = vst.msk [vmem:[%s143_s30 + $0x38] sm:$0xff] %vm1453_vm7, %v1508_v57 }
 0x2d4 PF: > { %s12_s9 = sadd.s32 1, %s2045_s9  }
 0x2d5   : > { %p9_p4 = scmp.ge.s32.totalorder %s12_s9, 4  }
 0x2d7   :  { %11 = sbr.rel (!%p9_p4) target bundleno = 1 (0x1), region = 58 }

// kernel: netD_forward.7
= control target key start
LH: loop header
LB: loop body
LE: loop exit
PB: predicated region body
PF: predicated region fallthrough
CT: control target
= control target key end

     0   :  { %s1771_s9 = smov 0   ;;  %s1953_s0 = inlined_call_operand.vmem [shape: bf16[2,1296,100], index: 0, kind: input, shape index: {}]   ;;  %s1954_s1 = inlined_call_operand.vmem [shape: bf16[32,1296], index: 1, kind: input, shape index: {}]   ;;  %s1955_s2 = inlined_call_operand.vmem [shape: f32[2,32,100], index: 2, kind: output, shape index: {}]  }
   0x1 LB: > { %s1353_s10 = sadd.s32 4294967295, %s1754_s9   ;;  %p1357_p0 = scmp.ge.s32.totalorder %s1754_s9, 1  ;;  %s1754_s9 = sphi %s1771_s9, %s12_s9  }
   0x2   : > { %p112_p1 = scmp.lt.s32.totalorder %s1754_s9, 3 }
   0x4   : > { %p113_p2 = pnand %p1357_p0, %p112_p1 }
   0x5   : > { %p134_p3 = scmp.lt.s32.totalorder (!%p113_p2), %s1353_s10, 1  ;;  %v1661_v0 = vld [vmem:[%s1954_s1 + $0x4] ss:$44 sps:$4 sm:$0xff] (!%p113_p2)   ;;  %v1664_v1 = vld [vmem:[%s1954_s1 + $0xc] ss:$44 sps:$4 sm:$0xff] (!%p113_p2)   ;;  %vm927_vm0 = vcmask (!%p113_p2), 130048  }
   0x6   : > { %116 = sbr.rel (%p113_p2) target bundleno = 659 (0x293), region = 28  ;;  %966 = vmatprep.mubr.bf16.mxu0 (!%p113_p2), %v1661_v0  ;;  %1015 = vmatprep.mubr.bf16.mxu1 (!%p113_p2), %v1664_v1  ;;  %v1659_v32 = vld [vmem:[%s1954_s1] ss:$44 sps:$4 sm:$0xff] (!%p113_p2)   ;;  %v1662_v34 = vld [vmem:[%s1954_s1 + $0x8] ss:$44 sps:$4 sm:$0xff] (!%p113_p2)   ;;  %vm1240_vm2 = vcmask (!%p113_p2), 818176  }
   0x7   : > { %v1686_v36 = vld [vmem:[%s1954_s1 + $0x5c] ss:$44 sps:$4 sm:$0xff] (!%p113_p2)   ;;  %v1688_v39 = vld [vmem:[%s1954_s1 + $0x64] ss:$44 sps:$4 sm:$0xff] (!%p113_p2)   ;;  %v1692_v47 = vld [vmem:[%s1954_s1 + $0x60] ss:$44 sps:$4 sm:$0xff] (!%p113_p2)  }
   0x8   : > { %v1691_v44 = vld [vmem:[%s1954_s1 + $0x58] ss:$44 sps:$4 sm:$0xff] (!%p113_p2)   ;;  %v1704_v48 = vld [vmem:[%s1954_s1 + $0x14] ss:$44 sps:$4 sm:$0xff] (!%p113_p2)  }
   0xd   : > { %s1957_s10 = smov (!%p134_p3, %s1353_s10), 1 }
   0xe   : > { %s1618_s15 = smul.u32 648, %s1957_s10 }
  0x10   : > { %s1791_s18 = scalar_lea.vmem %s1953_s0, %s1618_s15 }
  0x11   : > { %v1627_v2 = vld [vmem:[%s1791_s18 + $0x40] sm:$0xff]   ;;  %v1631_v6 = vld [vmem:[%s1791_s18 + $0x48] sm:$0xff]   ;;  %v1635_v10 = vld [vmem:[%s1791_s18 + $0x50] sm:$0xff]  }
  0x12   : > { %v1628_v3 = vld [vmem:[%s1791_s18 + $0xc0] sm:$0xff]   ;;  %1469 = vmatprep.subr.bf16.mxu0 %v1627_v2  ;;  %v1632_v7 = vld [vmem:[%s1791_s18 + $0xc8] sm:$0xff]   ;;  %v1636_v11 = vld [vmem:[%s1791_s18 + $0xd0] sm:$0xff]  }
  0x13   : > { %v1629_v4 = vld [vmem:[%s1791_s18] sm:$0xff]   ;;  %1497 = vmatprep.subr.bf16.mxu1 %v1628_v3  ;;  %v1633_v8 = vld [vmem:[%s1791_s18 + $0x8] sm:$0xff]   ;;  %v1637_v12 = vld [vmem:[%s1791_s18 + $0x10] sm:$0xff]  }
  0x14   : > { %v1630_v5 = vld [vmem:[%s1791_s18 + $0x80] sm:$0xff]   ;;  %1470 = vmatpush3.bf16.msra.mxu0 %v1629_v4  ;;  %v1634_v9 = vld [vmem:[%s1791_s18 + $0x88] sm:$0xff]   ;;  %v1638_v13 = vld [vmem:[%s1791_s18 + $0x90] sm:$0xff]  }
  0x15   : > { %1498 = vmatpush3.bf16.msra.mxu1 %v1630_v5  ;;  %1471 = vmatprep.subr.bf16.mxu0 %v1631_v6  ;;  %v1639_v14 = vld [vmem:[%s1791_s18 + $0x58] sm:$0xff]   ;;  %v1643_v18 = vld [vmem:[%s1791_s18 + $0x60] sm:$0xff]   ;;  %v1647_v22 = vld [vmem:[%s1791_s18 + $0x68] sm:$0xff]  }
  0x16   : > { %1499 = vmatprep.subr.bf16.mxu1 %v1632_v7  ;;  %v1640_v15 = vld [vmem:[%s1791_s18 + $0xd8] sm:$0xff]   ;;  %v1644_v19 = vld [vmem:[%s1791_s18 + $0xe0] sm:$0xff]   ;;  %v1648_v23 = vld [vmem:[%s1791_s18 + $0xe8] sm:$0xff]  }
  0x17   : > { %v1641_v16 = vld [vmem:[%s1791_s18 + $0x18] sm:$0xff]   ;;  %v1645_v20 = vld [vmem:[%s1791_s18 + $0x20] sm:$0xff]   ;;  %v1649_v24 = vld [vmem:[%s1791_s18 + $0x28] sm:$0xff]  }
  0x18   : > { %1472 = vmatpush3.bf16.msra.mxu0 %v1633_v8  ;;  %v1642_v17 = vld [vmem:[%s1791_s18 + $0x98] sm:$0xff]   ;;  %v1646_v21 = vld [vmem:[%s1791_s18 + $0xa0] sm:$0xff]   ;;  %v1650_v25 = vld [vmem:[%s1791_s18 + $0xa8] sm:$0xff]  }
  0x19   : > { %1500 = vmatpush3.bf16.msra.mxu1 %v1634_v9  ;;  %1473 = vmatprep.subr.bf16.mxu0 %v1635_v10  ;;  %v1651_v26 = vld [vmem:[%s1791_s18 + $0x70] sm:$0xff]   ;;  %v1655_v30 = vld [vmem:[%s1791_s18 + $0x78] sm:$0xff]   ;;  %v1665_v37 = vld [vmem:[%s1791_s18 + $0x140] sm:$0xff]  }
  0x1a   : > { %1501 = vmatprep.subr.bf16.mxu1 %v1636_v11  ;;  %v1652_v27 = vld [vmem:[%s1791_s18 + $0xf0] sm:$0xff]   ;;  %v1656_v31 = vld [vmem:[%s1791_s18 + $0xf8] sm:$0xff]   ;;  %v1666_v38 = vld [vmem:[%s1791_s18 + $0x100] sm:$0xff]  }
  0x1b   : > { %v1653_v28 = vld [vmem:[%s1791_s18 + $0x30] sm:$0xff]   ;;  %v1657_v33 = vld [vmem:[%s1791_s18 + $0x38] sm:$0xff]   ;;  %v1667_v40 = vld [vmem:[%s1791_s18 + $0x1c0] sm:$0xff]  }
  0x1c   : > { %1474 = vmatpush3.bf16.msra.mxu0 %v1637_v12  ;;  %v1654_v29 = vld [vmem:[%s1791_s18 + $0xb0] sm:$0xff]   ;;  %v1658_v35 = vld [vmem:[%s1791_s18 + $0xb8] sm:$0xff]   ;;  %v1668_v41 = vld [vmem:[%s1791_s18 + $0x180] sm:$0xff]  }
  0x1d   : > { %1502 = vmatpush3.bf16.msra.mxu1 %v1638_v13  ;;  %1475 = vmatprep.subr.bf16.mxu0 %v1639_v14  ;;  %v1669_v42 = vld [vmem:[%s1791_s18 + $0x148] sm:$0xff]   ;;  %v1673_v49 = vld [vmem:[%s1791_s18 + $0x150] sm:$0xff]   ;;  %v1677_v53 = vld [vmem:[%s1791_s18 + $0x158] sm:$0xff]  }
  0x1e   : > { %1503 = vmatprep.subr.bf16.mxu1 %v1640_v15  ;;  %v1670_v43 = vld [vmem:[%s1791_s18 + $0x108] sm:$0xff]   ;;  %v1674_v50 = vld [vmem:[%s1791_s18 + $0x110] sm:$0xff]   ;;  %v1678_v54 = vld [vmem:[%s1791_s18 + $0x118] sm:$0xff]  }
  0x1f   : > { %v1671_v45 = vld [vmem:[%s1791_s18 + $0x1c8] sm:$0xff]   ;;  %v1675_v51 = vld [vmem:[%s1791_s18 + $0x1d0] sm:$0xff]   ;;  %v1679_v55 = vld [vmem:[%s1791_s18 + $0x1d8] sm:$0xff]  }
  0x20   : > { %1476 = vmatpush3.bf16.msra.mxu0 %v1641_v16  ;;  %v1672_v46 = vld [vmem:[%s1791_s18 + $0x188] sm:$0xff]   ;;  %v1676_v52 = vld [vmem:[%s1791_s18 + $0x190] sm:$0xff]   ;;  %v1680_v56 = vld [vmem:[%s1791_s18 + $0x198] sm:$0xff]  }
  0x21   : > { %1504 = vmatpush3.bf16.msra.mxu1 %v1642_v17  ;;  %1477 = vmatprep.subr.bf16.mxu0 %v1643_v18  ;;  %v1681_v57 = vld [vmem:[%s1791_s18 + $0x160] sm:$0xff]   ;;  %v1685_v61 = vld [vmem:[%s1791_s18 + $0x168] sm:$0xff]   ;;  %v1695_v1 = vld [vmem:[%s1791_s18 + $0x170] sm:$0xff]  }
  0x22   : > { %1505 = vmatprep.subr.bf16.mxu1 %v1644_v19  ;;  %v1682_v58 = vld [vmem:[%s1791_s18 + $0x120] sm:$0xff]   ;;  %v1690_v62 = vld [vmem:[%s1791_s18 + $0x128] sm:$0xff]   ;;  %v1696_v2 = vld [vmem:[%s1791_s18 + $0x130] sm:$0xff]  }
  0x23   : > { %v1683_v59 = vld [vmem:[%s1791_s18 + $0x1e0] sm:$0xff]   ;;  %v1693_v63 = vld [vmem:[%s1791_s18 + $0x1e8] sm:$0xff]   ;;  %v1697_v3 = vld [vmem:[%s1791_s18 + $0x1f0] sm:$0xff]  }
  0x24   : > { %1478 = vmatpush3.bf16.msra.mxu0 %v1645_v20  ;;  %v1684_v60 = vld [vmem:[%s1791_s18 + $0x1a0] sm:$0xff]   ;;  %v1694_v0 = vld [vmem:[%s1791_s18 + $0x1a8] sm:$0xff]   ;;  %v1698_v4 = vld [vmem:[%s1791_s18 + $0x1b0] sm:$0xff]  }
  0x25   : > { %1506 = vmatpush3.bf16.msra.mxu1 %v1646_v21  ;;  %1479 = vmatprep.subr.bf16.mxu0 %v1647_v22  ;;  %v1699_v5 = vld [vmem:[%s1791_s18 + $0x178] sm:$0xff]   ;;  %v1706_v10 = vld [vmem:[%s1791_s18 + $0x240] sm:$0xff]   ;;  %v1711_v14 = vld [vmem:[%s1791_s18 + $0x248] sm:$0xff]  }
  0x26   : > { %1507 = vmatprep.subr.bf16.mxu1 %v1648_v23  ;;  %v1700_v6 = vld [vmem:[%s1791_s18 + $0x138] sm:$0xff]   ;;  %v1710_v13 = vld [vmem:[%s1791_s18 + $0x200] sm:$0xff]   ;;  %v1712_v15 = vld [vmem:[%s1791_s18 + $0x208] sm:$0xff]  }
  0x27   : > { %v1702_v7 = vld [vmem:[%s1954_s1 + $0x10] ss:$44 sps:$4 sm:$0xff]   ;;  %v1707_v11 = vld [vmem:[%s1954_s1 + $0x18] ss:$44 sps:$4 sm:$0xff]   ;;  %v1715_v17 = vld [vmem:[%s1954_s1 + $0x68] ss:$44 sps:$4 sm:$0xff]  }
  0x28   : > { %1480 = vmatpush3.bf16.msra.mxu0 %v1649_v24  ;;  %v1701_v8 = vld [vmem:[%s1791_s18 + $0x1f8] sm:$0xff]   ;;  %v1716_v18 = vld [vmem:[%s1791_s18 + $0x250] sm:$0xff]   ;;  %v1723_v24 = vld [vmem:[%s1791_s18 + $0x260] sm:$0xff]  }
  0x29   : > { %1508 = vmatpush3.bf16.msra.mxu1 %v1650_v25  ;;  %1481 = vmatprep.subr.bf16.mxu0 %v1651_v26  ;;  %v1705_v9 = vld [vmem:[%s1791_s18 + $0x1b8] sm:$0xff]   ;;  %v1717_v19 = vld [vmem:[%s1954_s1 + $0x74] ss:$44 sps:$4 sm:$0xff]  }
  0x2a   : > { %1509 = vmatprep.subr.bf16.mxu1 %v1652_v27  ;;  %v1709_v12 = vld [vmem:[%s1954_s1 + $0x1c] ss:$44 sps:$4 sm:$0xff]   ;;  %v1713_v16 = vld [vmem:[%s1954_s1 + $0x6c] ss:$44 sps:$4 sm:$0xff]   ;;  %v1719_v20 = vld [vmem:[%s1791_s18 + $0x210] sm:$0xff]  }
  0x2b   : > { %v1720_v21 = vld [vmem:[%s1954_s1 + $0x70] ss:$44 sps:$4 sm:$0xff]   ;;  %v1724_v25 = vld [vmem:[%s1791_s18 + $0x220] sm:$0xff]   ;;  %v1725_v27 = vld [vmem:[%s1791_s18 + $0x268] sm:$0xff]  }
  0x2c   : > { %1482 = vmatpush3.bf16.msra.mxu0 %v1653_v28  ;;  %v1721_v22 = vld [vmem:[%s1791_s18 + $0x258] sm:$0xff]   ;;  %v1727_v26 = vld [vmem:[%s1791_s18 + $0x280] sm:$0xff]   ;;  %v1726_v28 = vld [vmem:[%s1791_s18 + $0x228] sm:$0xff]  }
  0x2d   : > { %1510 = vmatpush3.bf16.msra.mxu1 %v1654_v29  ;;  %1483 = vmatprep.subr.bf16.mxu0 %v1655_v30  ;;  %v1722_v23 = vld [vmem:[%s1791_s18 + $0x218] sm:$0xff]   ;;  %v1728_v29 = vld [vmem:[%s1791_s18 + $0x270] sm:$0xff]  }
  0x2e   : > { %1511 = vmatprep.subr.bf16.mxu1 %v1656_v31  ;;  %v1734_v30 = vld [vmem:[%s1954_s1 + $0x24] ss:$44 sps:$4 sm:$0xff]   ;;  %v1735_v31 = vld [vmem:[%s1954_s1 + $0x28] ss:$44 sps:$4 sm:$0xff]  }
  0x30   : > { %1484 = vmatpush3.bf16.msra.mxu0 %v1657_v33  ;;  %v1729_v33 = vld [vmem:[%s1791_s18 + $0x230] sm:$0xff]  }
  0x31   : > { %1512 = vmatpush3.bf16.msra.mxu1 %v1658_v35  ;;  %1525 = vmatprep.subr.bf16.mxu0 %v1665_v37  ;;  %v1731_v35 = vld [vmem:[%s1791_s18 + $0x238] sm:$0xff]  }
  0x32   : > { %1553 = vmatprep.subr.bf16.mxu1 %v1667_v40  ;;  %v1737_v37 = vld [vmem:[%s1954_s1 + $0x7c] ss:$44 sps:$4 sm:$0xff]  }
  0x33   : > { %967 = vmatmul.mubr.bf16.vlgmr.msra.gmra.mrb[0].mxu0 %v1659_v32  ;;  %v1736_v32 = vld [vmem:[%s1954_s1 + $0x80] ss:$44 sps:$4 sm:$0xff]  }
  0x34   : > { %1016 = vmatmul.mubr.bf16.vlgmr.msra.gmra.mrb[0].mxu1 %v1662_v34  ;;  %1526 = vmatpush3.bf16.msra.mxu0 %v1666_v38  ;;  %v1730_v34 = vld [vmem:[%s1791_s18 + $0x278] sm:$0xff]   ;;  %s1468_s18 = sshll.u32 %s1957_s10, 5 }
  0x35   : > { %974 = vmatprep.mubr.bf16.mxu0 %v1686_v36  ;;  %1554 = vmatpush3.bf16.msra.mxu1 %v1668_v41  ;;  %v1732_v36 = vld [vmem:[%s1954_s1 + $0x20] ss:$44 sps:$4 sm:$0xff]   ;;  %v1739_v38 = vld [vmem:[%s1954_s1 + $0x78] ss:$44 sps:$4 sm:$0xff]   ;;  %s143_s8 = scalar_lea.vmem %s1955_s2, %s1468_s18 }
  0x36   : > { %1527 = vmatprep.subr.bf16.mxu0 %v1669_v42  ;;  %1023 = vmatprep.mubr.bf16.mxu1 %v1688_v39 }
  0x37   : > { %1555 = vmatprep.subr.bf16.mxu1 %v1671_v45 }
  0x38   : > { %1528 = vmatpush3.bf16.msra.mxu0 %v1670_v43 }
  0x39   : > { %1556 = vmatpush3.bf16.msra.mxu1 %v1672_v46  ;;  %1529 = vmatprep.subr.bf16.mxu0 %v1673_v49 }
  0x3a   : > { %1557 = vmatprep.subr.bf16.mxu1 %v1675_v51 }
  0x3b   : > { %975 = vmatmul.mubr.bf16.gmra.mrb[4].mxu0 %v1691_v44 }
  0x3c   : > { %1530 = vmatpush3.bf16.msra.mxu0 %v1674_v50  ;;  %1024 = vmatmul.mubr.bf16.gmra.mrb[4].mxu1 %v1692_v47 }
  0x3d   : > { %1064 = vmatprep.mubr.bf16.mxu0 %v1704_v48  ;;  %1558 = vmatpush3.bf16.msra.mxu1 %v1676_v52 }
  0x3e   : > { %1531 = vmatprep.subr.bf16.mxu0 %v1677_v53  ;;  %1559 = vmatprep.subr.bf16.mxu1 %v1679_v55 }
  0x3f   : > { %1113 = vmatprep.mubr.bf16.mxu1 %v1709_v12 }
  0x40   : > { %1532 = vmatpush3.bf16.msra.mxu0 %v1678_v54 }
  0x41   : > { %1560 = vmatpush3.bf16.msra.mxu1 %v1680_v56  ;;  %1533 = vmatprep.subr.bf16.mxu0 %v1681_v57 }
  0x42   : > { %1561 = vmatprep.subr.bf16.mxu1 %v1683_v59 }
  0x44   : > { %1534 = vmatpush3.bf16.msra.mxu0 %v1682_v58 }
  0x45   : > { %1562 = vmatpush3.bf16.msra.mxu1 %v1684_v60  ;;  %1535 = vmatprep.subr.bf16.mxu0 %v1685_v61 }
  0x46   : > { %1563 = vmatprep.subr.bf16.mxu1 %v1693_v63 }
  0x48   : > { %1536 = vmatpush3.bf16.msra.mxu0 %v1690_v62 }
  0x49   : > { %1564 = vmatpush3.bf16.msra.mxu1 %v1694_v0  ;;  %1537 = vmatprep.subr.bf16.mxu0 %v1695_v1 }
  0x4a   : > { %1565 = vmatprep.subr.bf16.mxu1 %v1697_v3 }
  0x4c   : > { %1538 = vmatpush3.bf16.msra.mxu0 %v1696_v2 }
  0x4d   : > { %1566 = vmatpush3.bf16.msra.mxu1 %v1698_v4  ;;  %1539 = vmatprep.subr.bf16.mxu0 %v1699_v5 }
  0x4e   : > { %1567 = vmatprep.subr.bf16.mxu1 %v1701_v8 }
  0x50   : > { %1540 = vmatpush3.bf16.msra.mxu0 %v1700_v6 }
  0x51   : > { %1568 = vmatpush3.bf16.msra.mxu1 %v1705_v9  ;;  %1581 = vmatprep.subr.bf16.mxu0 %v1706_v10 }
  0x52   : > { %1612 = vmatprep.subr.bf16.mxu1 %v1727_v26 }
  0x53   : > { %1065 = vmatmul.mubr.bf16.vlgmr.msra.gmra.mrb[8].mxu0 %v1702_v7 }
  0x54   : > { %1582 = vmatpush3.bf16.msra.mxu0 %v1710_v13  ;;  %1114 = vmatmul.mubr.bf16.vlgmr.msra.gmra.mrb[8].mxu1 %v1707_v11 }
  0x55   : > { %1583 = vmatprep.subr.bf16.mxu0 %v1711_v14  ;;  %1072 = vmatprep.mubr.bf16.mxu0 %v1713_v16 }
  0x56   : > { %1121 = vmatprep.mubr.bf16.mxu1 %v1717_v19  ;;  %1613 = vmatpush3.bf16.msra.mxu1 %v1727_v26 }
  0x58   : > { %1584 = vmatpush3.bf16.msra.mxu0 %v1712_v15 }
  0x59   : > { %1585 = vmatprep.subr.bf16.mxu0 %v1716_v18 }
  0x5b   : > { %1073 = vmatmul.mubr.bf16.gmra.mrb[12].mxu0 %v1715_v17 }
  0x5c   : > { %1586 = vmatpush3.bf16.msra.mxu0 %v1719_v20  ;;  %1122 = vmatmul.mubr.bf16.gmra.mrb[12].mxu1 %v1720_v21 }
  0x5d   : > { %1587 = vmatprep.subr.bf16.mxu0 %v1721_v22  ;;  %1162 = vmatprep.mubr.bf16.mxu0 %v1734_v30 }
  0x5e   : > { %1614 = vmatprep.mubr.msk.bf16.mxu1 %vm927_vm0, %v1735_v31 }
  0x60   : > { %1588 = vmatpush3.bf16.msra.mxu0 %v1722_v23 }
  0x61   : > { %1589 = vmatprep.subr.bf16.mxu0 %v1723_v24 }
  0x64   : > { %1590 = vmatpush3.bf16.msra.mxu0 %v1724_v25  ;;  %1615 = vmatmul.mubr.msk.bf16.vlgmr.msra.gmra.mrb[16].mxu1 %vm927_vm0, %v1736_v32 }
  0x65   : > { %1591 = vmatprep.subr.bf16.mxu0 %v1725_v27 }
  0x68   : > { %1592 = vmatpush3.bf16.msra.mxu0 %v1726_v28 }
  0x69   : > { %1593 = vmatprep.subr.bf16.mxu0 %v1728_v29 }
  0x6c   : > { %1594 = vmatpush3.bf16.msra.mxu0 %v1729_v33 }
  0x6d   : > { %1595 = vmatprep.subr.bf16.mxu0 %v1730_v34 }
  0x70   : > { %1596 = vmatpush3.bf16.msra.mxu0 %v1731_v35 }
  0x73   : > { %1163 = vmatmul.mubr.bf16.vlgmr.msra.gmra.mrb[16].mxu0 %v1732_v36 }
  0x74   : > { %1170 = vmatprep.mubr.bf16.mxu0 %v1737_v37 }
  0x7b   : > { %1171 = vmatmul.mubr.bf16.gmra.mrb[20].mxu0 %v1739_v38 }
 0x106   : > { %v1485_v39 = vpop.f32.mrb[0].mxu0 }
 0x107   : > { %v1513_v40 = vpop.f32.mrb[0].mxu1  ;;  %v1486_v41 = vpop.f32.mrb[1].mxu0 }
 0x108   : > { %v1487_v42 = vadd.f32 %v1486_v41, %v1485_v39  ;;  %v1514_v43 = vpop.f32.mrb[1].mxu1  ;;  %v1488_v44 = vpop.f32.mrb[2].mxu0 }
 0x109   : > { %v1515_v45 = vadd.f32 %v1514_v43, %v1513_v40  ;;  %v1516_v46 = vpop.f32.mrb[2].mxu1  ;;  %v1489_v47 = vpop.f32.mrb[3].mxu0 }
 0x10a   : > { %v1490_v48 = vadd.f32 %v1489_v47, %v1488_v44  ;;  %v1517_v49 = vpop.f32.mrb[3].mxu1 }
 0x10b   : > { %v1018_v50 = vadd.f32 %v1515_v45, %v1487_v42  ;;  %v1518_v51 = vadd.f32 %v1517_v49, %v1516_v46 }
 0x10d   : > { %v1021_v52 = vadd.f32 %v1518_v51, %v1490_v48 }
 0x10e   : > { %v1491_v53 = vpop.f32.mrb[4].mxu0 }
 0x10f   : > { %v1492_v54 = vpop.f32.mrb[5].mxu0  ;;  %v1519_v55 = vpop.f32.mrb[4].mxu1 }
 0x110   : > { %v1493_v56 = vadd.f32 %v1492_v54, %v1491_v53  ;;  %v1494_v57 = vpop.f32.mrb[6].mxu0  ;;  %v1520_v58 = vpop.f32.mrb[5].mxu1 }
 0x111   : > { %v1495_v59 = vpop.f32.mrb[7].mxu0  ;;  %v1521_v60 = vadd.f32 %v1520_v58, %v1519_v55  ;;  %v1522_v61 = vpop.f32.mrb[6].mxu1 }
 0x112   : > { %v1496_v62 = vadd.f32 %v1495_v59, %v1494_v57  ;;  %v1523_v63 = vpop.f32.mrb[7].mxu1 }
 0x113   : > { %v1026_v0 = vadd.f32 %v1521_v60, %v1493_v56  ;;  %v1524_v1 = vadd.f32 %v1523_v63, %v1522_v61 }
 0x115   : > { %v1029_v2 = vadd.f32 %v1524_v1, %v1496_v62 }
 0x126   : > { %v1541_v3 = vpop.f32.mrb[8].mxu0 }
 0x127   : > { %v1542_v4 = vpop.f32.mrb[9].mxu0  ;;  %v1569_v7 = vpop.f32.mrb[8].mxu1 }
 0x128   : > { %v1543_v5 = vadd.f32 %v1542_v4, %v1541_v3  ;;  %v1544_v6 = vpop.f32.mrb[10].mxu0  ;;  %v1570_v9 = vpop.f32.mrb[9].mxu1 }
 0x129   : > { %v1545_v8 = vpop.f32.mrb[11].mxu0  ;;  %v1571_v12 = vadd.f32 %v1570_v9, %v1569_v7  ;;  %v1572_v13 = vpop.f32.mrb[10].mxu1 }
 0x12a   : > { %v1067_v10 = vadd.f32 %v1543_v5, %v1018_v50  ;;  %v1546_v11 = vadd.f32 %v1545_v8, %v1544_v6  ;;  %v1573_v14 = vpop.f32.mrb[11].mxu1 }
 0x12b   : > { %v1574_v17 = vadd.f32 %v1573_v14, %v1572_v13 }
 0x12c   : > { %v1070_v15 = vadd.f32 %v1546_v11, %v1021_v52  ;;  %v1116_v16 = vadd.f32 %v1571_v12, %v1067_v10 }
 0x12e   : > { %v1119_v18 = vadd.f32 %v1574_v17, %v1070_v15  ;;  %v1547_v19 = vpop.f32.mrb[12].mxu0 }
 0x12f   : > { %v1548_v20 = vpop.f32.mrb[13].mxu0  ;;  %v1575_v23 = vpop.f32.mrb[12].mxu1 }
 0x130   : > { %v1549_v21 = vadd.f32 %v1548_v20, %v1547_v19  ;;  %v1550_v22 = vpop.f32.mrb[14].mxu0  ;;  %v1576_v25 = vpop.f32.mrb[13].mxu1 }
 0x131   : > { %v1551_v24 = vpop.f32.mrb[15].mxu0  ;;  %v1577_v28 = vadd.f32 %v1576_v25, %v1575_v23  ;;  %v1578_v29 = vpop.f32.mrb[14].mxu1 }
 0x132   : > { %v1075_v26 = vadd.f32 %v1549_v21, %v1026_v0  ;;  %v1552_v27 = vadd.f32 %v1551_v24, %v1550_v22  ;;  %v1579_v30 = vpop.f32.mrb[15].mxu1 }
 0x133   : > { %v1580_v33 = vadd.f32 %v1579_v30, %v1578_v29 }
 0x134   : > { %v1078_v31 = vadd.f32 %v1552_v27, %v1029_v2  ;;  %v1124_v32 = vadd.f32 %v1577_v28, %v1075_v26 }
 0x136   : > { %v1127_v34 = vadd.f32 %v1580_v33, %v1078_v31 }
 0x137   : > { %v1616_v35 = vpop.f32.mrb[16].mxu1 }
 0x138   : > { %v1213_v36 = vpop.f32.mrb[17].mxu1 }
 0x139   : > { %v1617_v37 = vpop.f32.mrb[18].mxu1 }
 0x13a   : > { %v1216_v38 = vpop.f32.mrb[19].mxu1 }
 0x146   : > { %v1597_v39 = vpop.f32.mrb[16].mxu0 }
 0x147   : > { %v1598_v40 = vpop.f32.mrb[17].mxu0 }
 0x148   : > { %v1599_v41 = vadd.f32 %v1598_v40, %v1597_v39  ;;  %v1600_v42 = vpop.f32.mrb[18].mxu0 }
 0x149   : > { %v1601_v43 = vpop.f32.mrb[19].mxu0 }
 0x14a   : > { %v1602_v44 = vadd.f32 %v1601_v43, %v1600_v42  ;;  %v1165_v45 = vadd.f32 %v1599_v41, %v1116_v16 }
 0x14c   : > { %v1214_v46 = vadd.f32 %v1213_v36, %v1165_v45  ;;  %v1168_v47 = vadd.f32 %v1602_v44, %v1119_v18 }
 0x14e   : > { %v1232_v48 = vmul.f32 0.2, %v1214_v46  ;;  %v1217_v49 = vadd.f32 %v1216_v38, %v1168_v47  ;;  %v1603_v50 = vpop.f32.mrb[20].mxu0  ;;  %vm1228_vm1 = vcmp.ge.f32.partialorder %v1214_v46, 0.0 }
 0x14f   : > { %v1604_v51 = vpop.f32.mrb[21].mxu0 }
 0x150   : > { %v1233_v52 = vmul.f32 0.2, %v1217_v49  ;;  %v1605_v53 = vadd.f32 %v1604_v51, %v1603_v50  ;;  %v1606_v54 = vpop.f32.mrb[22].mxu0  ;;  %v1236_v55 = vsel %vm1228_vm1, %v1214_v46, %v1232_v48  ;;  %vm1229_vm3 = vcmp.ge.f32.partialorder %v1217_v49, 0.0 }
 0x151   : > { %v1607_v56 = vpop.f32.mrb[23].mxu0  ;;  %v1241_v57 = vsel %vm1240_vm2, %v1236_v55, 0.0 }
 0x152   : > { %v1173_v58 = vadd.f32 %v1605_v53, %v1124_v32  ;;  %v1608_v59 = vadd.f32 %v1607_v56, %v1606_v54  ;;  %1242 = vadd.xlane.f32.xlu0 %v1241_v57  ;;  %v1237_v60 = vsel %vm1229_vm3, %v1217_v49, %v1233_v52 }
 0x153   : > { %v1244_v63 = vsel %vm1240_vm2, %v1237_v60, 0.0 }
 0x154   : > { %v1222_v61 = vadd.f32 %v1616_v35, %v1173_v58  ;;  %v1176_v62 = vadd.f32 %v1608_v59, %v1127_v34 }
 0x156   : > { %v1225_v0 = vadd.f32 %v1617_v37, %v1176_v62  ;;  %1245 = vadd.xlane.f32.xlu0 %v1244_v63  ;;  %vm1230_vm4 = vcmp.ge.f32.partialorder %v1222_v61, 0.0  ;;  %v1234_v1 = vmul.f32 0.2, %v1222_v61 }
 0x158   : > { %v1238_v2 = vsel %vm1230_vm4, %v1222_v61, %v1234_v1  ;;  %vm1231_vm5 = vcmp.ge.f32.partialorder %v1225_v0, 0.0  ;;  %v1235_v3 = vmul.f32 0.2, %v1225_v0 }
 0x159   : > { %v1247_v4 = vsel %vm1240_vm2, %v1238_v2, 0.0 }
 0x15a   : > { %1248 = vadd.xlane.f32.xlu1 %v1247_v4  ;;  %v1239_v5 = vsel %vm1231_vm5, %v1225_v0, %v1235_v3 }
 0x15b   : > { %v1250_v6 = vsel %vm1240_vm2, %v1239_v5, 0.0 }
 0x15e   : > { %1251 = vadd.xlane.f32.xlu1 %v1250_v6 }
 0x1df   : > { %v1243_v7 = vpop.xlane.xlu0 %1242 }
 0x1e0   : > { %v1254_v8 = vmul.f32 0.01, %v1243_v7 }
 0x1e2   : > { %v1258_v9 = vsub.f32 %v1236_v55, %v1254_v8 }
 0x1e3   : > { %v1246_v10 = vpop.xlane.xlu0 %1245 }
 0x1e4   : > { %v1255_v11 = vmul.f32 0.01, %v1246_v10  ;;  %v1262_v12 = vmul.f32 %v1258_v9, %v1258_v9 }
 0x1e6   : > { %v1259_v13 = vsub.f32 %v1237_v60, %v1255_v11  ;;  %v1266_v14 = vsel %vm1240_vm2, %v1262_v12, 0.0 }
 0x1e7   : > { %v1249_v15 = vpop.xlane.xlu1 %1248  ;;  %1267 = vadd.xlane.f32.xlu0 %v1266_v14 }
 0x1e8   : > { %v1256_v16 = vmul.f32 0.01, %v1249_v15  ;;  %v1263_v17 = vmul.f32 %v1259_v13, %v1259_v13 }
 0x1ea   : > { %v1260_v18 = vsub.f32 %v1238_v2, %v1256_v16  ;;  %v1269_v19 = vsel %vm1240_vm2, %v1263_v17, 0.0 }
 0x1eb   : > { %v1252_v20 = vpop.xlane.xlu1 %1251  ;;  %1270 = vadd.xlane.f32.xlu1 %v1269_v19 }
 0x1ec   : > { %v1257_v21 = vmul.f32 0.01, %v1252_v20  ;;  %v1264_v22 = vmul.f32 %v1260_v18, %v1260_v18 }
 0x1ee   : > { %v1261_v23 = vsub.f32 %v1239_v5, %v1257_v21  ;;  %v1272_v24 = vsel %vm1240_vm2, %v1264_v22, 0.0 }
 0x1ef   : > { %1273 = vadd.xlane.f32.xlu0 %v1272_v24 }
 0x1f0   : > { %v1265_v25 = vmul.f32 %v1261_v23, %v1261_v23 }
 0x1f2   : > { %v1275_v26 = vsel %vm1240_vm2, %v1265_v25, 0.0 }
 0x1f3   : > { %1276 = vadd.xlane.f32.xlu1 %v1275_v26 }
 0x274   : > { %v1268_v27 = vpop.xlane.xlu0 %1267 }
 0x275   : > { %v1278_v28 = vmul.f32 0.01, %v1268_v27 }
 0x277   : > { %v1282_v29 = vadd.f32 1e-05, %v1278_v28 }
 0x278   : > { %v1271_v30 = vpop.xlane.xlu1 %1270 }
 0x279   : > { %1740 = vrsqrt.f32 %v1282_v29  ;;  %v1279_v31 = vmul.f32 0.01, %v1271_v30 }
 0x27b   : > { %v1283_v32 = vadd.f32 1e-05, %v1279_v31 }
 0x27c   : > { %v1274_v33 = vpop.xlane.xlu0 %1273 }
 0x27d   : > { %1742 = vrsqrt.f32 %v1283_v32  ;;  %v1280_v34 = vmul.f32 0.01, %v1274_v33 }
 0x27f   : > { %v1284_v35 = vadd.f32 1e-05, %v1280_v34 }
 0x280   : > { %v1277_v36 = vpop.xlane.xlu1 %1276 }
 0x281   : > { %1744 = vrsqrt.f32 %v1284_v35  ;;  %v1281_v37 = vmul.f32 0.01, %v1277_v36 }
 0x283   : > { %v1741_v38 = vpop.eup %1740  ;;  %v1285_v39 = vadd.f32 1e-05, %v1281_v37 }
 0x284   : > { %v1290_v40 = vmul.f32 %v1741_v38, %v1258_v9 }
 0x285   : > { %1746 = vrsqrt.f32 %v1285_v39 }
 0x286   : > { %1294 = vst.msk [vmem:[%s143_s8] sm:$0xff] %vm1240_vm2, %v1290_v40 }
 0x287   : > { %v1743_v41 = vpop.eup %1742 }
 0x288   : > { %v1291_v42 = vmul.f32 %v1743_v41, %v1259_v13 }
 0x28a   : > { %1295 = vst.msk [vmem:[%s143_s8 + $0x8] sm:$0xff] %vm1240_vm2, %v1291_v42 }
 0x28b   : > { %v1745_v43 = vpop.eup %1744 }
 0x28c   : > { %v1292_v44 = vmul.f32 %v1745_v43, %v1260_v18 }
 0x28e   : > { %1296 = vst.msk [vmem:[%s143_s8 + $0x10] sm:$0xff] %vm1240_vm2, %v1292_v44 }
 0x28f   : > { %v1747_v45 = vpop.eup %1746 }
 0x290   : > { %v1293_v46 = vmul.f32 %v1747_v45, %v1261_v23 }
 0x292   : > { %1297 = vst.msk [vmem:[%s143_s8 + $0x18] sm:$0xff] %vm1240_vm2, %v1293_v46 }
 0x293 PF: > { %s12_s9 = sadd.s32 1, %s1754_s9  }
 0x294   : > { %p9_p4 = scmp.ge.s32.totalorder %s12_s9, 4  }
 0x296   :  { %11 = sbr.rel (!%p9_p4) target bundleno = 1 (0x1), region = 58 }

// kernel: netD_forward.8
= control target key start
LH: loop header
LB: loop body
LE: loop exit
PB: predicated region body
PF: predicated region fallthrough
CT: control target
= control target key end

     0   :  { %s3887_s9 = smov 0   ;;  %s4401_s0 = inlined_call_operand.vmem [shape: bf16[2,2592,25], index: 0, kind: input, shape index: {}]   ;;  %s4402_s1 = inlined_call_operand.vmem [shape: bf16[64,2592], index: 1, kind: input, shape index: {}]   ;;  %s4403_s2 = inlined_call_operand.vmem [shape: f32[2,64,25], index: 2, kind: output, shape index: {}]  }
   0x1 LB: > { %s2870_s10 = sadd.s32 4294967295, %s3870_s9   ;;  %p2874_p0 = scmp.ge.s32.totalorder %s3870_s9, 1  ;;  %s3870_s9 = sphi %s3887_s9, %s12_s9  }
   0x2   : > { %p112_p1 = scmp.lt.s32.totalorder %s3870_s9, 3 }
   0x4   : > { %p113_p2 = pnand %p2874_p0, %p112_p1 }
   0x5   : > { %p134_p3 = scmp.lt.s32.totalorder (!%p113_p2), %s2870_s10, 1  ;;  %v3596_v0 = vld [vmem:[%s4402_s1 + $0x4] ss:$84 sps:$4 sm:$0xff] (!%p113_p2)   ;;  %v3599_v1 = vld [vmem:[%s4402_s1 + $0xc] ss:$84 sps:$4 sm:$0xff] (!%p113_p2)   ;;  %vm1949_vm0 = vcmask (!%p113_p2), 261120  }
   0x6   : > { %116 = sbr.rel (%p113_p2) target bundleno = 755 (0x2f3), region = 28  ;;  %1994 = vmatprep.mubr.bf16.mxu0 (!%p113_p2), %v3596_v0  ;;  %2059 = vmatprep.mubr.bf16.mxu1 (!%p113_p2), %v3599_v1  ;;  %v3594_v32 = vld [vmem:[%s4402_s1] ss:$84 sps:$4 sm:$0xff] (!%p113_p2)   ;;  %v3597_v34 = vld [vmem:[%s4402_s1 + $0x8] ss:$84 sps:$4 sm:$0xff] (!%p113_p2)   ;;  %vm2701_vm1 = vcmask (!%p113_p2), 203776  }
   0x7   : > { %v3608_v36 = vld [vmem:[%s4402_s1 + $0xac] ss:$84 sps:$4 sm:$0xff] (!%p113_p2)   ;;  %v3610_v38 = vld [vmem:[%s4402_s1 + $0xb4] ss:$84 sps:$4 sm:$0xff] (!%p113_p2)   ;;  %v3613_v46 = vld [vmem:[%s4402_s1 + $0xb0] ss:$84 sps:$4 sm:$0xff] (!%p113_p2)  }
   0x8   : > { %v3612_v44 = vld [vmem:[%s4402_s1 + $0xa8] ss:$84 sps:$4 sm:$0xff] (!%p113_p2)   ;;  %v3626_v58 = vld [vmem:[%s4402_s1 + $0x150] ss:$84 sps:$4 sm:$0xff] (!%p113_p2)   ;;  %v3627_v59 = vld [vmem:[%s4402_s1 + $0x158] ss:$84 sps:$4 sm:$0xff] (!%p113_p2)  }
   0x9   : > { %v3622_v48 = vld [vmem:[%s4402_s1 + $0x154] ss:$84 sps:$4 sm:$0xff] (!%p113_p2)   ;;  %v3624_v57 = vld [vmem:[%s4402_s1 + $0x15c] ss:$84 sps:$4 sm:$0xff] (!%p113_p2)  }
   0xd   : > { %s4405_s10 = smov (!%p134_p3, %s2870_s10), 1 }
   0xe   : > { %s3553_s15 = smul.u32 1296, %s4405_s10  ;;  %s3130_s4 = sshll.u32 %s4405_s10, 6 }
   0xf   : > { %s4372_s7 = scalar_lea.vmem %s4403_s2, %s3130_s4 }
  0x10   : > { %s3907_s18 = scalar_lea.vmem %s4401_s0, %s3553_s15 }
  0x11   : > { %v3562_v2 = vld [vmem:[%s3907_s18 + $0x40] sm:$0xff]   ;;  %v3566_v6 = vld [vmem:[%s3907_s18 + $0x48] sm:$0xff]   ;;  %v3570_v10 = vld [vmem:[%s3907_s18 + $0x50] sm:$0xff]  }
  0x12   : > { %v3563_v3 = vld [vmem:[%s3907_s18 + $0xc0] sm:$0xff]   ;;  %3131 = vmatprep.subr.bf16.mxu0 %v3562_v2  ;;  %v3567_v7 = vld [vmem:[%s3907_s18 + $0xc8] sm:$0xff]   ;;  %v3571_v11 = vld [vmem:[%s3907_s18 + $0xd0] sm:$0xff]  }
  0x13   : > { %v3564_v4 = vld [vmem:[%s3907_s18] sm:$0xff]   ;;  %3171 = vmatprep.subr.bf16.mxu1 %v3563_v3  ;;  %v3568_v8 = vld [vmem:[%s3907_s18 + $0x8] sm:$0xff]   ;;  %v3572_v12 = vld [vmem:[%s3907_s18 + $0x10] sm:$0xff]  }
  0x14   : > { %v3565_v5 = vld [vmem:[%s3907_s18 + $0x80] sm:$0xff]   ;;  %3132 = vmatpush3.bf16.msra.mxu0 %v3564_v4  ;;  %v3569_v9 = vld [vmem:[%s3907_s18 + $0x88] sm:$0xff]   ;;  %v3573_v13 = vld [vmem:[%s3907_s18 + $0x90] sm:$0xff]  }
  0x15   : > { %3172 = vmatpush3.bf16.msra.mxu1 %v3565_v5  ;;  %3133 = vmatprep.subr.bf16.mxu0 %v3566_v6  ;;  %v3574_v14 = vld [vmem:[%s3907_s18 + $0x58] sm:$0xff]   ;;  %v3578_v18 = vld [vmem:[%s3907_s18 + $0x60] sm:$0xff]   ;;  %v3582_v22 = vld [vmem:[%s3907_s18 + $0x68] sm:$0xff]  }
  0x16   : > { %3173 = vmatprep.subr.bf16.mxu1 %v3567_v7  ;;  %v3575_v15 = vld [vmem:[%s3907_s18 + $0xd8] sm:$0xff]   ;;  %v3579_v19 = vld [vmem:[%s3907_s18 + $0xe0] sm:$0xff]   ;;  %v3583_v23 = vld [vmem:[%s3907_s18 + $0xe8] sm:$0xff]  }
  0x17   : > { %v3576_v16 = vld [vmem:[%s3907_s18 + $0x18] sm:$0xff]   ;;  %v3580_v20 = vld [vmem:[%s3907_s18 + $0x20] sm:$0xff]   ;;  %v3584_v24 = vld [vmem:[%s3907_s18 + $0x28] sm:$0xff]  }
  0x18   : > { %3134 = vmatpush3.bf16.msra.mxu0 %v3568_v8  ;;  %v3577_v17 = vld [vmem:[%s3907_s18 + $0x98] sm:$0xff]   ;;  %v3581_v21 = vld [vmem:[%s3907_s18 + $0xa0] sm:$0xff]   ;;  %v3585_v25 = vld [vmem:[%s3907_s18 + $0xa8] sm:$0xff]  }
  0x19   : > { %3174 = vmatpush3.bf16.msra.mxu1 %v3569_v9  ;;  %3135 = vmatprep.subr.bf16.mxu0 %v3570_v10  ;;  %v3586_v26 = vld [vmem:[%s3907_s18 + $0x70] sm:$0xff]   ;;  %v3590_v30 = vld [vmem:[%s3907_s18 + $0x78] sm:$0xff]   ;;  %v3600_v37 = vld [vmem:[%s3907_s18 + $0x140] sm:$0xff]  }
  0x1a   : > { %3175 = vmatprep.subr.bf16.mxu1 %v3571_v11  ;;  %v3587_v27 = vld [vmem:[%s3907_s18 + $0xf0] sm:$0xff]   ;;  %v3591_v31 = vld [vmem:[%s3907_s18 + $0xf8] sm:$0xff]   ;;  %v3601_v39 = vld [vmem:[%s3907_s18 + $0x1c0] sm:$0xff]  }
  0x1b   : > { %v3588_v28 = vld [vmem:[%s3907_s18 + $0x30] sm:$0xff]   ;;  %v3592_v33 = vld [vmem:[%s3907_s18 + $0x38] sm:$0xff]   ;;  %v3602_v40 = vld [vmem:[%s3907_s18 + $0x100] sm:$0xff]  }
  0x1c   : > { %3136 = vmatpush3.bf16.msra.mxu0 %v3572_v12  ;;  %v3589_v29 = vld [vmem:[%s3907_s18 + $0xb0] sm:$0xff]   ;;  %v3593_v35 = vld [vmem:[%s3907_s18 + $0xb8] sm:$0xff]   ;;  %v3603_v41 = vld [vmem:[%s3907_s18 + $0x180] sm:$0xff]  }
  0x1d   : > { %3176 = vmatpush3.bf16.msra.mxu1 %v3573_v13  ;;  %3137 = vmatprep.subr.bf16.mxu0 %v3574_v14  ;;  %v3604_v42 = vld [vmem:[%s3907_s18 + $0x148] sm:$0xff]   ;;  %v3614_v49 = vld [vmem:[%s3907_s18 + $0x150] sm:$0xff]   ;;  %v3618_v53 = vld [vmem:[%s3907_s18 + $0x158] sm:$0xff]  }
  0x1e   : > { %3177 = vmatprep.subr.bf16.mxu1 %v3575_v15  ;;  %v3605_v43 = vld [vmem:[%s3907_s18 + $0x1c8] sm:$0xff]   ;;  %v3615_v50 = vld [vmem:[%s3907_s18 + $0x1d0] sm:$0xff]   ;;  %v3619_v54 = vld [vmem:[%s3907_s18 + $0x1d8] sm:$0xff]  }
  0x1f   : > { %v3606_v45 = vld [vmem:[%s3907_s18 + $0x108] sm:$0xff]   ;;  %v3616_v51 = vld [vmem:[%s3907_s18 + $0x110] sm:$0xff]   ;;  %v3620_v55 = vld [vmem:[%s3907_s18 + $0x118] sm:$0xff]  }
  0x20   : > { %3138 = vmatpush3.bf16.msra.mxu0 %v3576_v16  ;;  %v3607_v47 = vld [vmem:[%s3907_s18 + $0x188] sm:$0xff]   ;;  %v3617_v52 = vld [vmem:[%s3907_s18 + $0x190] sm:$0xff]   ;;  %v3621_v56 = vld [vmem:[%s3907_s18 + $0x198] sm:$0xff]  }
  0x21   : > { %3178 = vmatpush3.bf16.msra.mxu1 %v3577_v17  ;;  %3139 = vmatprep.subr.bf16.mxu0 %v3578_v18  ;;  %v3628_v60 = vld [vmem:[%s3907_s18 + $0x160] sm:$0xff]   ;;  %v3632_v0 = vld [vmem:[%s3907_s18 + $0x168] sm:$0xff]   ;;  %v3636_v4 = vld [vmem:[%s4402_s1 + $0x1fc] ss:$84 sps:$4 sm:$0xff]  }
  0x22   : > { %3179 = vmatprep.subr.bf16.mxu1 %v3579_v19  ;;  %v3629_v61 = vld [vmem:[%s3907_s18 + $0x1e0] sm:$0xff]   ;;  %v3633_v1 = vld [vmem:[%s3907_s18 + $0x1e8] sm:$0xff]   ;;  %v3642_v8 = vld [vmem:[%s3907_s18 + $0x170] sm:$0xff]  }
  0x23   : > { %v3630_v62 = vld [vmem:[%s3907_s18 + $0x120] sm:$0xff]   ;;  %v3634_v2 = vld [vmem:[%s3907_s18 + $0x128] sm:$0xff]   ;;  %v3643_v9 = vld [vmem:[%s3907_s18 + $0x1f0] sm:$0xff]  }
  0x24   : > { %3140 = vmatpush3.bf16.msra.mxu0 %v3580_v20  ;;  %v3631_v63 = vld [vmem:[%s3907_s18 + $0x1a0] sm:$0xff]   ;;  %v3635_v3 = vld [vmem:[%s3907_s18 + $0x1a8] sm:$0xff]   ;;  %v3644_v10 = vld [vmem:[%s3907_s18 + $0x130] sm:$0xff]  }
  0x25   : > { %3180 = vmatpush3.bf16.msra.mxu1 %v3581_v21  ;;  %3141 = vmatprep.subr.bf16.mxu0 %v3582_v22  ;;  %v3638_v5 = vld [vmem:[%s4402_s1 + $0x204] ss:$84 sps:$4 sm:$0xff]   ;;  %v3641_v7 = vld [vmem:[%s4402_s1 + $0x200] ss:$84 sps:$4 sm:$0xff]   ;;  %v3655_v19 = vld [vmem:[%s4402_s1 + $0x1c] ss:$84 sps:$4 sm:$0xff]  }
  0x26   : > { %3181 = vmatprep.subr.bf16.mxu1 %v3583_v23  ;;  %v3640_v6 = vld [vmem:[%s4402_s1 + $0x1f8] ss:$84 sps:$4 sm:$0xff]   ;;  %v3645_v11 = vld [vmem:[%s3907_s18 + $0x1b0] sm:$0xff]   ;;  %v3656_v20 = vld [vmem:[%s3907_s18 + $0x240] sm:$0xff]  }
  0x27   : > { %v3646_v12 = vld [vmem:[%s3907_s18 + $0x178] sm:$0xff]   ;;  %v3650_v16 = vld [vmem:[%s4402_s1 + $0x10] ss:$84 sps:$4 sm:$0xff]   ;;  %v3652_v17 = vld [vmem:[%s4402_s1 + $0x14] ss:$84 sps:$4 sm:$0xff]  }
  0x28   : > { %3142 = vmatpush3.bf16.msra.mxu0 %v3584_v24  ;;  %v3647_v13 = vld [vmem:[%s3907_s18 + $0x1f8] sm:$0xff]   ;;  %v3657_v21 = vld [vmem:[%s3907_s18 + $0x2c0] sm:$0xff]   ;;  %v3660_v24 = vld [vmem:[%s3907_s18 + $0x248] sm:$0xff]  }
  0x29   : > { %3182 = vmatpush3.bf16.msra.mxu1 %v3585_v25  ;;  %3143 = vmatprep.subr.bf16.mxu0 %v3586_v26  ;;  %v3648_v14 = vld [vmem:[%s3907_s18 + $0x138] sm:$0xff]   ;;  %v3658_v22 = vld [vmem:[%s3907_s18 + $0x200] sm:$0xff]   ;;  %v3661_v25 = vld [vmem:[%s3907_s18 + $0x2c8] sm:$0xff]  }
  0x2a   : > { %3183 = vmatprep.subr.bf16.mxu1 %v3587_v27  ;;  %v3649_v15 = vld [vmem:[%s3907_s18 + $0x1b8] sm:$0xff]   ;;  %v3659_v23 = vld [vmem:[%s3907_s18 + $0x280] sm:$0xff]   ;;  %v3662_v26 = vld [vmem:[%s3907_s18 + $0x208] sm:$0xff]  }
  0x2b   : > { %v3653_v18 = vld [vmem:[%s4402_s1 + $0x18] ss:$84 sps:$4 sm:$0xff]  }
  0x2c   : > { %3144 = vmatpush3.bf16.msra.mxu0 %v3588_v28  ;;  %v3663_v27 = vld [vmem:[%s3907_s18 + $0x288] sm:$0xff]   ;;  %v3664_v28 = vld [vmem:[%s4402_s1 + $0xbc] ss:$84 sps:$4 sm:$0xff]  }
  0x2d   : > { %3184 = vmatpush3.bf16.msra.mxu1 %v3589_v29  ;;  %3145 = vmatprep.subr.bf16.mxu0 %v3590_v30  ;;  %v3666_v29 = vld [vmem:[%s4402_s1 + $0xc4] ss:$84 sps:$4 sm:$0xff]  }
  0x2e   : > { %3185 = vmatprep.subr.bf16.mxu1 %v3591_v31  ;;  %v3668_v30 = vld [vmem:[%s4402_s1 + $0xb8] ss:$84 sps:$4 sm:$0xff]   ;;  %v3669_v31 = vld [vmem:[%s4402_s1 + $0xc0] ss:$84 sps:$4 sm:$0xff]  }
  0x30   : > { %3146 = vmatpush3.bf16.msra.mxu0 %v3592_v33  ;;  %v3671_v33 = vld [vmem:[%s3907_s18 + $0x2d0] sm:$0xff]  }
  0x31   : > { %3186 = vmatpush3.bf16.msra.mxu1 %v3593_v35  ;;  %3211 = vmatprep.subr.bf16.mxu0 %v3600_v37  ;;  %v3673_v35 = vld [vmem:[%s3907_s18 + $0x290] sm:$0xff]   ;;  %v3675_v37 = vld [vmem:[%s3907_s18 + $0x2d8] sm:$0xff]  }
  0x32   : > { %3251 = vmatprep.subr.bf16.mxu1 %v3601_v39  ;;  %v3677_v39 = vld [vmem:[%s3907_s18 + $0x298] sm:$0xff]  }
  0x33   : > { %1995 = vmatmul.mubr.bf16.vlgmr.msra.gmra.mrb[0].mxu0 %v3594_v32  ;;  %v3670_v32 = vld [vmem:[%s3907_s18 + $0x250] sm:$0xff]  }
  0x34   : > { %2060 = vmatmul.mubr.bf16.vlgmr.msra.gmra.mrb[0].mxu1 %v3597_v34  ;;  %3212 = vmatpush3.bf16.msra.mxu0 %v3602_v40  ;;  %v3672_v34 = vld [vmem:[%s3907_s18 + $0x210] sm:$0xff]   ;;  %v3678_v40 = vld [vmem:[%s4402_s1 + $0x164] ss:$84 sps:$4 sm:$0xff]  }
  0x35   : > { %3252 = vmatpush3.bf16.msra.mxu1 %v3603_v41  ;;  %2002 = vmatprep.mubr.bf16.mxu0 %v3608_v36  ;;  %v3674_v36 = vld [vmem:[%s3907_s18 + $0x258] sm:$0xff]   ;;  %v3680_v41 = vld [vmem:[%s4402_s1 + $0x16c] ss:$84 sps:$4 sm:$0xff]  }
  0x36   : > { %3213 = vmatprep.subr.bf16.mxu0 %v3604_v42  ;;  %2067 = vmatprep.mubr.bf16.mxu1 %v3610_v38  ;;  %v3676_v38 = vld [vmem:[%s3907_s18 + $0x218] sm:$0xff]   ;;  %v3682_v42 = vld [vmem:[%s4402_s1 + $0x160] ss:$84 sps:$4 sm:$0xff]  }
  0x37   : > { %3253 = vmatprep.subr.bf16.mxu1 %v3605_v43  ;;  %v3683_v43 = vld [vmem:[%s4402_s1 + $0x168] ss:$84 sps:$4 sm:$0xff]  }
  0x38   : > { %3214 = vmatpush3.bf16.msra.mxu0 %v3606_v45  ;;  %v3685_v45 = vld [vmem:[%s3907_s18 + $0x2e0] sm:$0xff]  }
  0x39   : > { %3254 = vmatpush3.bf16.msra.mxu1 %v3607_v47  ;;  %3215 = vmatprep.subr.bf16.mxu0 %v3614_v49  ;;  %v3687_v47 = vld [vmem:[%s3907_s18 + $0x2a0] sm:$0xff]   ;;  %v3689_v49 = vld [vmem:[%s3907_s18 + $0x2e8] sm:$0xff]  }
  0x3a   : > { %3255 = vmatprep.subr.bf16.mxu1 %v3615_v50  ;;  %v3690_v50 = vld [vmem:[%s3907_s18 + $0x228] sm:$0xff]  }
  0x3b   : > { %2003 = vmatmul.mubr.bf16.gmra.mrb[4].mxu0 %v3612_v44  ;;  %v3684_v44 = vld [vmem:[%s3907_s18 + $0x260] sm:$0xff]  }
  0x3c   : > { %2068 = vmatmul.mubr.bf16.gmra.mrb[4].mxu1 %v3613_v46  ;;  %3216 = vmatpush3.bf16.msra.mxu0 %v3616_v51  ;;  %v3686_v46 = vld [vmem:[%s3907_s18 + $0x220] sm:$0xff]   ;;  %v3691_v51 = vld [vmem:[%s3907_s18 + $0x2a8] sm:$0xff]  }
  0x3d   : > { %3256 = vmatpush3.bf16.msra.mxu1 %v3617_v52  ;;  %2010 = vmatprep.mubr.bf16.mxu0 %v3622_v48  ;;  %v3688_v48 = vld [vmem:[%s3907_s18 + $0x268] sm:$0xff]  }
  0x3e   : > { %3217 = vmatprep.subr.bf16.mxu0 %v3618_v53  ;;  %3257 = vmatprep.subr.bf16.mxu1 %v3619_v54  ;;  %v3692_v52 = vld [vmem:[%s4402_s1 + $0x20c] ss:$84 sps:$4 sm:$0xff]   ;;  %v3694_v53 = vld [vmem:[%s4402_s1 + $0x214] ss:$84 sps:$4 sm:$0xff]  }
  0x3f   : > { %2075 = vmatprep.mubr.bf16.mxu1 %v3624_v57  ;;  %v3696_v54 = vld [vmem:[%s4402_s1 + $0x208] ss:$84 sps:$4 sm:$0xff]   ;;  %v3699_v57 = vld [vmem:[%s3907_s18 + $0x2f0] sm:$0xff]  }
  0x40   : > { %3218 = vmatpush3.bf16.msra.mxu0 %v3620_v55  ;;  %v3697_v55 = vld [vmem:[%s4402_s1 + $0x210] ss:$84 sps:$4 sm:$0xff]  }
  0x41   : > { %3258 = vmatpush3.bf16.msra.mxu1 %v3621_v56  ;;  %3219 = vmatprep.subr.bf16.mxu0 %v3628_v60  ;;  %v3698_v56 = vld [vmem:[%s3907_s18 + $0x270] sm:$0xff]   ;;  %v3702_v60 = vld [vmem:[%s3907_s18 + $0x278] sm:$0xff]  }
  0x42   : > { %3259 = vmatprep.subr.bf16.mxu1 %v3629_v61  ;;  %v3703_v61 = vld [vmem:[%s3907_s18 + $0x2f8] sm:$0xff]  }
  0x43   : > { %2011 = vmatmul.mubr.bf16.gmra.mrb[8].mxu0 %v3626_v58  ;;  %v3700_v58 = vld [vmem:[%s3907_s18 + $0x230] sm:$0xff]  }
  0x44   : > { %2076 = vmatmul.mubr.bf16.gmra.mrb[8].mxu1 %v3627_v59  ;;  %3220 = vmatpush3.bf16.msra.mxu0 %v3630_v62  ;;  %v3701_v59 = vld [vmem:[%s3907_s18 + $0x2b0] sm:$0xff]   ;;  %v3704_v62 = vld [vmem:[%s3907_s18 + $0x238] sm:$0xff]  }
  0x45   : > { %3260 = vmatpush3.bf16.msra.mxu1 %v3631_v63  ;;  %3221 = vmatprep.subr.bf16.mxu0 %v3632_v0  ;;  %v3705_v63 = vld [vmem:[%s3907_s18 + $0x2b8] sm:$0xff]   ;;  %v3706_v0 = vld [vmem:[%s4402_s1 + $0x20] ss:$84 sps:$4 sm:$0xff]  }
  0x46   : > { %3261 = vmatprep.subr.bf16.mxu1 %v3633_v1  ;;  %2018 = vmatprep.mubr.bf16.mxu0 %v3636_v4  ;;  %v3708_v1 = vld [vmem:[%s4402_s1 + $0x24] ss:$84 sps:$4 sm:$0xff]  }
  0x47   : > { %2083 = vmatprep.mubr.bf16.mxu1 %v3638_v5  ;;  %v3712_v4 = vld [vmem:[%s3907_s18 + $0x340] sm:$0xff]  }
  0x48   : > { %3222 = vmatpush3.bf16.msra.mxu0 %v3634_v2  ;;  %v3709_v2 = vld [vmem:[%s4402_s1 + $0x28] ss:$84 sps:$4 sm:$0xff]   ;;  %v3713_v5 = vld [vmem:[%s3907_s18 + $0x3c0] sm:$0xff]  }
  0x49   : > { %3262 = vmatpush3.bf16.msra.mxu1 %v3635_v3  ;;  %3223 = vmatprep.subr.bf16.mxu0 %v3642_v8  ;;  %v3711_v3 = vld [vmem:[%s4402_s1 + $0x2c] ss:$84 sps:$4 sm:$0xff]  }
  0x4a   : > { %3263 = vmatprep.subr.bf16.mxu1 %v3643_v9  ;;  %v3716_v8 = vld [vmem:[%s3907_s18 + $0x348] sm:$0xff]  }
  0x4b   : > { %2019 = vmatmul.mubr.bf16.gmra.mrb[12].mxu0 %v3640_v6  ;;  %v3714_v6 = vld [vmem:[%s3907_s18 + $0x300] sm:$0xff]   ;;  %v3717_v9 = vld [vmem:[%s3907_s18 + $0x3c8] sm:$0xff]  }
  0x4c   : > { %2084 = vmatmul.mubr.bf16.gmra.mrb[12].mxu1 %v3641_v7  ;;  %3224 = vmatpush3.bf16.msra.mxu0 %v3644_v10  ;;  %v3715_v7 = vld [vmem:[%s3907_s18 + $0x380] sm:$0xff]   ;;  %v3718_v10 = vld [vmem:[%s3907_s18 + $0x308] sm:$0xff]  }
  0x4d   : > { %3264 = vmatpush3.bf16.msra.mxu1 %v3645_v11  ;;  %3225 = vmatprep.subr.bf16.mxu0 %v3646_v12  ;;  %v3719_v11 = vld [vmem:[%s3907_s18 + $0x388] sm:$0xff]  }
  0x4e   : > { %3265 = vmatprep.subr.bf16.mxu1 %v3647_v13  ;;  %2124 = vmatprep.mubr.bf16.mxu0 %v3652_v17  ;;  %v3720_v12 = vld [vmem:[%s4402_s1 + $0xcc] ss:$84 sps:$4 sm:$0xff]   ;;  %v3722_v13 = vld [vmem:[%s4402_s1 + $0xd4] ss:$84 sps:$4 sm:$0xff]  }
  0x4f   : > { %2189 = vmatprep.mubr.bf16.mxu1 %v3655_v19  ;;  %v3727_v17 = vld [vmem:[%s3907_s18 + $0x3d0] sm:$0xff]  }
  0x50   : > { %3226 = vmatpush3.bf16.msra.mxu0 %v3648_v14  ;;  %v3724_v14 = vld [vmem:[%s4402_s1 + $0xc8] ss:$84 sps:$4 sm:$0xff]   ;;  %v3729_v19 = vld [vmem:[%s3907_s18 + $0x390] sm:$0xff]  }
  0x51   : > { %3266 = vmatpush3.bf16.msra.mxu1 %v3649_v15  ;;  %3291 = vmatprep.subr.bf16.mxu0 %v3656_v20  ;;  %v3725_v15 = vld [vmem:[%s4402_s1 + $0xd0] ss:$84 sps:$4 sm:$0xff]   ;;  %v3730_v20 = vld [vmem:[%s3907_s18 + $0x358] sm:$0xff]  }
  0x52   : > { %3331 = vmatprep.subr.bf16.mxu1 %v3657_v21  ;;  %v3731_v21 = vld [vmem:[%s3907_s18 + $0x3d8] sm:$0xff]  }
  0x53   : > { %2125 = vmatmul.mubr.bf16.vlgmr.msra.gmra.mrb[16].mxu0 %v3650_v16  ;;  %v3726_v16 = vld [vmem:[%s3907_s18 + $0x350] sm:$0xff]  }
  0x54   : > { %2190 = vmatmul.mubr.bf16.vlgmr.msra.gmra.mrb[16].mxu1 %v3653_v18  ;;  %3292 = vmatpush3.bf16.msra.mxu0 %v3658_v22  ;;  %v3728_v18 = vld [vmem:[%s3907_s18 + $0x310] sm:$0xff]   ;;  %v3732_v22 = vld [vmem:[%s3907_s18 + $0x318] sm:$0xff]  }
  0x55   : > { %3332 = vmatpush3.bf16.msra.mxu1 %v3659_v23  ;;  %3293 = vmatprep.subr.bf16.mxu0 %v3660_v24  ;;  %v3733_v23 = vld [vmem:[%s3907_s18 + $0x398] sm:$0xff]   ;;  %v3734_v24 = vld [vmem:[%s4402_s1 + $0x174] ss:$84 sps:$4 sm:$0xff]  }
  0x56   : > { %3333 = vmatprep.subr.bf16.mxu1 %v3661_v25  ;;  %2132 = vmatprep.mubr.bf16.mxu0 %v3664_v28  ;;  %v3736_v25 = vld [vmem:[%s4402_s1 + $0x17c] ss:$84 sps:$4 sm:$0xff]   ;;  %v3740_v28 = vld [vmem:[%s3907_s18 + $0x360] sm:$0xff]  }
  0x57   : > { %2197 = vmatprep.mubr.bf16.mxu1 %v3666_v29  ;;  %v3741_v29 = vld [vmem:[%s3907_s18 + $0x3e0] sm:$0xff]  }
  0x58   : > { %3294 = vmatpush3.bf16.msra.mxu0 %v3662_v26  ;;  %v3738_v26 = vld [vmem:[%s4402_s1 + $0x170] ss:$84 sps:$4 sm:$0xff]  }
  0x59   : > { %3334 = vmatpush3.bf16.msra.mxu1 %v3663_v27  ;;  %3295 = vmatprep.subr.bf16.mxu0 %v3670_v32  ;;  %v3739_v27 = vld [vmem:[%s4402_s1 + $0x178] ss:$84 sps:$4 sm:$0xff]  }
  0x5a   : > { %3335 = vmatprep.subr.bf16.mxu1 %v3671_v33  ;;  %v3744_v32 = vld [vmem:[%s3907_s18 + $0x368] sm:$0xff]  }
  0x5b   : > { %2133 = vmatmul.mubr.bf16.gmra.mrb[20].mxu0 %v3668_v30  ;;  %v3742_v30 = vld [vmem:[%s3907_s18 + $0x320] sm:$0xff]   ;;  %v3745_v33 = vld [vmem:[%s3907_s18 + $0x3e8] sm:$0xff]  }
  0x5c   : > { %2198 = vmatmul.mubr.bf16.gmra.mrb[20].mxu1 %v3669_v31  ;;  %3296 = vmatpush3.bf16.msra.mxu0 %v3672_v34  ;;  %v3743_v31 = vld [vmem:[%s3907_s18 + $0x3a0] sm:$0xff]   ;;  %v3746_v34 = vld [vmem:[%s3907_s18 + $0x328] sm:$0xff]  }
  0x5d   : > { %3336 = vmatpush3.bf16.msra.mxu1 %v3673_v35  ;;  %3297 = vmatprep.subr.bf16.mxu0 %v3674_v36  ;;  %v3747_v35 = vld [vmem:[%s3907_s18 + $0x3a8] sm:$0xff]   ;;  %v3748_v36 = vld [vmem:[%s4402_s1 + $0x21c] ss:$84 sps:$4 sm:$0xff]  }
  0x5e   : > { %3337 = vmatprep.subr.bf16.mxu1 %v3675_v37  ;;  %2140 = vmatprep.mubr.bf16.mxu0 %v3678_v40  ;;  %v3750_v37 = vld [vmem:[%s4402_s1 + $0x224] ss:$84 sps:$4 sm:$0xff]   ;;  %v3754_v40 = vld [vmem:[%s3907_s18 + $0x370] sm:$0xff]  }
  0x5f   : > { %2205 = vmatprep.mubr.bf16.mxu1 %v3680_v41  ;;  %v3755_v41 = vld [vmem:[%s3907_s18 + $0x3f0] sm:$0xff]  }
  0x60   : > { %3298 = vmatpush3.bf16.msra.mxu0 %v3676_v38  ;;  %v3752_v38 = vld [vmem:[%s4402_s1 + $0x218] ss:$84 sps:$4 sm:$0xff]  }
  0x61   : > { %3338 = vmatpush3.bf16.msra.mxu1 %v3677_v39  ;;  %3299 = vmatprep.subr.bf16.mxu0 %v3684_v44  ;;  %v3753_v39 = vld [vmem:[%s4402_s1 + $0x220] ss:$84 sps:$4 sm:$0xff]   ;;  %v3758_v44 = vld [vmem:[%s3907_s18 + $0x378] sm:$0xff]  }
  0x62   : > { %3339 = vmatprep.subr.bf16.mxu1 %v3685_v45  ;;  %v3759_v45 = vld [vmem:[%s3907_s18 + $0x3f8] sm:$0xff]  }
  0x63   : > { %2141 = vmatmul.mubr.bf16.gmra.mrb[24].mxu0 %v3682_v42  ;;  %v3756_v42 = vld [vmem:[%s3907_s18 + $0x330] sm:$0xff]  }
  0x64   : > { %2206 = vmatmul.mubr.bf16.gmra.mrb[24].mxu1 %v3683_v43  ;;  %3300 = vmatpush3.bf16.msra.mxu0 %v3686_v46  ;;  %v3757_v43 = vld [vmem:[%s3907_s18 + $0x3b0] sm:$0xff]   ;;  %v3760_v46 = vld [vmem:[%s3907_s18 + $0x338] sm:$0xff]  }
  0x65   : > { %3340 = vmatpush3.bf16.msra.mxu1 %v3687_v47  ;;  %3301 = vmatprep.subr.bf16.mxu0 %v3688_v48  ;;  %v3761_v47 = vld [vmem:[%s3907_s18 + $0x3b8] sm:$0xff]   ;;  %v3762_v48 = vld [vmem:[%s4402_s1 + $0x30] ss:$84 sps:$4 sm:$0xff]  }
  0x66   : > { %3341 = vmatprep.subr.bf16.mxu1 %v3689_v49  ;;  %2148 = vmatprep.mubr.bf16.mxu0 %v3692_v52  ;;  %v3764_v49 = vld [vmem:[%s4402_s1 + $0x34] ss:$84 sps:$4 sm:$0xff]   ;;  %v3768_v52 = vld [vmem:[%s3907_s18 + $0x440] sm:$0xff]  }
  0x67   : > { %2213 = vmatprep.mubr.bf16.mxu1 %v3694_v53  ;;  %v3769_v53 = vld [vmem:[%s3907_s18 + $0x4c0] sm:$0xff]  }
  0x68   : > { %3302 = vmatpush3.bf16.msra.mxu0 %v3690_v50  ;;  %v3765_v50 = vld [vmem:[%s4402_s1 + $0x38] ss:$84 sps:$4 sm:$0xff]  }
  0x69   : > { %3342 = vmatpush3.bf16.msra.mxu1 %v3691_v51  ;;  %3303 = vmatprep.subr.bf16.mxu0 %v3698_v56  ;;  %v3767_v51 = vld [vmem:[%s4402_s1 + $0x3c] ss:$84 sps:$4 sm:$0xff]   ;;  %v3772_v56 = vld [vmem:[%s3907_s18 + $0x448] sm:$0xff]  }
  0x6a   : > { %3343 = vmatprep.subr.bf16.mxu1 %v3699_v57  ;;  %v3773_v57 = vld [vmem:[%s3907_s18 + $0x4c8] sm:$0xff]  }
  0x6b   : > { %2149 = vmatmul.mubr.bf16.gmra.mrb[28].mxu0 %v3696_v54  ;;  %v3770_v54 = vld [vmem:[%s3907_s18 + $0x400] sm:$0xff]  }
  0x6c   : > { %2214 = vmatmul.mubr.bf16.gmra.mrb[28].mxu1 %v3697_v55  ;;  %3304 = vmatpush3.bf16.msra.mxu0 %v3700_v58  ;;  %v3771_v55 = vld [vmem:[%s3907_s18 + $0x480] sm:$0xff]   ;;  %v3774_v58 = vld [vmem:[%s3907_s18 + $0x408] sm:$0xff]  }
  0x6d   : > { %3344 = vmatpush3.bf16.msra.mxu1 %v3701_v59  ;;  %3305 = vmatprep.subr.bf16.mxu0 %v3702_v60  ;;  %v3775_v59 = vld [vmem:[%s3907_s18 + $0x488] sm:$0xff]   ;;  %v3776_v60 = vld [vmem:[%s4402_s1 + $0xdc] ss:$84 sps:$4 sm:$0xff]  }
  0x6e   : > { %3345 = vmatprep.subr.bf16.mxu1 %v3703_v61  ;;  %2254 = vmatprep.mubr.bf16.mxu0 %v3708_v1  ;;  %v3778_v61 = vld [vmem:[%s4402_s1 + $0xe4] ss:$84 sps:$4 sm:$0xff]   ;;  %v3783_v1 = vld [vmem:[%s3907_s18 + $0x4d0] sm:$0xff]  }
  0x6f   : > { %2319 = vmatprep.mubr.bf16.mxu1 %v3711_v3  ;;  %v3785_v3 = vld [vmem:[%s3907_s18 + $0x490] sm:$0xff]  }
  0x70   : > { %3306 = vmatpush3.bf16.msra.mxu0 %v3704_v62  ;;  %v3780_v62 = vld [vmem:[%s4402_s1 + $0xd8] ss:$84 sps:$4 sm:$0xff]  }
  0x71   : > { %3346 = vmatpush3.bf16.msra.mxu1 %v3705_v63  ;;  %3371 = vmatprep.subr.bf16.mxu0 %v3712_v4  ;;  %v3781_v63 = vld [vmem:[%s4402_s1 + $0xe0] ss:$84 sps:$4 sm:$0xff]   ;;  %v3786_v4 = vld [vmem:[%s3907_s18 + $0x458] sm:$0xff]  }
  0x72   : > { %3411 = vmatprep.subr.bf16.mxu1 %v3713_v5  ;;  %v3787_v5 = vld [vmem:[%s3907_s18 + $0x4d8] sm:$0xff]  }
  0x73   : > { %2255 = vmatmul.mubr.bf16.vlgmr.msra.gmra.mrb[32].mxu0 %v3706_v0  ;;  %v3782_v0 = vld [vmem:[%s3907_s18 + $0x450] sm:$0xff]  }
  0x74   : > { %2320 = vmatmul.mubr.bf16.vlgmr.msra.gmra.mrb[32].mxu1 %v3709_v2  ;;  %3372 = vmatpush3.bf16.msra.mxu0 %v3714_v6  ;;  %v3784_v2 = vld [vmem:[%s3907_s18 + $0x410] sm:$0xff]   ;;  %v3788_v6 = vld [vmem:[%s3907_s18 + $0x418] sm:$0xff]  }
  0x75   : > { %3412 = vmatpush3.bf16.msra.mxu1 %v3715_v7  ;;  %3373 = vmatprep.subr.bf16.mxu0 %v3716_v8  ;;  %v3789_v7 = vld [vmem:[%s3907_s18 + $0x498] sm:$0xff]  }
  0x76   : > { %3413 = vmatprep.subr.bf16.mxu1 %v3717_v9  ;;  %2262 = vmatprep.mubr.bf16.mxu0 %v3720_v12  ;;  %v3790_v8 = vld [vmem:[%s4402_s1 + $0x184] ss:$84 sps:$4 sm:$0xff]   ;;  %v3792_v9 = vld [vmem:[%s4402_s1 + $0x18c] ss:$84 sps:$4 sm:$0xff]  }
  0x77   : > { %2327 = vmatprep.mubr.bf16.mxu1 %v3722_v13  ;;  %v3796_v12 = vld [vmem:[%s3907_s18 + $0x460] sm:$0xff]  }
  0x78   : > { %3374 = vmatpush3.bf16.msra.mxu0 %v3718_v10  ;;  %v3794_v10 = vld [vmem:[%s4402_s1 + $0x180] ss:$84 sps:$4 sm:$0xff]  }
  0x79   : > { %3414 = vmatpush3.bf16.msra.mxu1 %v3719_v11  ;;  %3375 = vmatprep.subr.bf16.mxu0 %v3726_v16  ;;  %v3795_v11 = vld [vmem:[%s4402_s1 + $0x188] ss:$84 sps:$4 sm:$0xff]   ;;  %v3797_v13 = vld [vmem:[%s3907_s18 + $0x4e0] sm:$0xff]  }
  0x7a   : > { %3415 = vmatprep.subr.bf16.mxu1 %v3727_v17  ;;  %v3800_v16 = vld [vmem:[%s3907_s18 + $0x468] sm:$0xff]  }
  0x7b   : > { %2263 = vmatmul.mubr.bf16.gmra.mrb[36].mxu0 %v3724_v14  ;;  %v3798_v14 = vld [vmem:[%s3907_s18 + $0x420] sm:$0xff]   ;;  %v3801_v17 = vld [vmem:[%s3907_s18 + $0x4e8] sm:$0xff]  }
  0x7c   : > { %2328 = vmatmul.mubr.bf16.gmra.mrb[36].mxu1 %v3725_v15  ;;  %3376 = vmatpush3.bf16.msra.mxu0 %v3728_v18  ;;  %v3799_v15 = vld [vmem:[%s3907_s18 + $0x4a0] sm:$0xff]   ;;  %v3802_v18 = vld [vmem:[%s3907_s18 + $0x428] sm:$0xff]  }
  0x7d   : > { %3416 = vmatpush3.bf16.msra.mxu1 %v3729_v19  ;;  %3377 = vmatprep.subr.bf16.mxu0 %v3730_v20  ;;  %v3803_v19 = vld [vmem:[%s3907_s18 + $0x4a8] sm:$0xff]  }
  0x7e   : > { %3417 = vmatprep.subr.bf16.mxu1 %v3731_v21  ;;  %2270 = vmatprep.mubr.bf16.mxu0 %v3734_v24  ;;  %v3804_v20 = vld [vmem:[%s4402_s1 + $0x22c] ss:$84 sps:$4 sm:$0xff]   ;;  %v3806_v21 = vld [vmem:[%s4402_s1 + $0x234] ss:$84 sps:$4 sm:$0xff]  }
  0x7f   : > { %2335 = vmatprep.mubr.bf16.mxu1 %v3736_v25  ;;  %v3810_v24 = vld [vmem:[%s3907_s18 + $0x470] sm:$0xff]  }
  0x80   : > { %3378 = vmatpush3.bf16.msra.mxu0 %v3732_v22  ;;  %v3808_v22 = vld [vmem:[%s4402_s1 + $0x228] ss:$84 sps:$4 sm:$0xff]   ;;  %v3811_v25 = vld [vmem:[%s3907_s18 + $0x4f0] sm:$0xff]  }
  0x81   : > { %3418 = vmatpush3.bf16.msra.mxu1 %v3733_v23  ;;  %3379 = vmatprep.subr.bf16.mxu0 %v3740_v28  ;;  %v3809_v23 = vld [vmem:[%s4402_s1 + $0x230] ss:$84 sps:$4 sm:$0xff]   ;;  %v3814_v28 = vld [vmem:[%s3907_s18 + $0x478] sm:$0xff]  }
  0x82   : > { %3419 = vmatprep.subr.bf16.mxu1 %v3741_v29  ;;  %v3815_v29 = vld [vmem:[%s3907_s18 + $0x4f8] sm:$0xff]  }
  0x83   : > { %2271 = vmatmul.mubr.bf16.gmra.mrb[40].mxu0 %v3738_v26  ;;  %v3812_v26 = vld [vmem:[%s3907_s18 + $0x430] sm:$0xff]  }
  0x84   : > { %2336 = vmatmul.mubr.bf16.gmra.mrb[40].mxu1 %v3739_v27  ;;  %3380 = vmatpush3.bf16.msra.mxu0 %v3742_v30  ;;  %v3813_v27 = vld [vmem:[%s3907_s18 + $0x4b0] sm:$0xff]   ;;  %v3816_v30 = vld [vmem:[%s3907_s18 + $0x438] sm:$0xff]  }
  0x85   : > { %3420 = vmatpush3.bf16.msra.mxu1 %v3743_v31  ;;  %3381 = vmatprep.subr.bf16.mxu0 %v3744_v32  ;;  %v3817_v31 = vld [vmem:[%s3907_s18 + $0x4b8] sm:$0xff]   ;;  %v3818_v32 = vld [vmem:[%s4402_s1 + $0x40] ss:$84 sps:$4 sm:$0xff]  }
  0x86   : > { %3421 = vmatprep.subr.bf16.mxu1 %v3745_v33  ;;  %2278 = vmatprep.mubr.bf16.mxu0 %v3748_v36  ;;  %v3820_v33 = vld [vmem:[%s4402_s1 + $0x44] ss:$84 sps:$4 sm:$0xff]  }
  0x87   : > { %2343 = vmatprep.mubr.bf16.mxu1 %v3750_v37  ;;  %v3824_v36 = vld [vmem:[%s3907_s18 + $0x500] sm:$0xff]  }
  0x88   : > { %3382 = vmatpush3.bf16.msra.mxu0 %v3746_v34  ;;  %v3821_v34 = vld [vmem:[%s4402_s1 + $0x48] ss:$84 sps:$4 sm:$0xff]   ;;  %v3825_v37 = vld [vmem:[%s4402_s1 + $0xec] ss:$84 sps:$4 sm:$0xff]  }
  0x89   : > { %3422 = vmatpush3.bf16.msra.mxu1 %v3747_v35  ;;  %3383 = vmatprep.subr.bf16.mxu0 %v3754_v40  ;;  %v3823_v35 = vld [vmem:[%s4402_s1 + $0x4c] ss:$84 sps:$4 sm:$0xff]   ;;  %v3830_v40 = vld [vmem:[%s4402_s1 + $0xf0] ss:$84 sps:$4 sm:$0xff]  }
  0x8a   : > { %3423 = vmatprep.subr.bf16.mxu1 %v3755_v41  ;;  %v3831_v41 = vld [vmem:[%s4402_s1 + $0x194] ss:$84 sps:$4 sm:$0xff]  }
  0x8b   : > { %2279 = vmatmul.mubr.bf16.gmra.mrb[44].mxu0 %v3752_v38  ;;  %v3827_v38 = vld [vmem:[%s4402_s1 + $0xf4] ss:$84 sps:$4 sm:$0xff]  }
  0x8c   : > { %2344 = vmatmul.mubr.bf16.gmra.mrb[44].mxu1 %v3753_v39  ;;  %3384 = vmatpush3.bf16.msra.mxu0 %v3756_v42  ;;  %v3829_v39 = vld [vmem:[%s4402_s1 + $0xe8] ss:$84 sps:$4 sm:$0xff]  }
  0x8d   : > { %3424 = vmatpush3.bf16.msra.mxu1 %v3757_v43  ;;  %3385 = vmatprep.subr.bf16.mxu0 %v3758_v44  ;;  %v3837_v42 = vld [vmem:[%s3907_s18 + $0x508] sm:$0xff]   ;;  %v3833_v43 = vld [vmem:[%s4402_s1 + $0x19c] ss:$84 sps:$4 sm:$0xff]  }
  0x8e   : > { %3425 = vmatprep.subr.bf16.mxu1 %v3759_v45  ;;  %2384 = vmatprep.mubr.bf16.mxu0 %v3764_v49  ;;  %v3835_v44 = vld [vmem:[%s4402_s1 + $0x190] ss:$84 sps:$4 sm:$0xff]  }
  0x8f   : > { %2449 = vmatprep.mubr.bf16.mxu1 %v3767_v51  ;;  %v3838_v45 = vld [vmem:[%s4402_s1 + $0x23c] ss:$84 sps:$4 sm:$0xff]   ;;  %v3845_v51 = vld [vmem:[%s4402_s1 + $0x1a0] ss:$84 sps:$4 sm:$0xff]  }
  0x90   : > { %3386 = vmatpush3.bf16.msra.mxu0 %v3760_v46  ;;  %v3836_v46 = vld [vmem:[%s4402_s1 + $0x198] ss:$84 sps:$4 sm:$0xff]   ;;  %v3844_v49 = vld [vmem:[%s4402_s1 + $0x50] ss:$84 sps:$4 sm:$0xff]  }
  0x91   : > { %3426 = vmatpush3.bf16.msra.mxu1 %v3761_v47  ;;  %3451 = vmatprep.subr.bf16.mxu0 %v3768_v52  ;;  %v3840_v47 = vld [vmem:[%s4402_s1 + $0x244] ss:$84 sps:$4 sm:$0xff]  }
  0x92   : > { %3491 = vmatprep.subr.bf16.mxu1 %v3769_v53  ;;  %v3846_v52 = vld [vmem:[%s4402_s1 + $0xf8] ss:$84 sps:$4 sm:$0xff]   ;;  %v3847_v53 = vld [vmem:[%s4402_s1 + $0x248] ss:$84 sps:$4 sm:$0xff]  }
  0x93   : > { %2385 = vmatmul.mubr.bf16.vlgmr.msra.gmra.mrb[48].mxu0 %v3762_v48  ;;  %v3842_v48 = vld [vmem:[%s4402_s1 + $0x238] ss:$84 sps:$4 sm:$0xff]  }
  0x94   : > { %2450 = vmatmul.mubr.bf16.vlgmr.msra.gmra.mrb[48].mxu1 %v3765_v50  ;;  %3452 = vmatpush3.bf16.msra.mxu0 %v3770_v54  ;;  %v3843_v50 = vld [vmem:[%s4402_s1 + $0x240] ss:$84 sps:$4 sm:$0xff]  }
  0x95   : > { %3492 = vmatpush3.bf16.msra.mxu1 %v3771_v55  ;;  %3453 = vmatprep.subr.bf16.mxu0 %v3772_v56 }
  0x96   : > { %3493 = vmatprep.subr.bf16.mxu1 %v3773_v57  ;;  %2392 = vmatprep.mubr.bf16.mxu0 %v3776_v60 }
  0x97   : > { %2457 = vmatprep.mubr.bf16.mxu1 %v3778_v61 }
  0x98   : > { %3454 = vmatpush3.bf16.msra.mxu0 %v3774_v58 }
  0x99   : > { %3494 = vmatpush3.bf16.msra.mxu1 %v3775_v59  ;;  %3455 = vmatprep.subr.bf16.mxu0 %v3782_v0 }
  0x9a   : > { %3495 = vmatprep.subr.bf16.mxu1 %v3783_v1 }
  0x9b   : > { %2393 = vmatmul.mubr.bf16.gmra.mrb[52].mxu0 %v3780_v62 }
  0x9c   : > { %2458 = vmatmul.mubr.bf16.gmra.mrb[52].mxu1 %v3781_v63  ;;  %3456 = vmatpush3.bf16.msra.mxu0 %v3784_v2 }
  0x9d   : > { %3496 = vmatpush3.bf16.msra.mxu1 %v3785_v3  ;;  %3457 = vmatprep.subr.bf16.mxu0 %v3786_v4 }
  0x9e   : > { %3497 = vmatprep.subr.bf16.mxu1 %v3787_v5  ;;  %2400 = vmatprep.mubr.bf16.mxu0 %v3790_v8 }
  0x9f   : > { %2465 = vmatprep.mubr.bf16.mxu1 %v3792_v9 }
  0xa0   : > { %3458 = vmatpush3.bf16.msra.mxu0 %v3788_v6 }
  0xa1   : > { %3498 = vmatpush3.bf16.msra.mxu1 %v3789_v7  ;;  %3459 = vmatprep.subr.bf16.mxu0 %v3796_v12 }
  0xa2   : > { %3499 = vmatprep.subr.bf16.mxu1 %v3797_v13 }
  0xa3   : > { %2401 = vmatmul.mubr.bf16.gmra.mrb[56].mxu0 %v3794_v10 }
  0xa4   : > { %2466 = vmatmul.mubr.bf16.gmra.mrb[56].mxu1 %v3795_v11  ;;  %3460 = vmatpush3.bf16.msra.mxu0 %v3798_v14 }
  0xa5   : > { %3500 = vmatpush3.bf16.msra.mxu1 %v3799_v15  ;;  %3461 = vmatprep.subr.bf16.mxu0 %v3800_v16 }
  0xa6   : > { %3501 = vmatprep.subr.bf16.mxu1 %v3801_v17  ;;  %2408 = vmatprep.mubr.bf16.mxu0 %v3804_v20 }
  0xa7   : > { %2473 = vmatprep.mubr.bf16.mxu1 %v3806_v21 }
  0xa8   : > { %3462 = vmatpush3.bf16.msra.mxu0 %v3802_v18 }
  0xa9   : > { %3502 = vmatpush3.bf16.msra.mxu1 %v3803_v19  ;;  %3463 = vmatprep.subr.bf16.mxu0 %v3810_v24 }
  0xaa   : > { %3503 = vmatprep.subr.bf16.mxu1 %v3811_v25 }
  0xab   : > { %2409 = vmatmul.mubr.bf16.gmra.mrb[60].mxu0 %v3808_v22 }
  0xac   : > { %2474 = vmatmul.mubr.bf16.gmra.mrb[60].mxu1 %v3809_v23  ;;  %3464 = vmatpush3.bf16.msra.mxu0 %v3812_v26 }
  0xad   : > { %3504 = vmatpush3.bf16.msra.mxu1 %v3813_v27  ;;  %3465 = vmatprep.subr.bf16.mxu0 %v3814_v28 }
  0xae   : > { %3505 = vmatprep.subr.bf16.mxu1 %v3815_v29  ;;  %2514 = vmatprep.mubr.bf16.mxu0 %v3820_v33 }
  0xaf   : > { %2579 = vmatprep.mubr.bf16.mxu1 %v3823_v35 }
  0xb0   : > { %3466 = vmatpush3.bf16.msra.mxu0 %v3816_v30 }
  0xb1   : > { %3506 = vmatpush3.bf16.msra.mxu1 %v3817_v31  ;;  %3537 = vmatprep.subr.bf16.mxu0 %v3824_v36 }
  0xb2   : > { %3549 = vmatprep.subr.bf16.mxu1 %v3824_v36 }
  0xb3   : > { %2515 = vmatmul.mubr.bf16.vlgmr.msra.gmra.mrb[64].mxu0 %v3818_v32 }
  0xb4   : > { %2580 = vmatmul.mubr.bf16.vlgmr.msra.gmra.mrb[64].mxu1 %v3821_v34  ;;  %3538 = vmatpush3.bf16.msra.mxu0 %v3824_v36 }
  0xb5   : > { %3551 = vmatpush3.bf16.msra.mxu1 %v3824_v36  ;;  %2522 = vmatprep.mubr.bf16.mxu0 %v3825_v37 }
  0xb6   : > { %2587 = vmatprep.mubr.bf16.mxu1 %v3827_v38  ;;  %3539 = vmatprep.subr.bf16.mxu0 %v3837_v42 }
  0xb7   : > { %3550 = vmatprep.subr.bf16.mxu1 %v3837_v42 }
  0xb8   : > { %3540 = vmatpush3.bf16.msra.mxu0 %v3837_v42 }
  0xb9   : > { %3552 = vmatpush3.bf16.msra.mxu1 %v3837_v42 }
  0xbb   : > { %2523 = vmatmul.mubr.bf16.gmra.mrb[68].mxu0 %v3829_v39 }
  0xbc   : > { %2530 = vmatprep.mubr.bf16.mxu0 %v3831_v41  ;;  %2588 = vmatmul.mubr.bf16.gmra.mrb[68].mxu1 %v3830_v40 }
  0xbd   : > { %2595 = vmatprep.mubr.bf16.mxu1 %v3833_v43 }
  0xc3   : > { %2531 = vmatmul.mubr.bf16.gmra.mrb[72].mxu0 %v3835_v44 }
  0xc4   : > { %2538 = vmatprep.mubr.bf16.mxu0 %v3838_v45  ;;  %2596 = vmatmul.mubr.bf16.gmra.mrb[72].mxu1 %v3836_v46 }
  0xc5   : > { %2603 = vmatprep.mubr.bf16.mxu1 %v3840_v47 }
  0xcb   : > { %2539 = vmatmul.mubr.bf16.gmra.mrb[76].mxu0 %v3842_v48 }
  0xcc   : > { %3541 = vmatprep.mubr.msk.bf16.mxu0 %vm1949_vm0, %v3844_v49  ;;  %2604 = vmatmul.mubr.bf16.gmra.mrb[76].mxu1 %v3843_v50 }
  0xcd   : > { %3545 = vmatprep.mubr.msk.bf16.mxu1 %vm1949_vm0, %v3845_v51 }
  0xd3   : > { %3542 = vmatmul.mubr.msk.bf16.vlgmr.msra.gmra.mrb[80].mxu0 %vm1949_vm0, %v3846_v52 }
  0xd4   : > { %3546 = vmatmul.mubr.msk.bf16.vlgmr.msra.gmra.mrb[80].mxu1 %vm1949_vm0, %v3847_v53 }
 0x106   : > { %v3147_v54 = vpop.f32.mrb[0].mxu0 }
 0x107   : > { %v3187_v55 = vpop.f32.mrb[0].mxu1  ;;  %v3148_v56 = vpop.f32.mrb[1].mxu0 }
 0x108   : > { %v3149_v57 = vadd.f32 %v3148_v56, %v3147_v54  ;;  %v3188_v58 = vpop.f32.mrb[1].mxu1  ;;  %v3150_v59 = vpop.f32.mrb[2].mxu0 }
 0x109   : > { %v3189_v60 = vadd.f32 %v3188_v58, %v3187_v55  ;;  %v3190_v61 = vpop.f32.mrb[2].mxu1  ;;  %v3151_v62 = vpop.f32.mrb[3].mxu0 }
 0x10a   : > { %v3152_v63 = vadd.f32 %v3151_v62, %v3150_v59  ;;  %v3191_v0 = vpop.f32.mrb[3].mxu1 }
 0x10b   : > { %v2062_v1 = vadd.f32 %v3189_v60, %v3149_v57  ;;  %v3192_v2 = vadd.f32 %v3191_v0, %v3190_v61 }
 0x10d   : > { %v2065_v3 = vadd.f32 %v3192_v2, %v3152_v63 }
 0x10e   : > { %v3153_v4 = vpop.f32.mrb[4].mxu0 }
 0x10f   : > { %v3193_v5 = vpop.f32.mrb[4].mxu1  ;;  %v3154_v6 = vpop.f32.mrb[5].mxu0 }
 0x110   : > { %v3155_v7 = vadd.f32 %v3154_v6, %v3153_v4  ;;  %v3194_v8 = vpop.f32.mrb[5].mxu1  ;;  %v3156_v9 = vpop.f32.mrb[6].mxu0 }
 0x111   : > { %v3195_v10 = vadd.f32 %v3194_v8, %v3193_v5  ;;  %v3196_v11 = vpop.f32.mrb[6].mxu1  ;;  %v3157_v12 = vpop.f32.mrb[7].mxu0 }
 0x112   : > { %v3158_v13 = vadd.f32 %v3157_v12, %v3156_v9  ;;  %v3197_v14 = vpop.f32.mrb[7].mxu1 }
 0x113   : > { %v2070_v15 = vadd.f32 %v3195_v10, %v3155_v7  ;;  %v3198_v16 = vadd.f32 %v3197_v14, %v3196_v11 }
 0x115   : > { %v2073_v17 = vadd.f32 %v3198_v16, %v3158_v13 }
 0x116   : > { %v3159_v18 = vpop.f32.mrb[8].mxu0 }
 0x117   : > { %v3199_v19 = vpop.f32.mrb[8].mxu1  ;;  %v3160_v20 = vpop.f32.mrb[9].mxu0 }
 0x118   : > { %v3161_v21 = vadd.f32 %v3160_v20, %v3159_v18  ;;  %v3200_v22 = vpop.f32.mrb[9].mxu1  ;;  %v3162_v23 = vpop.f32.mrb[10].mxu0 }
 0x119   : > { %v3201_v24 = vadd.f32 %v3200_v22, %v3199_v19  ;;  %v3202_v25 = vpop.f32.mrb[10].mxu1  ;;  %v3163_v26 = vpop.f32.mrb[11].mxu0 }
 0x11a   : > { %v3164_v27 = vadd.f32 %v3163_v26, %v3162_v23  ;;  %v3203_v28 = vpop.f32.mrb[11].mxu1 }
 0x11b   : > { %v2078_v29 = vadd.f32 %v3201_v24, %v3161_v21  ;;  %v3204_v30 = vadd.f32 %v3203_v28, %v3202_v25 }
 0x11d   : > { %v2081_v31 = vadd.f32 %v3204_v30, %v3164_v27 }
 0x11e   : > { %v3165_v32 = vpop.f32.mrb[12].mxu0 }
 0x11f   : > { %v3205_v33 = vpop.f32.mrb[12].mxu1  ;;  %v3166_v34 = vpop.f32.mrb[13].mxu0 }
 0x120   : > { %v3206_v35 = vpop.f32.mrb[13].mxu1  ;;  %v3167_v36 = vadd.f32 %v3166_v34, %v3165_v32  ;;  %v3168_v38 = vpop.f32.mrb[14].mxu0 }
 0x121   : > { %v3207_v37 = vadd.f32 %v3206_v35, %v3205_v33  ;;  %v3208_v39 = vpop.f32.mrb[14].mxu1  ;;  %v3169_v40 = vpop.f32.mrb[15].mxu0 }
 0x122   : > { %v3209_v41 = vpop.f32.mrb[15].mxu1  ;;  %v3170_v43 = vadd.f32 %v3169_v40, %v3168_v38 }
 0x123   : > { %v2086_v42 = vadd.f32 %v3207_v37, %v3167_v36  ;;  %v3210_v44 = vadd.f32 %v3209_v41, %v3208_v39 }
 0x125   : > { %v2089_v45 = vadd.f32 %v3210_v44, %v3170_v43 }
 0x126   : > { %v3227_v46 = vpop.f32.mrb[16].mxu0 }
 0x127   : > { %v3228_v47 = vpop.f32.mrb[17].mxu0  ;;  %v3267_v50 = vpop.f32.mrb[16].mxu1 }
 0x128   : > { %v3229_v48 = vadd.f32 %v3228_v47, %v3227_v46  ;;  %v3230_v49 = vpop.f32.mrb[18].mxu0  ;;  %v3268_v52 = vpop.f32.mrb[17].mxu1 }
 0x129   : > { %v3231_v51 = vpop.f32.mrb[19].mxu0  ;;  %v3269_v55 = vadd.f32 %v3268_v52, %v3267_v50  ;;  %v3270_v56 = vpop.f32.mrb[18].mxu1 }
 0x12a   : > { %v2127_v53 = vadd.f32 %v3229_v48, %v2062_v1  ;;  %v3232_v54 = vadd.f32 %v3231_v51, %v3230_v49  ;;  %v3271_v57 = vpop.f32.mrb[19].mxu1 }
 0x12b   : > { %v3272_v60 = vadd.f32 %v3271_v57, %v3270_v56 }
 0x12c   : > { %v2130_v58 = vadd.f32 %v3232_v54, %v2065_v3  ;;  %v2192_v59 = vadd.f32 %v3269_v55, %v2127_v53 }
 0x12e   : > { %v2195_v61 = vadd.f32 %v3272_v60, %v2130_v58  ;;  %v3233_v62 = vpop.f32.mrb[20].mxu0 }
 0x12f   : > { %v3234_v63 = vpop.f32.mrb[21].mxu0  ;;  %v3273_v0 = vpop.f32.mrb[20].mxu1 }
 0x130   : > { %v3235_v2 = vadd.f32 %v3234_v63, %v3233_v62  ;;  %v3236_v4 = vpop.f32.mrb[22].mxu0  ;;  %v3274_v5 = vpop.f32.mrb[21].mxu1 }
 0x131   : > { %v3237_v6 = vpop.f32.mrb[23].mxu0  ;;  %v3275_v7 = vadd.f32 %v3274_v5, %v3273_v0  ;;  %v3276_v8 = vpop.f32.mrb[22].mxu1 }
 0x132   : > { %v2135_v9 = vadd.f32 %v3235_v2, %v2070_v15  ;;  %v3238_v10 = vadd.f32 %v3237_v6, %v3236_v4  ;;  %v3277_v1 = vpop.f32.mrb[23].mxu1 }
 0x133   : > { %v3278_v11 = vadd.f32 %v3277_v1, %v3276_v8 }
 0x134   : > { %v2138_v12 = vadd.f32 %v3238_v10, %v2073_v17  ;;  %v2200_v13 = vadd.f32 %v3275_v7, %v2135_v9 }
 0x136   : > { %v2203_v14 = vadd.f32 %v3278_v11, %v2138_v12  ;;  %v3239_v3 = vpop.f32.mrb[24].mxu0 }
 0x137   : > { %v3279_v16 = vpop.f32.mrb[24].mxu1  ;;  %v3240_v18 = vpop.f32.mrb[25].mxu0 }
 0x138   : > { %v3280_v19 = vpop.f32.mrb[25].mxu1  ;;  %v3241_v20 = vadd.f32 %v3240_v18, %v3239_v3  ;;  %v3242_v21 = vpop.f32.mrb[26].mxu0 }
 0x139   : > { %v3281_v22 = vadd.f32 %v3280_v19, %v3279_v16  ;;  %v3282_v23 = vpop.f32.mrb[26].mxu1  ;;  %v3243_v24 = vpop.f32.mrb[27].mxu0 }
 0x13a   : > { %v3283_v25 = vpop.f32.mrb[27].mxu1  ;;  %v2143_v26 = vadd.f32 %v3241_v20, %v2078_v29  ;;  %v3244_v27 = vadd.f32 %v3243_v24, %v3242_v21 }
 0x13b   : > { %v3284_v28 = vadd.f32 %v3283_v25, %v3282_v23 }
 0x13c   : > { %v2146_v15 = vadd.f32 %v3244_v27, %v2081_v31  ;;  %v2208_v30 = vadd.f32 %v3281_v22, %v2143_v26 }
 0x13e   : > { %v2211_v32 = vadd.f32 %v3284_v28, %v2146_v15  ;;  %v3245_v33 = vpop.f32.mrb[28].mxu0 }
 0x13f   : > { %v3246_v17 = vpop.f32.mrb[29].mxu0  ;;  %v3285_v34 = vpop.f32.mrb[28].mxu1 }
 0x140   : > { %v3247_v35 = vadd.f32 %v3246_v17, %v3245_v33  ;;  %v3248_v36 = vpop.f32.mrb[30].mxu0  ;;  %v3286_v37 = vpop.f32.mrb[29].mxu1 }
 0x141   : > { %v3249_v38 = vpop.f32.mrb[31].mxu0  ;;  %v3287_v39 = vadd.f32 %v3286_v37, %v3285_v34  ;;  %v3288_v40 = vpop.f32.mrb[30].mxu1 }
 0x142   : > { %v2151_v41 = vadd.f32 %v3247_v35, %v2086_v42  ;;  %v3250_v43 = vadd.f32 %v3249_v38, %v3248_v36  ;;  %v3289_v44 = vpop.f32.mrb[31].mxu1 }
 0x143   : > { %v3290_v46 = vadd.f32 %v3289_v44, %v3288_v40 }
 0x144   : > { %v2154_v47 = vadd.f32 %v3250_v43, %v2089_v45  ;;  %v2216_v29 = vadd.f32 %v3287_v39, %v2151_v41 }
 0x146   : > { %v2219_v48 = vadd.f32 %v3290_v46, %v2154_v47  ;;  %v3307_v49 = vpop.f32.mrb[32].mxu0 }
 0x147   : > { %v3308_v31 = vpop.f32.mrb[33].mxu0  ;;  %v3347_v50 = vpop.f32.mrb[32].mxu1 }
 0x148   : > { %v3309_v51 = vadd.f32 %v3308_v31, %v3307_v49  ;;  %v3310_v52 = vpop.f32.mrb[34].mxu0  ;;  %v3348_v53 = vpop.f32.mrb[33].mxu1 }
 0x149   : > { %v3311_v54 = vpop.f32.mrb[35].mxu0  ;;  %v3349_v55 = vadd.f32 %v3348_v53, %v3347_v50  ;;  %v3350_v56 = vpop.f32.mrb[34].mxu1 }
 0x14a   : > { %v2257_v57 = vadd.f32 %v3309_v51, %v2192_v59  ;;  %v3312_v58 = vadd.f32 %v3311_v54, %v3310_v52  ;;  %v3351_v60 = vpop.f32.mrb[35].mxu1 }
 0x14b   : > { %v3352_v62 = vadd.f32 %v3351_v60, %v3350_v56 }
 0x14c   : > { %v2260_v42 = vadd.f32 %v3312_v58, %v2195_v61  ;;  %v2322_v63 = vadd.f32 %v3349_v55, %v2257_v57 }
 0x14e   : > { %v2325_v0 = vadd.f32 %v3352_v62, %v2260_v42  ;;  %v3313_v2 = vpop.f32.mrb[36].mxu0 }
 0x14f   : > { %v3353_v45 = vpop.f32.mrb[36].mxu1  ;;  %v3314_v4 = vpop.f32.mrb[37].mxu0 }
 0x150   : > { %v3354_v5 = vpop.f32.mrb[37].mxu1  ;;  %v3315_v6 = vadd.f32 %v3314_v4, %v3313_v2  ;;  %v3316_v7 = vpop.f32.mrb[38].mxu0 }
 0x151   : > { %v3355_v8 = vadd.f32 %v3354_v5, %v3353_v45  ;;  %v3356_v9 = vpop.f32.mrb[38].mxu1  ;;  %v3317_v10 = vpop.f32.mrb[39].mxu0 }
 0x152   : > { %v3357_v1 = vpop.f32.mrb[39].mxu1  ;;  %v2265_v11 = vadd.f32 %v3315_v6, %v2200_v13  ;;  %v3318_v12 = vadd.f32 %v3317_v10, %v3316_v7 }
 0x153   : > { %v3358_v3 = vadd.f32 %v3357_v1, %v3356_v9 }
 0x154   : > { %v2268_v59 = vadd.f32 %v3318_v12, %v2203_v14  ;;  %v2330_v16 = vadd.f32 %v3355_v8, %v2265_v11 }
 0x156   : > { %v2333_v18 = vadd.f32 %v3358_v3, %v2268_v59  ;;  %v3319_v19 = vpop.f32.mrb[40].mxu0 }
 0x157   : > { %v3320_v61 = vpop.f32.mrb[41].mxu0  ;;  %v3359_v20 = vpop.f32.mrb[40].mxu1 }
 0x158   : > { %v3321_v21 = vadd.f32 %v3320_v61, %v3319_v19  ;;  %v3322_v22 = vpop.f32.mrb[42].mxu0  ;;  %v3360_v23 = vpop.f32.mrb[41].mxu1 }
 0x159   : > { %v3323_v24 = vpop.f32.mrb[43].mxu0  ;;  %v3361_v25 = vadd.f32 %v3360_v23, %v3359_v20  ;;  %v3362_v26 = vpop.f32.mrb[42].mxu1 }
 0x15a   : > { %v2273_v27 = vadd.f32 %v3321_v21, %v2208_v30  ;;  %v3324_v28 = vadd.f32 %v3323_v24, %v3322_v22  ;;  %v3363_v15 = vpop.f32.mrb[43].mxu1 }
 0x15b   : > { %v3364_v33 = vadd.f32 %v3363_v15, %v3362_v26 }
 0x15c   : > { %v2276_v17 = vadd.f32 %v3324_v28, %v2211_v32  ;;  %v2338_v13 = vadd.f32 %v3361_v25, %v2273_v27 }
 0x15e   : > { %v2341_v34 = vadd.f32 %v3364_v33, %v2276_v17  ;;  %v3325_v35 = vpop.f32.mrb[44].mxu0 }
 0x15f   : > { %v3326_v14 = vpop.f32.mrb[45].mxu0  ;;  %v3365_v36 = vpop.f32.mrb[44].mxu1 }
 0x160   : > { %v3327_v37 = vadd.f32 %v3326_v14, %v3325_v35  ;;  %v3328_v38 = vpop.f32.mrb[46].mxu0  ;;  %v3366_v39 = vpop.f32.mrb[45].mxu1 }
 0x161   : > { %v3329_v40 = vpop.f32.mrb[47].mxu0  ;;  %v3367_v41 = vadd.f32 %v3366_v39, %v3365_v36  ;;  %v3368_v43 = vpop.f32.mrb[46].mxu1 }
 0x162   : > { %v2281_v44 = vadd.f32 %v3327_v37, %v2216_v29  ;;  %v3330_v46 = vadd.f32 %v3329_v40, %v3328_v38  ;;  %v3369_v47 = vpop.f32.mrb[47].mxu1 }
 0x163   : > { %v3370_v49 = vadd.f32 %v3369_v47, %v3368_v43 }
 0x164   : > { %v2284_v30 = vadd.f32 %v3330_v46, %v2219_v48  ;;  %v2346_v31 = vadd.f32 %v3367_v41, %v2281_v44 }
 0x166   : > { %v2349_v50 = vadd.f32 %v3370_v49, %v2284_v30  ;;  %v3387_v51 = vpop.f32.mrb[48].mxu0 }
 0x167   : > { %v3388_v32 = vpop.f32.mrb[49].mxu0  ;;  %v3427_v52 = vpop.f32.mrb[48].mxu1 }
 0x168   : > { %v3389_v53 = vadd.f32 %v3388_v32, %v3387_v51  ;;  %v3390_v54 = vpop.f32.mrb[50].mxu0  ;;  %v3428_v55 = vpop.f32.mrb[49].mxu1 }
 0x169   : > { %v3391_v56 = vpop.f32.mrb[51].mxu0  ;;  %v3429_v57 = vadd.f32 %v3428_v55, %v3427_v52  ;;  %v3430_v58 = vpop.f32.mrb[50].mxu1 }
 0x16a   : > { %v2387_v60 = vadd.f32 %v3389_v53, %v2322_v63  ;;  %v3392_v62 = vadd.f32 %v3391_v56, %v3390_v54  ;;  %v3431_v42 = vpop.f32.mrb[51].mxu1 }
 0x16b   : > { %v3432_v2 = vadd.f32 %v3431_v42, %v3430_v58 }
 0x16c   : > { %v2390_v29 = vadd.f32 %v3392_v62, %v2325_v0  ;;  %v2452_v45 = vadd.f32 %v3429_v57, %v2387_v60 }
 0x16e   : > { %v2455_v4 = vadd.f32 %v3432_v2, %v2390_v29  ;;  %v3393_v5 = vpop.f32.mrb[52].mxu0 }
 0x16f   : > { %v3394_v48 = vpop.f32.mrb[53].mxu0  ;;  %v3433_v6 = vpop.f32.mrb[52].mxu1 }
 0x170   : > { %v3395_v7 = vadd.f32 %v3394_v48, %v3393_v5  ;;  %v3396_v8 = vpop.f32.mrb[54].mxu0  ;;  %v3434_v9 = vpop.f32.mrb[53].mxu1 }
 0x171   : > { %v3397_v10 = vpop.f32.mrb[55].mxu0  ;;  %v3435_v1 = vadd.f32 %v3434_v9, %v3433_v6  ;;  %v3436_v11 = vpop.f32.mrb[54].mxu1 }
 0x172   : > { %v2395_v12 = vadd.f32 %v3395_v7, %v2330_v16  ;;  %v3398_v3 = vadd.f32 %v3397_v10, %v3396_v8  ;;  %v3437_v59 = vpop.f32.mrb[55].mxu1 }
 0x173   : > { %v3438_v19 = vadd.f32 %v3437_v59, %v3436_v11 }
 0x174   : > { %v2398_v63 = vadd.f32 %v3398_v3, %v2333_v18  ;;  %v2460_v61 = vadd.f32 %v3435_v1, %v2395_v12 }
 0x176   : > { %v2463_v20 = vadd.f32 %v3438_v19, %v2398_v63  ;;  %v3399_v21 = vpop.f32.mrb[56].mxu0 }
 0x177   : > { %v3400_v0 = vpop.f32.mrb[57].mxu0  ;;  %v3439_v22 = vpop.f32.mrb[56].mxu1 }
 0x178   : > { %v3401_v23 = vadd.f32 %v3400_v0, %v3399_v21  ;;  %v3402_v24 = vpop.f32.mrb[58].mxu0  ;;  %v3440_v25 = vpop.f32.mrb[57].mxu1 }
 0x179   : > { %v3403_v26 = vpop.f32.mrb[59].mxu0  ;;  %v3441_v27 = vadd.f32 %v3440_v25, %v3439_v22  ;;  %v3442_v28 = vpop.f32.mrb[58].mxu1 }
 0x17a   : > { %v2403_v15 = vadd.f32 %v3401_v23, %v2338_v13  ;;  %v3404_v33 = vadd.f32 %v3403_v26, %v3402_v24  ;;  %v3443_v17 = vpop.f32.mrb[59].mxu1 }
 0x17b   : > { %v3444_v35 = vadd.f32 %v3443_v17, %v3442_v28 }
 0x17c   : > { %v2406_v16 = vadd.f32 %v3404_v33, %v2341_v34  ;;  %v2468_v14 = vadd.f32 %v3441_v27, %v2403_v15 }
 0x17e   : > { %v2471_v36 = vadd.f32 %v3444_v35, %v2406_v16  ;;  %v3405_v37 = vpop.f32.mrb[60].mxu0 }
 0x17f   : > { %v3445_v18 = vpop.f32.mrb[60].mxu1  ;;  %v3406_v38 = vpop.f32.mrb[61].mxu0 }
 0x180   : > { %v3446_v39 = vpop.f32.mrb[61].mxu1  ;;  %v3407_v40 = vadd.f32 %v3406_v38, %v3405_v37  ;;  %v3408_v41 = vpop.f32.mrb[62].mxu0 }
 0x181   : > { %v3447_v43 = vadd.f32 %v3446_v39, %v3445_v18  ;;  %v3448_v44 = vpop.f32.mrb[62].mxu1  ;;  %v3409_v46 = vpop.f32.mrb[63].mxu0 }
 0x182   : > { %v3449_v47 = vpop.f32.mrb[63].mxu1  ;;  %v2411_v49 = vadd.f32 %v3407_v40, %v2346_v31  ;;  %v3410_v30 = vadd.f32 %v3409_v46, %v3408_v41 }
 0x183   : > { %v3450_v51 = vadd.f32 %v3449_v47, %v3448_v44 }
 0x184   : > { %v2414_v13 = vadd.f32 %v3410_v30, %v2349_v50  ;;  %v2476_v32 = vadd.f32 %v3447_v43, %v2411_v49 }
 0x186   : > { %v2479_v52 = vadd.f32 %v3450_v51, %v2414_v13  ;;  %v3467_v53 = vpop.f32.mrb[64].mxu0 }
 0x187   : > { %v3468_v34 = vpop.f32.mrb[65].mxu0  ;;  %v3507_v56 = vpop.f32.mrb[64].mxu1 }
 0x188   : > { %v3469_v54 = vadd.f32 %v3468_v34, %v3467_v53  ;;  %v3470_v55 = vpop.f32.mrb[66].mxu0  ;;  %v3508_v58 = vpop.f32.mrb[65].mxu1 }
 0x189   : > { %v3471_v57 = vpop.f32.mrb[67].mxu0  ;;  %v3509_v42 = vadd.f32 %v3508_v58, %v3507_v56  ;;  %v3510_v2 = vpop.f32.mrb[66].mxu1 }
 0x18a   : > { %v2517_v60 = vadd.f32 %v3469_v54, %v2452_v45  ;;  %v3472_v62 = vadd.f32 %v3471_v57, %v3470_v55  ;;  %v3511_v29 = vpop.f32.mrb[67].mxu1 }
 0x18b   : > { %v3512_v48 = vadd.f32 %v3511_v29, %v3510_v2 }
 0x18c   : > { %v2520_v5 = vadd.f32 %v3472_v62, %v2455_v4  ;;  %v2582_v31 = vadd.f32 %v3509_v42, %v2517_v60 }
 0x18e   : > { %v3473_v6 = vpop.f32.mrb[68].mxu0  ;;  %v4317_v7 = vadd.f32 %v3512_v48, %v2520_v5 }
 0x18f   : > { %v3474_v50 = vpop.f32.mrb[69].mxu0  ;;  %v3513_v10 = vpop.f32.mrb[68].mxu1 }
 0x190   : > { %v3475_v8 = vadd.f32 %v3474_v50, %v3473_v6  ;;  %v3476_v9 = vpop.f32.mrb[70].mxu0  ;;  %v3514_v11 = vpop.f32.mrb[69].mxu1 }
 0x191   : > { %v3477_v1 = vpop.f32.mrb[71].mxu0  ;;  %v3515_v59 = vadd.f32 %v3514_v11, %v3513_v10  ;;  %v3516_v45 = vpop.f32.mrb[70].mxu1 }
 0x192   : > { %v2525_v12 = vadd.f32 %v3475_v8, %v2460_v61  ;;  %v3478_v3 = vadd.f32 %v3477_v1, %v3476_v9  ;;  %v3517_v19 = vpop.f32.mrb[71].mxu1 }
 0x193   : > { %v3518_v21 = vadd.f32 %v3517_v19, %v3516_v45 }
 0x194   : > { %v2528_v63 = vadd.f32 %v3478_v3, %v2463_v20  ;;  %v2590_v0 = vadd.f32 %v3515_v59, %v2525_v12 }
 0x196   : > { %v3479_v4 = vpop.f32.mrb[72].mxu0  ;;  %v2593_v22 = vadd.f32 %v3518_v21, %v2528_v63 }
 0x197   : > { %v3480_v23 = vpop.f32.mrb[73].mxu0  ;;  %v3519_v26 = vpop.f32.mrb[72].mxu1 }
 0x198   : > { %v3481_v24 = vadd.f32 %v3480_v23, %v3479_v4  ;;  %v3482_v25 = vpop.f32.mrb[74].mxu0  ;;  %v3520_v28 = vpop.f32.mrb[73].mxu1 }
 0x199   : > { %v3483_v27 = vpop.f32.mrb[75].mxu0  ;;  %v3521_v17 = vadd.f32 %v3520_v28, %v3519_v26  ;;  %v3522_v35 = vpop.f32.mrb[74].mxu1 }
 0x19a   : > { %v2533_v15 = vadd.f32 %v3481_v24, %v2468_v14  ;;  %v3484_v33 = vadd.f32 %v3483_v27, %v3482_v25  ;;  %v3523_v61 = vpop.f32.mrb[75].mxu1 }
 0x19b   : > { %v3524_v37 = vadd.f32 %v3523_v61, %v3522_v35 }
 0x19c   : > { %v2536_v16 = vadd.f32 %v3484_v33, %v2471_v36  ;;  %v2598_v18 = vadd.f32 %v3521_v17, %v2533_v15 }
 0x19e   : > { %v3485_v38 = vpop.f32.mrb[76].mxu0  ;;  %v2601_v20 = vadd.f32 %v3524_v37, %v2536_v16 }
 0x19f   : > { %v3486_v39 = vpop.f32.mrb[77].mxu0  ;;  %v3525_v43 = vpop.f32.mrb[76].mxu1 }
 0x1a0   : > { %v3487_v40 = vadd.f32 %v3486_v39, %v3485_v38  ;;  %v3488_v41 = vpop.f32.mrb[78].mxu0  ;;  %v3526_v46 = vpop.f32.mrb[77].mxu1 }
 0x1a1   : > { %v3489_v44 = vpop.f32.mrb[79].mxu0  ;;  %v3527_v30 = vadd.f32 %v3526_v46, %v3525_v43  ;;  %v3528_v51 = vpop.f32.mrb[78].mxu1 }
 0x1a2   : > { %v2541_v47 = vadd.f32 %v3487_v40, %v2476_v32  ;;  %v3490_v49 = vadd.f32 %v3489_v44, %v3488_v41  ;;  %v3529_v14 = vpop.f32.mrb[79].mxu1 }
 0x1a3   : > { %v3530_v53 = vadd.f32 %v3529_v14, %v3528_v51 }
 0x1a4   : > { %v2544_v13 = vadd.f32 %v3490_v49, %v2479_v52  ;;  %v2606_v34 = vadd.f32 %v3527_v30, %v2541_v47 }
 0x1a6   : > { %v3543_v54 = vpop.f32.mrb[80].mxu0  ;;  %v2609_v36 = vadd.f32 %v3530_v53, %v2544_v13 }
 0x1a7   : > { %v2655_v55 = vadd.f32 %v3543_v54, %v2590_v0  ;;  %v2646_v56 = vpop.f32.mrb[81].mxu0  ;;  %v3547_v57 = vpop.f32.mrb[80].mxu1 }
 0x1a8   : > { %v2647_v58 = vadd.f32 %v2646_v56, %v2582_v31  ;;  %v3544_v60 = vpop.f32.mrb[82].mxu0  ;;  %v2671_v42 = vadd.f32 %v3547_v57, %v2606_v34  ;;  %v2662_v2 = vpop.f32.mrb[81].mxu1 }
 0x1a9   : > { %v2687_v62 = vmul.f32 0.2, %v2655_v55  ;;  %v2658_v29 = vadd.f32 %v3544_v60, %v2593_v22  ;;  %v2649_v32 = vpop.f32.mrb[83].mxu0  ;;  %vm2679_vm2 = vcmp.ge.f32.partialorder %v2655_v55, 0.0  ;;  %v2663_v48 = vadd.f32 %v2662_v2, %v2598_v18  ;;  %v3548_v6 = vpop.f32.mrb[82].mxu1 }
 0x1aa   : > { %v2685_v5 = vmul.f32 0.2, %v2647_v58  ;;  %v2650_v52 = vadd.f32 %v2649_v32, %v4317_v7  ;;  %vm2677_vm3 = vcmp.ge.f32.partialorder %v2647_v58, 0.0  ;;  %v2674_v8 = vadd.f32 %v3548_v6, %v2609_v36  ;;  %v2665_v9 = vpop.f32.mrb[83].mxu1 }
 0x1ab   : > { %v2688_v50 = vmul.f32 0.2, %v2658_v29  ;;  %v2695_v10 = vsel %vm2679_vm2, %v2655_v55, %v2687_v62  ;;  %v2689_v1 = vmul.f32 0.2, %v2663_v48  ;;  %v2666_v31 = vadd.f32 %v2665_v9, %v2601_v20 }
 0x1ac   : > { %v2708_v11 = vsel %vm2701_vm1, %v2695_v10, 0.0  ;;  %v2693_v12 = vsel %vm2677_vm3, %v2647_v58, %v2685_v5  ;;  %vm2680_vm4 = vcmp.ge.f32.partialorder %v2658_v29, 0.0  ;;  %vm2681_vm5 = vcmp.ge.f32.partialorder %v2663_v48, 0.0 }
 0x1ad   : > { %2709 = vadd.xlane.f32.xlu1 %v2708_v11  ;;  %v2690_v3 = vmul.f32 0.2, %v2666_v31  ;;  %v2702_v59 = vsel %vm2701_vm1, %v2693_v12, 0.0  ;;  %v2696_v45 = vsel %vm2680_vm4, %v2658_v29, %v2688_v50  ;;  %v2686_v19 = vmul.f32 0.2, %v2650_v52 }
 0x1ae   : > { %2703 = vadd.xlane.f32.xlu0 %v2702_v59  ;;  %v2697_v7 = vsel %vm2681_vm5, %v2663_v48, %v2689_v1  ;;  %vm2682_vm6 = vcmp.ge.f32.partialorder %v2666_v31, 0.0  ;;  %v2711_v63 = vsel %vm2701_vm1, %v2696_v45, 0.0  ;;  %vm2678_vm7 = vcmp.ge.f32.partialorder %v2650_v52, 0.0 }
 0x1af   : > { %v2692_v21 = vmul.f32 0.2, %v2674_v8  ;;  %v2698_v0 = vsel %vm2682_vm6, %v2666_v31, %v2690_v3  ;;  %v2714_v4 = vsel %vm2701_vm1, %v2697_v7, 0.0  ;;  %vm2684_vm8 = vcmp.ge.f32.partialorder %v2674_v8, 0.0 }
 0x1b0   : > { %v2691_v22 = vmul.f32 0.2, %v2671_v42  ;;  %v2694_v23 = vsel %vm2678_vm7, %v2650_v52, %v2686_v19  ;;  %v2717_v24 = vsel %vm2701_vm1, %v2698_v0, 0.0  ;;  %vm2683_vm9 = vcmp.ge.f32.partialorder %v2671_v42, 0.0 }
 0x1b1   : > { %2712 = vadd.xlane.f32.xlu1 %v2711_v63  ;;  %v2700_v25 = vsel %vm2684_vm8, %v2674_v8, %v2692_v21  ;;  %v2705_v26 = vsel %vm2701_vm1, %v2694_v23, 0.0 }
 0x1b2   : > { %2715 = vadd.xlane.f32.xlu0 %v2714_v4  ;;  %v2699_v27 = vsel %vm2683_vm9, %v2671_v42, %v2691_v22  ;;  %v2723_v28 = vsel %vm2701_vm1, %v2700_v25, 0.0 }
 0x1b3   : > { %v2720_v15 = vsel %vm2701_vm1, %v2699_v27, 0.0 }
 0x1b5   : > { %2718 = vadd.xlane.f32.xlu1 %v2717_v24 }
 0x1b6   : > { %2706 = vadd.xlane.f32.xlu0 %v2705_v26 }
 0x1b9   : > { %2724 = vadd.xlane.f32.xlu1 %v2723_v28 }
 0x1ba   : > { %2721 = vadd.xlane.f32.xlu0 %v2720_v15 }
 0x23a   : > { %v2710_v33 = vpop.xlane.xlu1 %2709 }
 0x23b   : > { %v2729_v17 = vmul.f32 0.04, %v2710_v33  ;;  %v2704_v35 = vpop.xlane.xlu0 %2703 }
 0x23c   : > { %v2727_v16 = vmul.f32 0.04, %v2704_v35 }
 0x23d   : > { %v4328_v61 = vsub.f32 %v2695_v10, %v2729_v17 }
 0x23e   : > { %v2713_v37 = vpop.xlane.xlu1 %2712  ;;  %v4330_v18 = vsub.f32 %v2693_v12, %v2727_v16 }
 0x23f   : > { %v2730_v38 = vmul.f32 0.04, %v2713_v37  ;;  %v2745_v20 = vmul.f32 %v4328_v61, %v4328_v61  ;;  %v2716_v39 = vpop.xlane.xlu0 %2715 }
 0x240   : > { %v2731_v41 = vmul.f32 0.04, %v2716_v39  ;;  %v2743_v44 = vmul.f32 %v4330_v18, %v4330_v18 }
 0x241   : > { %v4334_v40 = vsub.f32 %v2696_v45, %v2730_v38  ;;  %v2757_v43 = vsel %vm2701_vm1, %v2745_v20, 0.0 }
 0x242   : > { %v2719_v46 = vpop.xlane.xlu1 %2718  ;;  %2758 = vadd.xlane.f32.xlu0 %v2757_v43  ;;  %v4339_v47 = vsub.f32 %v2697_v7, %v2731_v41  ;;  %v2751_v53 = vsel %vm2701_vm1, %v2743_v44, 0.0 }
 0x243   : > { %v2732_v49 = vmul.f32 0.04, %v2719_v46  ;;  %v2746_v30 = vmul.f32 %v4334_v40, %v4334_v40  ;;  %v2707_v51 = vpop.xlane.xlu0 %2706 }
 0x244   : > { %v2728_v14 = vmul.f32 0.04, %v2707_v51  ;;  %v2747_v34 = vmul.f32 %v4339_v47, %v4339_v47 }
 0x245   : > { %v2760_v13 = vsel %vm2701_vm1, %v2746_v30, 0.0  ;;  %v4347_v36 = vsub.f32 %v2698_v0, %v2732_v49 }
 0x246   : > { %2761 = vadd.xlane.f32.xlu1 %v2760_v13  ;;  %v2725_v54 = vpop.xlane.xlu1 %2724  ;;  %2752 = vadd.xlane.f32.xlu0 %v2751_v53  ;;  %v4349_v55 = vsub.f32 %v2694_v23, %v2728_v14  ;;  %v2763_v60 = vsel %vm2701_vm1, %v2747_v34, 0.0 }
 0x247   : > { %v2734_v56 = vmul.f32 0.04, %v2725_v54  ;;  %v2722_v57 = vpop.xlane.xlu0 %2721  ;;  %v2748_v32 = vmul.f32 %v4347_v36, %v4347_v36 }
 0x248   : > { %v2733_v58 = vmul.f32 0.04, %v2722_v57  ;;  %v2744_v62 = vmul.f32 %v4349_v55, %v4349_v55 }
 0x249   : > { %v4354_v42 = vsub.f32 %v2700_v25, %v2734_v56  ;;  %v2766_v48 = vsel %vm2701_vm1, %v2748_v32, 0.0 }
 0x24a   : > { %2764 = vadd.xlane.f32.xlu0 %v2763_v60  ;;  %v4356_v2 = vsub.f32 %v2699_v27, %v2733_v58  ;;  %v2754_v29 = vsel %vm2701_vm1, %v2744_v62, 0.0 }
 0x24b   : > { %2755 = vadd.xlane.f32.xlu1 %v2754_v29  ;;  %v2750_v52 = vmul.f32 %v4354_v42, %v4354_v42 }
 0x24c   : > { %v2749_v5 = vmul.f32 %v4356_v2, %v4356_v2 }
 0x24d   : > { %v2772_v50 = vsel %vm2701_vm1, %v2750_v52, 0.0 }
 0x24e   : > { %v2769_v6 = vsel %vm2701_vm1, %v2749_v5, 0.0 }
 0x24f   : > { %2767 = vadd.xlane.f32.xlu1 %v2766_v48  ;;  %2770 = vadd.xlane.f32.xlu0 %v2769_v6 }
 0x253   : > { %2773 = vadd.xlane.f32.xlu1 %v2772_v50 }
 0x2cf   : > { %v2759_v8 = vpop.xlane.xlu0 %2758 }
 0x2d0   : > { %v2777_v9 = vmul.f32 0.04, %v2759_v8 }
 0x2d2   : > { %v2785_v10 = vadd.f32 1e-05, %v2777_v9 }
 0x2d3   : > { %v2762_v1 = vpop.xlane.xlu1 %2761  ;;  %v2753_v31 = vpop.xlane.xlu0 %2752 }
 0x2d4   : > { %3848 = vrsqrt.f32 %v2785_v10  ;;  %v2778_v11 = vmul.f32 0.04, %v2762_v1  ;;  %v2775_v12 = vmul.f32 0.04, %v2753_v31 }
 0x2d6   : > { %v2786_v3 = vadd.f32 1e-05, %v2778_v11  ;;  %v2783_v59 = vadd.f32 1e-05, %v2775_v12 }
 0x2d7   : > { %v2765_v45 = vpop.xlane.xlu0 %2764 }
 0x2d8   : > { %3850 = vrsqrt.f32 %v2786_v3  ;;  %v2779_v19 = vmul.f32 0.04, %v2765_v45  ;;  %v2756_v7 = vpop.xlane.xlu1 %2755 }
 0x2d9   : > { %3852 = vrsqrt.f32 %v2783_v59  ;;  %v2776_v21 = vmul.f32 0.04, %v2756_v7 }
 0x2da   : > { %v2787_v63 = vadd.f32 1e-05, %v2779_v19 }
 0x2db   : > { %v2784_v0 = vadd.f32 1e-05, %v2776_v21 }
 0x2dc   : > { %3854 = vrsqrt.f32 %v2787_v63  ;;  %v2768_v4 = vpop.xlane.xlu1 %2767  ;;  %v2771_v22 = vpop.xlane.xlu0 %2770 }
 0x2dd   : > { %3856 = vrsqrt.f32 %v2784_v0  ;;  %v2780_v24 = vmul.f32 0.04, %v2768_v4  ;;  %v2781_v25 = vmul.f32 0.04, %v2771_v22 }
 0x2de   : > { %v3849_v23 = vpop.eup %3848 }
 0x2df   : > { %v2801_v26 = vmul.f32 %v3849_v23, %v4328_v61  ;;  %v2788_v27 = vadd.f32 1e-05, %v2780_v24  ;;  %v2789_v28 = vadd.f32 1e-05, %v2781_v25 }
 0x2e0   : > { %v2774_v15 = vpop.xlane.xlu1 %2773 }
 0x2e1   : > { %2809 = vst.msk [vmem:[%s4372_s7 + $0x10] sm:$0xff] %vm2701_vm1, %v2801_v26  ;;  %3858 = vrsqrt.f32 %v2788_v27  ;;  %v2782_v17 = vmul.f32 0.04, %v2774_v15 }
 0x2e2   : > { %v3851_v33 = vpop.eup %3850  ;;  %3860 = vrsqrt.f32 %v2789_v28 }
 0x2e3   : > { %v3853_v35 = vpop.eup %3852  ;;  %v2802_v16 = vmul.f32 %v3851_v33, %v4334_v40  ;;  %v2790_v38 = vadd.f32 1e-05, %v2782_v17 }
 0x2e4   : > { %v2799_v37 = vmul.f32 %v3853_v35, %v4330_v18 }
 0x2e5   : > { %2810 = vst.msk [vmem:[%s4372_s7 + $0x18] sm:$0xff] %vm2701_vm1, %v2802_v16  ;;  %3862 = vrsqrt.f32 %v2790_v38 }
 0x2e6   : > { %v3855_v61 = vpop.eup %3854  ;;  %2807 = vst.msk [vmem:[%s4372_s7] sm:$0xff] %vm2701_vm1, %v2799_v37 }
 0x2e7   : > { %v2803_v20 = vmul.f32 %v3855_v61, %v4339_v47  ;;  %v3857_v39 = vpop.eup %3856 }
 0x2e8   : > { %v2800_v40 = vmul.f32 %v3857_v39, %v4349_v55 }
 0x2e9   : > { %2811 = vst.msk [vmem:[%s4372_s7 + $0x20] sm:$0xff] %vm2701_vm1, %v2803_v20 }
 0x2ea   : > { %2808 = vst.msk [vmem:[%s4372_s7 + $0x8] sm:$0xff] %vm2701_vm1, %v2800_v40 }
 0x2eb   : > { %v3859_v41 = vpop.eup %3858 }
 0x2ec   : > { %v3861_v18 = vpop.eup %3860  ;;  %v2804_v43 = vmul.f32 %v3859_v41, %v4347_v36 }
 0x2ed   : > { %v2805_v44 = vmul.f32 %v3861_v18, %v4356_v2 }
 0x2ee   : > { %2812 = vst.msk [vmem:[%s4372_s7 + $0x28] sm:$0xff] %vm2701_vm1, %v2804_v43 }
 0x2ef   : > { %v3863_v46 = vpop.eup %3862  ;;  %2813 = vst.msk [vmem:[%s4372_s7 + $0x30] sm:$0xff] %vm2701_vm1, %v2805_v44 }
 0x2f0   : > { %v2806_v47 = vmul.f32 %v3863_v46, %v4354_v42 }
 0x2f2   : > { %2814 = vst.msk [vmem:[%s4372_s7 + $0x38] sm:$0xff] %vm2701_vm1, %v2806_v47 }
 0x2f3 PF: > { %s12_s9 = sadd.s32 1, %s3870_s9  }
 0x2f4   : > { %p9_p4 = scmp.ge.s32.totalorder %s12_s9, 4  }
 0x2f6   :  { %11 = sbr.rel (!%p9_p4) target bundleno = 1 (0x1), region = 58 }

// kernel: netD_forward.9
= control target key start
LH: loop header
LB: loop body
LE: loop exit
PB: predicated region body
PF: predicated region fallthrough
CT: control target
= control target key end

     0   :  { %s5106_s9 = smov 0   ;;  %s5550_s0 = inlined_call_operand.vmem [shape: bf16[2,5184,1], index: 0, kind: input, shape index: {}]   ;;  %s5551_s1 = inlined_call_operand.vmem [shape: bf16[1,5184], index: 1, kind: input, shape index: {}]   ;;  %s5552_s2 = inlined_call_operand.vmem [shape: f32[2,1,1], index: 2, kind: output, shape index: {}]  }
   0x1 LB: > { %s3943_s10 = sadd.s32 4294967295, %s5086_s9   ;;  %p3947_p0 = scmp.ge.s32.totalorder %s5086_s9, 1  ;;  %s5086_s9 = sphi %s5106_s9, %s12_s9  }
   0x2   : > { %p112_p1 = scmp.lt.s32.totalorder %s5086_s9, 3 }
   0x4   : > { %p113_p2 = pnand %p3947_p0, %p112_p1 }
   0x5   : > { %p132_p3 = scmp.lt.s32.totalorder (!%p113_p2), %s3943_s10, 1  ;;  %v805_v0 = vlaneseq (!%p113_p2)  ;;  %v5088_v1 = vmov (!%p113_p2), 1966171168   ;;  %v141_v5 = vld [vmem:[%s5551_s1] sm:$0xff] (!%p113_p2)  ;;  %vm5090_vm0 = vmmov (!%p113_p2), 0   ;;  %vm3044_vm1 = vcmask (!%p113_p2), 523264  }
   0x6   : > { %116 = sbr.rel (%p113_p2) target bundleno = 596 (0x254), region = 28  ;;  %v803_v2 = vunpack.c.l.s4 (!%p113_p2), %v5088_v1  ;;  %v801_v31 = vcombine.high (!%p113_p2), %v141_v5, %v141_v5  ;;  %vm3894_vm2 = vcmask (!%p113_p2), 0  }
   0x7   : > { %v806_v3 = vshrl.u32 (!%p113_p2), %v805_v0, 7 }
   0x8   : > { %v804_v4 = vunpack.c.0.s8 (!%p113_p2), %v803_v2 }
   0xa   : > { %v5120_v6 = vsub.s32 (!%p113_p2), %v804_v4, %v806_v3 }
   0xc   : > { %v5129_v8 = vrot.slane (!%p113_p2), %v141_v5, %v5120_v6  ;;  %v5158_v36 = vrot.slane (!%p113_p2), %v801_v31, %v5120_v6  ;;  %v5195_v5 = vld [vmem:[%s5551_s1 + $0x8] sm:$0xff] (!%p113_p2) }
   0xd   : > { %s5554_s10 = smov (!%p132_p3, %s3943_s10), 1 }
   0xe   : > { %s4735_s11 = smul.u32 2592, %s5554_s10  ;;  %v816_v11 = vcombine.high %v5129_v8, %v5129_v8  ;;  %v817_v41 = vcombine.high %v5158_v36, %v5158_v36  ;;  %v824_v43 = vrot.slane %v5129_v8, %v5120_v6  ;;  %s139_s29 = scalar_lea.vmem %s5552_s2, %s5554_s10 }
  0x10   : > { %s5125_s16 = scalar_lea.vmem %s5550_s0, %s4735_s11  ;;  %v838_v14 = vrot.slane %v816_v11, %v5120_v6  ;;  %v845_v47 = vrot.slane %v817_v41, %v5120_v6  ;;  %v846_v48 = vcombine.high %v824_v43, %v824_v43 }
  0x11   : > { %v4747_v7 = vld [vmem:[%s5125_s16 + $0x40] sm:$0xff]   ;;  %v4751_v13 = vld [vmem:[%s5125_s16 + $0x48] sm:$0xff]   ;;  %v4755_v19 = vld [vmem:[%s5125_s16 + $0x50] sm:$0xff]  }
  0x12   : > { %v4748_v9 = vld [vmem:[%s5125_s16 + $0xc0] sm:$0xff]   ;;  %4278 = vmatprep.subr.bf16.mxu0 %v4747_v7  ;;  %v4752_v15 = vld [vmem:[%s5125_s16 + $0xc8] sm:$0xff]   ;;  %3080 = vmatprep.mubr.bf16.mxu0 %v838_v14  ;;  %v848_v17 = vcombine.high %v838_v14, %v838_v14  ;;  %v4756_v20 = vld [vmem:[%s5125_s16 + $0xd0] sm:$0xff]   ;;  %v849_v53 = vcombine.high %v845_v47, %v845_v47 }
  0x13   : > { %v4749_v10 = vld [vmem:[%s5125_s16] sm:$0xff]   ;;  %4300 = vmatprep.subr.bf16.mxu1 %v4748_v9  ;;  %v4753_v16 = vld [vmem:[%s5125_s16 + $0x8] sm:$0xff]   ;;  %v4757_v21 = vld [vmem:[%s5125_s16 + $0x10] sm:$0xff]  }
  0x14   : > { %v4750_v12 = vld [vmem:[%s5125_s16 + $0x80] sm:$0xff]   ;;  %4279 = vmatpush3.bf16.msra.mxu0 %v4749_v10  ;;  %v4754_v18 = vld [vmem:[%s5125_s16 + $0x88] sm:$0xff]   ;;  %3120 = vmatprep.mubr.bf16.mxu1 %v848_v17  ;;  %v4758_v22 = vld [vmem:[%s5125_s16 + $0x90] sm:$0xff]  }
  0x15   : > { %4301 = vmatpush3.bf16.msra.mxu1 %v4750_v12  ;;  %4280 = vmatprep.subr.bf16.mxu0 %v4751_v13  ;;  %v4759_v23 = vld [vmem:[%s5125_s16 + $0x58] sm:$0xff]   ;;  %v4763_v27 = vld [vmem:[%s5125_s16 + $0x60] sm:$0xff]   ;;  %v4767_v32 = vld [vmem:[%s5125_s16 + $0x68] sm:$0xff]   ;;  %v5204_v12 = vrot.slane %v5195_v5, %v5120_v6 }
  0x16   : > { %4302 = vmatprep.subr.bf16.mxu1 %v4752_v15  ;;  %v4760_v24 = vld [vmem:[%s5125_s16 + $0xd8] sm:$0xff]   ;;  %v4764_v28 = vld [vmem:[%s5125_s16 + $0xe0] sm:$0xff]   ;;  %v4768_v33 = vld [vmem:[%s5125_s16 + $0xe8] sm:$0xff]  }
  0x17   : > { %v4761_v25 = vld [vmem:[%s5125_s16 + $0x18] sm:$0xff]   ;;  %v4765_v29 = vld [vmem:[%s5125_s16 + $0x20] sm:$0xff]   ;;  %v4769_v34 = vld [vmem:[%s5125_s16 + $0x28] sm:$0xff]   ;;  %v865_v17 = vcombine.high %v5204_v12, %v5204_v12 }
  0x18   : > { %4281 = vmatpush3.bf16.msra.mxu0 %v4753_v16  ;;  %v4762_v26 = vld [vmem:[%s5125_s16 + $0x98] sm:$0xff]   ;;  %v4766_v30 = vld [vmem:[%s5125_s16 + $0xa0] sm:$0xff]   ;;  %v4770_v35 = vld [vmem:[%s5125_s16 + $0xa8] sm:$0xff]  }
  0x19   : > { %4303 = vmatpush3.bf16.msra.mxu1 %v4754_v18  ;;  %4282 = vmatprep.subr.bf16.mxu0 %v4755_v19  ;;  %v4771_v37 = vld [vmem:[%s5125_s16 + $0x70] sm:$0xff]   ;;  %v4775_v42 = vld [vmem:[%s5125_s16 + $0x78] sm:$0xff]   ;;  %v4780_v49 = vld [vmem:[%s5125_s16 + $0x140] sm:$0xff]  }
  0x1a   : > { %4304 = vmatprep.subr.bf16.mxu1 %v4756_v20  ;;  %v4772_v38 = vld [vmem:[%s5125_s16 + $0xf0] sm:$0xff]   ;;  %v4776_v44 = vld [vmem:[%s5125_s16 + $0xf8] sm:$0xff]   ;;  %v4781_v50 = vld [vmem:[%s5125_s16 + $0x100] sm:$0xff]   ;;  %v831_v20 = vrot.slane %v5158_v36, %v5120_v6 }
  0x1b   : > { %v4773_v39 = vld [vmem:[%s5125_s16 + $0x30] sm:$0xff]   ;;  %v4777_v45 = vld [vmem:[%s5125_s16 + $0x38] sm:$0xff]   ;;  %v4782_v51 = vld [vmem:[%s5125_s16 + $0x1c0] sm:$0xff]  }
  0x1c   : > { %4283 = vmatpush3.bf16.msra.mxu0 %v4757_v21  ;;  %v4774_v40 = vld [vmem:[%s5125_s16 + $0xb0] sm:$0xff]   ;;  %v4778_v46 = vld [vmem:[%s5125_s16 + $0xb8] sm:$0xff]   ;;  %v4783_v52 = vld [vmem:[%s5125_s16 + $0x180] sm:$0xff]  }
  0x1d   : > { %4305 = vmatpush3.bf16.msra.mxu1 %v4758_v22  ;;  %4284 = vmatprep.subr.bf16.mxu0 %v4759_v23  ;;  %v4784_v54 = vld [vmem:[%s5125_s16 + $0x148] sm:$0xff]   ;;  %v4788_v58 = vld [vmem:[%s5125_s16 + $0x150] sm:$0xff]   ;;  %v4792_v62 = vld [vmem:[%s5125_s16 + $0x158] sm:$0xff]   ;;  %v887_v23 = vrot.slane %v865_v17, %v5120_v6 }
  0x1e   : > { %4306 = vmatprep.subr.bf16.mxu1 %v4760_v24  ;;  %v4785_v55 = vld [vmem:[%s5125_s16 + $0x108] sm:$0xff]   ;;  %v4789_v59 = vld [vmem:[%s5125_s16 + $0x110] sm:$0xff]   ;;  %v4793_v63 = vld [vmem:[%s5125_s16 + $0x118] sm:$0xff]  }
  0x1f   : > { %v4786_v56 = vld [vmem:[%s5125_s16 + $0x1c8] sm:$0xff]   ;;  %v4790_v60 = vld [vmem:[%s5125_s16 + $0x1d0] sm:$0xff]   ;;  %v4794_v0 = vld [vmem:[%s5125_s16 + $0x1d8] sm:$0xff]  }
  0x20   : > { %4285 = vmatpush3.bf16.msra.mxu0 %v4761_v25  ;;  %v4787_v57 = vld [vmem:[%s5125_s16 + $0x188] sm:$0xff]   ;;  %v4791_v61 = vld [vmem:[%s5125_s16 + $0x190] sm:$0xff]   ;;  %v4795_v1 = vld [vmem:[%s5125_s16 + $0x198] sm:$0xff]  }
  0x21   : > { %4307 = vmatpush3.bf16.msra.mxu1 %v4762_v26  ;;  %4286 = vmatprep.subr.bf16.mxu0 %v4763_v27  ;;  %v4796_v2 = vld [vmem:[%s5125_s16 + $0x160] sm:$0xff]   ;;  %v4800_v8 = vld [vmem:[%s5125_s16 + $0x168] sm:$0xff]   ;;  %v4804_v13 = vld [vmem:[%s5125_s16 + $0x170] sm:$0xff]   ;;  %v847_v26 = vcombine.high %v831_v20, %v831_v20 }
  0x22   : > { %4308 = vmatprep.subr.bf16.mxu1 %v4764_v28  ;;  %v4797_v3 = vld [vmem:[%s5125_s16 + $0x120] sm:$0xff]   ;;  %v4801_v9 = vld [vmem:[%s5125_s16 + $0x128] sm:$0xff]   ;;  %v4805_v14 = vld [vmem:[%s5125_s16 + $0x130] sm:$0xff]  }
  0x23   : > { %v4798_v4 = vld [vmem:[%s5125_s16 + $0x1e0] sm:$0xff]   ;;  %v4802_v10 = vld [vmem:[%s5125_s16 + $0x1e8] sm:$0xff]   ;;  %v4806_v15 = vld [vmem:[%s5125_s16 + $0x1f0] sm:$0xff]  }
  0x24   : > { %4287 = vmatpush3.bf16.msra.mxu0 %v4765_v29  ;;  %v4799_v7 = vld [vmem:[%s5125_s16 + $0x1a0] sm:$0xff]   ;;  %v4803_v11 = vld [vmem:[%s5125_s16 + $0x1a8] sm:$0xff]   ;;  %v4807_v16 = vld [vmem:[%s5125_s16 + $0x1b0] sm:$0xff]   ;;  %v897_v29 = vcombine.high %v887_v23, %v887_v23 }
  0x25   : > { %4309 = vmatpush3.bf16.msra.mxu1 %v4766_v30  ;;  %4288 = vmatprep.subr.bf16.mxu0 %v4767_v32  ;;  %v4808_v18 = vld [vmem:[%s5125_s16 + $0x178] sm:$0xff]   ;;  %v4812_v24 = vld [vmem:[%s5125_s16 + $0x240] sm:$0xff]   ;;  %v4816_v30 = vld [vmem:[%s5125_s16 + $0x248] sm:$0xff]  }
  0x26   : > { %4310 = vmatprep.subr.bf16.mxu1 %v4768_v33  ;;  %v4809_v19 = vld [vmem:[%s5125_s16 + $0x138] sm:$0xff]   ;;  %v4813_v25 = vld [vmem:[%s5125_s16 + $0x200] sm:$0xff]   ;;  %v4817_v31 = vld [vmem:[%s5125_s16 + $0x208] sm:$0xff]  }
  0x27   : > { %v4810_v21 = vld [vmem:[%s5125_s16 + $0x1f8] sm:$0xff]   ;;  %v4814_v27 = vld [vmem:[%s5125_s16 + $0x2c0] sm:$0xff]   ;;  %v4818_v32 = vld [vmem:[%s5125_s16 + $0x2c8] sm:$0xff]  }
  0x28   : > { %4289 = vmatpush3.bf16.msra.mxu0 %v4769_v34  ;;  %v4811_v22 = vld [vmem:[%s5125_s16 + $0x1b8] sm:$0xff]   ;;  %v4815_v28 = vld [vmem:[%s5125_s16 + $0x280] sm:$0xff]   ;;  %v4819_v33 = vld [vmem:[%s5125_s16 + $0x288] sm:$0xff]  }
  0x29   : > { %4311 = vmatpush3.bf16.msra.mxu1 %v4770_v35  ;;  %4290 = vmatprep.subr.bf16.mxu0 %v4771_v37  ;;  %v4820_v34 = vld [vmem:[%s5125_s16 + $0x250] sm:$0xff]   ;;  %v4827_v41 = vld [vmem:[%s5125_s16 + $0x298] sm:$0xff]  }
  0x2a   : > { %4312 = vmatprep.subr.bf16.mxu1 %v4772_v38  ;;  %v4821_v35 = vld [vmem:[%s5125_s16 + $0x210] sm:$0xff]   ;;  %v4824_v38 = vld [vmem:[%s5125_s16 + $0x258] sm:$0xff]  }
  0x2b   : > { %v4822_v36 = vld [vmem:[%s5125_s16 + $0x2d0] sm:$0xff]   ;;  %v4859_v17 = vld [vmem:[%s5125_s16 + $0x398] sm:$0xff]  }
  0x2c   : > { %4291 = vmatpush3.bf16.msra.mxu0 %v4773_v39  ;;  %v4823_v37 = vld [vmem:[%s5125_s16 + $0x290] sm:$0xff]   ;;  %v4825_v39 = vld [vmem:[%s5125_s16 + $0x218] sm:$0xff]  }
  0x2d   : > { %4313 = vmatpush3.bf16.msra.mxu1 %v4774_v40  ;;  %4292 = vmatprep.subr.bf16.mxu0 %v4775_v42  ;;  %v4826_v40 = vld [vmem:[%s5125_s16 + $0x2d8] sm:$0xff]   ;;  %v4828_v42 = vld [vmem:[%s5125_s16 + $0x260] sm:$0xff]  }
  0x2e   : > { %4314 = vmatprep.subr.bf16.mxu1 %v4776_v44  ;;  %v4830_v44 = vld [vmem:[%s5125_s16 + $0x2e0] sm:$0xff]  }
  0x30   : > { %4293 = vmatpush3.bf16.msra.mxu0 %v4777_v45  ;;  %v4831_v45 = vld [vmem:[%s5125_s16 + $0x2a0] sm:$0xff]  }
  0x31   : > { %4315 = vmatpush3.bf16.msra.mxu1 %v4778_v46  ;;  %4322 = vmatprep.subr.bf16.mxu0 %v4780_v49  ;;  %v850_v46 = vcombine.high %v5195_v5, %v5195_v5  ;;  %v4834_v49 = vld [vmem:[%s5125_s16 + $0x2e8] sm:$0xff]  }
  0x32   : > { %4344 = vmatprep.subr.bf16.mxu1 %v4782_v51  ;;  %v4848_v5 = vld [vmem:[%s5125_s16 + $0x348] sm:$0xff]  }
  0x33   : > { %3081 = vmatmul.mubr.bf16.vlgmr.msra.gmra.mrb[0].mxu0 %v824_v43  ;;  %v4829_v43 = vld [vmem:[%s5125_s16 + $0x220] sm:$0xff]   ;;  %v5246_v51 = vrot.slane %v850_v46, %v5120_v6  ;;  %v4887_v46 = vld [vmem:[%s5125_s16 + $0x4d0] sm:$0xff]  }
  0x34   : > { %3121 = vmatmul.mubr.bf16.vlgmr.msra.gmra.mrb[0].mxu1 %v846_v48  ;;  %4323 = vmatpush3.bf16.msra.mxu0 %v4781_v50  ;;  %v4833_v48 = vld [vmem:[%s5125_s16 + $0x228] sm:$0xff]  }
  0x35   : > { %3160 = vmatprep.mubr.bf16.mxu0 %v845_v47  ;;  %4345 = vmatpush3.bf16.msra.mxu1 %v4783_v52  ;;  %v4832_v47 = vld [vmem:[%s5125_s16 + $0x268] sm:$0xff]   ;;  %v4836_v52 = vld [vmem:[%s5125_s16 + $0x270] sm:$0xff]  }
  0x36   : > { %4324 = vmatprep.subr.bf16.mxu0 %v4784_v54  ;;  %3200 = vmatprep.mubr.bf16.mxu1 %v849_v53  ;;  %v4835_v50 = vld [vmem:[%s5125_s16 + $0x2a8] sm:$0xff]   ;;  %v4837_v53 = vld [vmem:[%s5125_s16 + $0x230] sm:$0xff]  }
  0x37   : > { %4346 = vmatprep.subr.bf16.mxu1 %v4786_v56  ;;  %v4838_v54 = vld [vmem:[%s5125_s16 + $0x2f0] sm:$0xff]   ;;  %v866_v56 = vcombine.high %v5246_v51, %v5246_v51 }
  0x38   : > { %4325 = vmatpush3.bf16.msra.mxu0 %v4785_v55  ;;  %v4839_v55 = vld [vmem:[%s5125_s16 + $0x2b0] sm:$0xff]  }
  0x39   : > { %4347 = vmatpush3.bf16.msra.mxu1 %v4787_v57  ;;  %4326 = vmatprep.subr.bf16.mxu0 %v4788_v58  ;;  %v4840_v57 = vld [vmem:[%s5125_s16 + $0x278] sm:$0xff]  }
  0x3a   : > { %4348 = vmatprep.subr.bf16.mxu1 %v4790_v60  ;;  %v4841_v58 = vld [vmem:[%s5125_s16 + $0x238] sm:$0xff]  }
  0x3b   : > { %v4842_v60 = vld [vmem:[%s5125_s16 + $0x2f8] sm:$0xff]  }
  0x3c   : > { %4327 = vmatpush3.bf16.msra.mxu0 %v4789_v59  ;;  %v873_v59 = vrot.slane %v5204_v12, %v5120_v6  ;;  %v4854_v12 = vld [vmem:[%s5125_s16 + $0x3d0] sm:$0xff]  }
  0x3d   : > { %4349 = vmatpush3.bf16.msra.mxu1 %v4791_v61  ;;  %4328 = vmatprep.subr.bf16.mxu0 %v4792_v62  ;;  %v4843_v61 = vld [vmem:[%s5125_s16 + $0x2b8] sm:$0xff]   ;;  %v894_v62 = vrot.slane %v866_v56, %v5120_v6  ;;  %v4897_v56 = vld [vmem:[%s5125_s16 + $0x468] sm:$0xff]  }
  0x3e   : > { %4350 = vmatprep.subr.bf16.mxu1 %v4794_v0  ;;  %v4845_v0 = vld [vmem:[%s5125_s16 + $0x300] sm:$0xff]  }
  0x40   : > { %4329 = vmatpush3.bf16.msra.mxu0 %v4793_v63  ;;  %v4844_v63 = vld [vmem:[%s5125_s16 + $0x340] sm:$0xff]  }
  0x41   : > { %4351 = vmatpush3.bf16.msra.mxu1 %v4795_v1  ;;  %4330 = vmatprep.subr.bf16.mxu0 %v4796_v2  ;;  %v895_v1 = vcombine.high %v873_v59, %v873_v59  ;;  %v4846_v2 = vld [vmem:[%s5125_s16 + $0x3c0] sm:$0xff]  }
  0x42   : > { %4352 = vmatprep.subr.bf16.mxu1 %v4798_v4  ;;  %v898_v4 = vcombine.high %v894_v62, %v894_v62 }
  0x44   : > { %4331 = vmatpush3.bf16.msra.mxu0 %v4797_v3  ;;  %v4847_v3 = vld [vmem:[%s5125_s16 + $0x380] sm:$0xff]  }
  0x45   : > { %4353 = vmatpush3.bf16.msra.mxu1 %v4799_v7  ;;  %4332 = vmatprep.subr.bf16.mxu0 %v4800_v8  ;;  %v4849_v7 = vld [vmem:[%s5125_s16 + $0x308] sm:$0xff]  }
  0x46   : > { %4354 = vmatprep.subr.bf16.mxu1 %v4802_v10  ;;  %v4850_v8 = vld [vmem:[%s5125_s16 + $0x3c8] sm:$0xff]   ;;  %v4852_v10 = vld [vmem:[%s5125_s16 + $0x350] sm:$0xff]  }
  0x48   : > { %4333 = vmatpush3.bf16.msra.mxu0 %v4801_v9  ;;  %v4851_v9 = vld [vmem:[%s5125_s16 + $0x388] sm:$0xff]  }
  0x49   : > { %4355 = vmatpush3.bf16.msra.mxu1 %v4803_v11  ;;  %4334 = vmatprep.subr.bf16.mxu0 %v4804_v13  ;;  %v4853_v11 = vld [vmem:[%s5125_s16 + $0x310] sm:$0xff]  }
  0x4a   : > { %4356 = vmatprep.subr.bf16.mxu1 %v4806_v15  ;;  %v4855_v13 = vld [vmem:[%s5125_s16 + $0x390] sm:$0xff]   ;;  %v4857_v15 = vld [vmem:[%s5125_s16 + $0x318] sm:$0xff]  }
  0x4c   : > { %4335 = vmatpush3.bf16.msra.mxu0 %v4805_v14  ;;  %v4856_v14 = vld [vmem:[%s5125_s16 + $0x358] sm:$0xff]  }
  0x4d   : > { %4357 = vmatpush3.bf16.msra.mxu1 %v4807_v16  ;;  %4336 = vmatprep.subr.bf16.mxu0 %v4808_v18  ;;  %v4858_v16 = vld [vmem:[%s5125_s16 + $0x3d8] sm:$0xff]   ;;  %v4860_v18 = vld [vmem:[%s5125_s16 + $0x360] sm:$0xff]  }
  0x4e   : > { %4358 = vmatprep.subr.bf16.mxu1 %v4810_v21  ;;  %v4863_v21 = vld [vmem:[%s5125_s16 + $0x3a0] sm:$0xff]  }
  0x50   : > { %4337 = vmatpush3.bf16.msra.mxu0 %v4809_v19  ;;  %v4861_v19 = vld [vmem:[%s5125_s16 + $0x320] sm:$0xff]  }
  0x51   : > { %4359 = vmatpush3.bf16.msra.mxu1 %v4811_v22  ;;  %4366 = vmatprep.subr.bf16.mxu0 %v4812_v24  ;;  %v4864_v22 = vld [vmem:[%s5125_s16 + $0x368] sm:$0xff]  }
  0x52   : > { %4388 = vmatprep.subr.bf16.mxu1 %v4814_v27  ;;  %v4866_v24 = vld [vmem:[%s5125_s16 + $0x3e8] sm:$0xff]   ;;  %v4869_v27 = vld [vmem:[%s5125_s16 + $0x330] sm:$0xff]  }
  0x53   : > { %3161 = vmatmul.mubr.bf16.vlgmr.msra.gmra.mrb[4].mxu0 %v831_v20  ;;  %v4862_v20 = vld [vmem:[%s5125_s16 + $0x3e0] sm:$0xff]  }
  0x54   : > { %4367 = vmatpush3.bf16.msra.mxu0 %v4813_v25  ;;  %3201 = vmatmul.mubr.bf16.vlgmr.msra.gmra.mrb[4].mxu1 %v847_v26  ;;  %v4867_v25 = vld [vmem:[%s5125_s16 + $0x3a8] sm:$0xff]   ;;  %v4868_v26 = vld [vmem:[%s5125_s16 + $0x370] sm:$0xff]  }
  0x55   : > { %3240 = vmatprep.mubr.bf16.mxu0 %v887_v23  ;;  %4389 = vmatpush3.bf16.msra.mxu1 %v4815_v28  ;;  %v4865_v23 = vld [vmem:[%s5125_s16 + $0x328] sm:$0xff]   ;;  %v4870_v28 = vld [vmem:[%s5125_s16 + $0x3f0] sm:$0xff]  }
  0x56   : > { %4368 = vmatprep.subr.bf16.mxu0 %v4816_v30  ;;  %3280 = vmatprep.mubr.bf16.mxu1 %v897_v29  ;;  %v4871_v29 = vld [vmem:[%s5125_s16 + $0x3b0] sm:$0xff]   ;;  %v4872_v30 = vld [vmem:[%s5125_s16 + $0x378] sm:$0xff]  }
  0x57   : > { %4390 = vmatprep.subr.bf16.mxu1 %v4818_v32  ;;  %v880_v32 = vrot.slane %v5246_v51, %v5120_v6  ;;  %v4892_v51 = vld [vmem:[%s5125_s16 + $0x498] sm:$0xff]  }
  0x58   : > { %4369 = vmatpush3.bf16.msra.mxu0 %v4817_v31  ;;  %v4873_v31 = vld [vmem:[%s5125_s16 + $0x338] sm:$0xff]  }
  0x59   : > { %4391 = vmatpush3.bf16.msra.mxu1 %v4819_v33  ;;  %4370 = vmatprep.subr.bf16.mxu0 %v4820_v34  ;;  %v4874_v33 = vld [vmem:[%s5125_s16 + $0x3f8] sm:$0xff]  }
  0x5a   : > { %4392 = vmatprep.subr.bf16.mxu1 %v4822_v36  ;;  %v4876_v34 = vld [vmem:[%s5125_s16 + $0x3b8] sm:$0xff]   ;;  %v4878_v36 = vld [vmem:[%s5125_s16 + $0x400] sm:$0xff]  }
  0x5c   : > { %4371 = vmatpush3.bf16.msra.mxu0 %v4821_v35  ;;  %v4877_v35 = vld [vmem:[%s5125_s16 + $0x440] sm:$0xff]  }
  0x5d   : > { %4393 = vmatpush3.bf16.msra.mxu1 %v4823_v37  ;;  %4372 = vmatprep.subr.bf16.mxu0 %v4824_v38  ;;  %v896_v37 = vcombine.high %v880_v32, %v880_v32  ;;  %v4879_v38 = vld [vmem:[%s5125_s16 + $0x4c0] sm:$0xff]  }
  0x5e   : > { %4394 = vmatprep.subr.bf16.mxu1 %v4826_v40  ;;  %v4881_v40 = vld [vmem:[%s5125_s16 + $0x448] sm:$0xff]  }
  0x60   : > { %4373 = vmatpush3.bf16.msra.mxu0 %v4825_v39  ;;  %v4880_v39 = vld [vmem:[%s5125_s16 + $0x480] sm:$0xff]  }
  0x61   : > { %4395 = vmatpush3.bf16.msra.mxu1 %v4827_v41  ;;  %4374 = vmatprep.subr.bf16.mxu0 %v4828_v42  ;;  %v4882_v41 = vld [vmem:[%s5125_s16 + $0x408] sm:$0xff]  }
  0x62   : > { %4396 = vmatprep.subr.bf16.mxu1 %v4830_v44  ;;  %v4883_v42 = vld [vmem:[%s5125_s16 + $0x4c8] sm:$0xff]   ;;  %v4885_v44 = vld [vmem:[%s5125_s16 + $0x450] sm:$0xff]  }
  0x64   : > { %4375 = vmatpush3.bf16.msra.mxu0 %v4829_v43  ;;  %v4884_v43 = vld [vmem:[%s5125_s16 + $0x488] sm:$0xff]  }
  0x65   : > { %4397 = vmatpush3.bf16.msra.mxu1 %v4831_v45  ;;  %4376 = vmatprep.subr.bf16.mxu0 %v4832_v47  ;;  %v4886_v45 = vld [vmem:[%s5125_s16 + $0x410] sm:$0xff]  }
  0x66   : > { %4398 = vmatprep.subr.bf16.mxu1 %v4834_v49  ;;  %v4888_v47 = vld [vmem:[%s5125_s16 + $0x490] sm:$0xff]   ;;  %v4890_v49 = vld [vmem:[%s5125_s16 + $0x418] sm:$0xff]  }
  0x68   : > { %4377 = vmatpush3.bf16.msra.mxu0 %v4833_v48  ;;  %v4889_v48 = vld [vmem:[%s5125_s16 + $0x458] sm:$0xff]  }
  0x69   : > { %4399 = vmatpush3.bf16.msra.mxu1 %v4835_v50  ;;  %4378 = vmatprep.subr.bf16.mxu0 %v4836_v52  ;;  %v4891_v50 = vld [vmem:[%s5125_s16 + $0x4d8] sm:$0xff]   ;;  %v4893_v52 = vld [vmem:[%s5125_s16 + $0x460] sm:$0xff]  }
  0x6a   : > { %4400 = vmatprep.subr.bf16.mxu1 %v4838_v54  ;;  %v4895_v54 = vld [vmem:[%s5125_s16 + $0x4e0] sm:$0xff]  }
  0x6c   : > { %4379 = vmatpush3.bf16.msra.mxu0 %v4837_v53  ;;  %v4894_v53 = vld [vmem:[%s5125_s16 + $0x420] sm:$0xff]  }
  0x6d   : > { %4401 = vmatpush3.bf16.msra.mxu1 %v4839_v55  ;;  %4380 = vmatprep.subr.bf16.mxu0 %v4840_v57  ;;  %v4896_v55 = vld [vmem:[%s5125_s16 + $0x4a0] sm:$0xff]   ;;  %v4898_v57 = vld [vmem:[%s5125_s16 + $0x428] sm:$0xff]  }
  0x6e   : > { %4402 = vmatprep.subr.bf16.mxu1 %v4842_v60  ;;  %v4901_v60 = vld [vmem:[%s5125_s16 + $0x470] sm:$0xff]  }
  0x70   : > { %4381 = vmatpush3.bf16.msra.mxu0 %v4841_v58  ;;  %v4899_v58 = vld [vmem:[%s5125_s16 + $0x4e8] sm:$0xff]  }
  0x71   : > { %4403 = vmatpush3.bf16.msra.mxu1 %v4843_v61  ;;  %4410 = vmatprep.subr.bf16.mxu0 %v4844_v63  ;;  %v4902_v61 = vld [vmem:[%s5125_s16 + $0x430] sm:$0xff]  }
  0x72   : > { %4432 = vmatprep.subr.bf16.mxu1 %v4846_v2  ;;  %v4904_v63 = vld [vmem:[%s5125_s16 + $0x4b0] sm:$0xff]   ;;  %v4907_v2 = vld [vmem:[%s5125_s16 + $0x4f8] sm:$0xff]  }
  0x73   : > { %3241 = vmatmul.mubr.bf16.vlgmr.msra.gmra.mrb[8].mxu0 %v873_v59  ;;  %v4900_v59 = vld [vmem:[%s5125_s16 + $0x4a8] sm:$0xff]  }
  0x74   : > { %4411 = vmatpush3.bf16.msra.mxu0 %v4845_v0  ;;  %3281 = vmatmul.mubr.bf16.vlgmr.msra.gmra.mrb[8].mxu1 %v895_v1  ;;  %v4905_v0 = vld [vmem:[%s5125_s16 + $0x478] sm:$0xff]  }
  0x75   : > { %3320 = vmatprep.mubr.bf16.mxu0 %v894_v62  ;;  %4433 = vmatpush3.bf16.msra.mxu1 %v4847_v3  ;;  %v4903_v62 = vld [vmem:[%s5125_s16 + $0x4f0] sm:$0xff]   ;;  %v4906_v1 = vld [vmem:[%s5125_s16 + $0x438] sm:$0xff]  }
  0x76   : > { %4412 = vmatprep.subr.bf16.mxu0 %v4848_v5  ;;  %3360 = vmatprep.mubr.bf16.mxu1 %v898_v4  ;;  %v143_v3 = vld [vmem:[%s5551_s1 + $0x10] sm:$0xff]  ;;  %v4908_v5 = vld [vmem:[%s5125_s16 + $0x4b8] sm:$0xff]  }
  0x77   : > { %4434 = vmatprep.subr.bf16.mxu1 %v4850_v8  ;;  %v906_v4 = vrot.slane %v143_v3, %v5120_v6  ;;  %v4909_v8 = vld [vmem:[%s5125_s16 + $0x540] sm:$0xff]  }
  0x78   : > { %4413 = vmatpush3.bf16.msra.mxu0 %v4849_v7  ;;  %v899_v7 = vcombine.high %v143_v3, %v143_v3  ;;  %v4957_v3 = vld [vmem:[%s5125_s16 + $0x698] sm:$0xff]  }
  0x79   : > { %4435 = vmatpush3.bf16.msra.mxu1 %v4851_v9  ;;  %4414 = vmatprep.subr.bf16.mxu0 %v4852_v10  ;;  %v914_v9 = vcombine.high %v906_v4, %v906_v4  ;;  %v922_v10 = vrot.slane %v906_v4, %v5120_v6  ;;  %v4960_v4 = vld [vmem:[%s5125_s16 + $0x6e0] sm:$0xff]  }
  0x7a   : > { %4436 = vmatprep.subr.bf16.mxu1 %v4854_v12  ;;  %v4911_v12 = vld [vmem:[%s5125_s16 + $0x5c0] sm:$0xff]  }
  0x7c   : > { %4415 = vmatpush3.bf16.msra.mxu0 %v4853_v11  ;;  %v5334_v11 = vrot.slane %v899_v7, %v5120_v6  ;;  %v4962_v7 = vld [vmem:[%s5125_s16 + $0x668] sm:$0xff]  }
  0x7d   : > { %4437 = vmatpush3.bf16.msra.mxu1 %v4855_v13  ;;  %4416 = vmatprep.subr.bf16.mxu0 %v4856_v14  ;;  %v936_v13 = vrot.slane %v914_v9, %v5120_v6  ;;  %v4910_v14 = vld [vmem:[%s5125_s16 + $0x500] sm:$0xff]   ;;  %v4964_v9 = vld [vmem:[%s5125_s16 + $0x6e8] sm:$0xff]  }
  0x7e   : > { %4438 = vmatprep.subr.bf16.mxu1 %v4858_v16  ;;  %v944_v16 = vcombine.high %v922_v10, %v922_v10 }
  0x80   : > { %4417 = vmatpush3.bf16.msra.mxu0 %v4857_v15  ;;  %v915_v15 = vcombine.high %v5334_v11, %v5334_v11 }
  0x81   : > { %4439 = vmatpush3.bf16.msra.mxu1 %v4859_v17  ;;  %4418 = vmatprep.subr.bf16.mxu0 %v4860_v18  ;;  %v4913_v17 = vld [vmem:[%s5125_s16 + $0x548] sm:$0xff]   ;;  %v946_v18 = vcombine.high %v936_v13, %v936_v13 }
  0x82   : > { %4440 = vmatprep.subr.bf16.mxu1 %v4862_v20  ;;  %v943_v20 = vrot.slane %v915_v15, %v5120_v6  ;;  %v4970_v15 = vld [vmem:[%s5125_s16 + $0x678] sm:$0xff]  }
  0x84   : > { %4419 = vmatpush3.bf16.msra.mxu0 %v4861_v19  ;;  %v4912_v19 = vld [vmem:[%s5125_s16 + $0x580] sm:$0xff]  }
  0x85   : > { %4441 = vmatpush3.bf16.msra.mxu1 %v4863_v21  ;;  %4420 = vmatprep.subr.bf16.mxu0 %v4864_v22  ;;  %v4915_v21 = vld [vmem:[%s5125_s16 + $0x5c8] sm:$0xff]  }
  0x86   : > { %4442 = vmatprep.subr.bf16.mxu1 %v4866_v24  ;;  %v4914_v22 = vld [vmem:[%s5125_s16 + $0x508] sm:$0xff]   ;;  %v4917_v24 = vld [vmem:[%s5125_s16 + $0x550] sm:$0xff]  }
  0x88   : > { %4421 = vmatpush3.bf16.msra.mxu0 %v4865_v23  ;;  %v947_v23 = vcombine.high %v943_v20, %v943_v20 }
  0x89   : > { %4443 = vmatpush3.bf16.msra.mxu1 %v4867_v25  ;;  %4422 = vmatprep.subr.bf16.mxu0 %v4868_v26  ;;  %v4916_v25 = vld [vmem:[%s5125_s16 + $0x588] sm:$0xff]   ;;  %v4919_v26 = vld [vmem:[%s5125_s16 + $0x5d0] sm:$0xff]  }
  0x8a   : > { %4444 = vmatprep.subr.bf16.mxu1 %v4870_v28  ;;  %v4921_v28 = vld [vmem:[%s5125_s16 + $0x558] sm:$0xff]  }
  0x8c   : > { %4423 = vmatpush3.bf16.msra.mxu0 %v4869_v27  ;;  %v4918_v27 = vld [vmem:[%s5125_s16 + $0x510] sm:$0xff]  }
  0x8d   : > { %4445 = vmatpush3.bf16.msra.mxu1 %v4871_v29  ;;  %4424 = vmatprep.subr.bf16.mxu0 %v4872_v30  ;;  %v4920_v29 = vld [vmem:[%s5125_s16 + $0x590] sm:$0xff]   ;;  %v4923_v30 = vld [vmem:[%s5125_s16 + $0x5d8] sm:$0xff]  }
  0x8e   : > { %4446 = vmatprep.subr.bf16.mxu1 %v4874_v33  ;;  %v4924_v33 = vld [vmem:[%s5125_s16 + $0x598] sm:$0xff]  }
  0x90   : > { %4425 = vmatpush3.bf16.msra.mxu0 %v4873_v31  ;;  %v4922_v31 = vld [vmem:[%s5125_s16 + $0x518] sm:$0xff]  }
  0x91   : > { %4447 = vmatpush3.bf16.msra.mxu1 %v4876_v34  ;;  %4454 = vmatprep.subr.bf16.mxu0 %v4877_v35  ;;  %v4927_v34 = vld [vmem:[%s5125_s16 + $0x5e0] sm:$0xff]  }
  0x92   : > { %4476 = vmatprep.subr.bf16.mxu1 %v4879_v38  ;;  %v4926_v35 = vld [vmem:[%s5125_s16 + $0x520] sm:$0xff]   ;;  %v4931_v38 = vld [vmem:[%s5125_s16 + $0x5e8] sm:$0xff]  }
  0x93   : > { %3321 = vmatmul.mubr.bf16.vlgmr.msra.gmra.mrb[12].mxu0 %v880_v32  ;;  %v4925_v32 = vld [vmem:[%s5125_s16 + $0x560] sm:$0xff]  }
  0x94   : > { %4455 = vmatpush3.bf16.msra.mxu0 %v4878_v36  ;;  %3361 = vmatmul.mubr.bf16.vlgmr.msra.gmra.mrb[12].mxu1 %v896_v37  ;;  %v4929_v36 = vld [vmem:[%s5125_s16 + $0x568] sm:$0xff]   ;;  %v4928_v37 = vld [vmem:[%s5125_s16 + $0x5a0] sm:$0xff]  }
  0x95   : > { %4477 = vmatpush3.bf16.msra.mxu1 %v4880_v39  ;;  %4456 = vmatprep.subr.bf16.mxu0 %v4881_v40  ;;  %v4930_v39 = vld [vmem:[%s5125_s16 + $0x528] sm:$0xff]   ;;  %v4933_v40 = vld [vmem:[%s5125_s16 + $0x570] sm:$0xff]  }
  0x96   : > { %4478 = vmatprep.subr.bf16.mxu1 %v4883_v42  ;;  %3400 = vmatprep.mubr.bf16.mxu0 %v936_v13  ;;  %v4935_v42 = vld [vmem:[%s5125_s16 + $0x5f0] sm:$0xff]  }
  0x97   : > { %3440 = vmatprep.mubr.bf16.mxu1 %v946_v18  ;;  %v4968_v13 = vld [vmem:[%s5125_s16 + $0x6f0] sm:$0xff]   ;;  %v144_v18 = vld [vmem:[%s5551_s1 + $0x18] sm:$0xff] }
  0x98   : > { %4457 = vmatpush3.bf16.msra.mxu0 %v4882_v41  ;;  %v4932_v41 = vld [vmem:[%s5125_s16 + $0x5a8] sm:$0xff]  }
  0x99   : > { %4479 = vmatpush3.bf16.msra.mxu1 %v4884_v43  ;;  %4458 = vmatprep.subr.bf16.mxu0 %v4885_v44  ;;  %v4934_v43 = vld [vmem:[%s5125_s16 + $0x530] sm:$0xff]   ;;  %v4937_v44 = vld [vmem:[%s5125_s16 + $0x578] sm:$0xff]  }
  0x9a   : > { %4480 = vmatprep.subr.bf16.mxu1 %v4887_v46  ;;  %v4939_v46 = vld [vmem:[%s5125_s16 + $0x5f8] sm:$0xff]  }
  0x9c   : > { %4459 = vmatpush3.bf16.msra.mxu0 %v4886_v45  ;;  %v4936_v45 = vld [vmem:[%s5125_s16 + $0x5b0] sm:$0xff]  }
  0x9d   : > { %4481 = vmatpush3.bf16.msra.mxu1 %v4888_v47  ;;  %4460 = vmatprep.subr.bf16.mxu0 %v4889_v48  ;;  %v4938_v47 = vld [vmem:[%s5125_s16 + $0x538] sm:$0xff]   ;;  %v929_v48 = vrot.slane %v5334_v11, %v5120_v6  ;;  %v4966_v11 = vld [vmem:[%s5125_s16 + $0x670] sm:$0xff]  }
  0x9e   : > { %4482 = vmatprep.subr.bf16.mxu1 %v4891_v50  ;;  %v4941_v50 = vld [vmem:[%s5125_s16 + $0x5b8] sm:$0xff]  }
  0xa0   : > { %4461 = vmatpush3.bf16.msra.mxu0 %v4890_v49  ;;  %v4942_v49 = vld [vmem:[%s5125_s16 + $0x640] sm:$0xff]  }
  0xa1   : > { %4483 = vmatpush3.bf16.msra.mxu1 %v4892_v51  ;;  %4462 = vmatprep.subr.bf16.mxu0 %v4893_v52  ;;  %v4944_v51 = vld [vmem:[%s5125_s16 + $0x6c0] sm:$0xff]  }
  0xa2   : > { %4484 = vmatprep.subr.bf16.mxu1 %v4895_v54  ;;  %v4943_v52 = vld [vmem:[%s5125_s16 + $0x600] sm:$0xff]   ;;  %v4946_v54 = vld [vmem:[%s5125_s16 + $0x648] sm:$0xff]  }
  0xa4   : > { %4463 = vmatpush3.bf16.msra.mxu0 %v4894_v53  ;;  %v945_v53 = vcombine.high %v929_v48, %v929_v48 }
  0xa5   : > { %4485 = vmatpush3.bf16.msra.mxu1 %v4896_v55  ;;  %4464 = vmatprep.subr.bf16.mxu0 %v4897_v56  ;;  %v4945_v55 = vld [vmem:[%s5125_s16 + $0x680] sm:$0xff]   ;;  %v4948_v56 = vld [vmem:[%s5125_s16 + $0x6c8] sm:$0xff]  }
  0xa6   : > { %4486 = vmatprep.subr.bf16.mxu1 %v4899_v58  ;;  %v4950_v58 = vld [vmem:[%s5125_s16 + $0x650] sm:$0xff]  }
  0xa8   : > { %4465 = vmatpush3.bf16.msra.mxu0 %v4898_v57  ;;  %v4947_v57 = vld [vmem:[%s5125_s16 + $0x608] sm:$0xff]  }
  0xa9   : > { %4487 = vmatpush3.bf16.msra.mxu1 %v4900_v59  ;;  %4466 = vmatprep.subr.bf16.mxu0 %v4901_v60  ;;  %v4949_v59 = vld [vmem:[%s5125_s16 + $0x688] sm:$0xff]   ;;  %v4952_v60 = vld [vmem:[%s5125_s16 + $0x6d0] sm:$0xff]  }
  0xaa   : > { %4488 = vmatprep.subr.bf16.mxu1 %v4903_v62  ;;  %v4954_v62 = vld [vmem:[%s5125_s16 + $0x658] sm:$0xff]  }
  0xac   : > { %4467 = vmatpush3.bf16.msra.mxu0 %v4902_v61  ;;  %v4951_v61 = vld [vmem:[%s5125_s16 + $0x610] sm:$0xff]  }
  0xad   : > { %4489 = vmatpush3.bf16.msra.mxu1 %v4904_v63  ;;  %4468 = vmatprep.subr.bf16.mxu0 %v4905_v0  ;;  %v4953_v63 = vld [vmem:[%s5125_s16 + $0x690] sm:$0xff]   ;;  %v4956_v0 = vld [vmem:[%s5125_s16 + $0x6d8] sm:$0xff]  }
  0xae   : > { %4490 = vmatprep.subr.bf16.mxu1 %v4907_v2  ;;  %v4958_v2 = vld [vmem:[%s5125_s16 + $0x660] sm:$0xff]  }
  0xb0   : > { %4469 = vmatpush3.bf16.msra.mxu0 %v4906_v1  ;;  %v4955_v1 = vld [vmem:[%s5125_s16 + $0x618] sm:$0xff]  }
  0xb1   : > { %4491 = vmatpush3.bf16.msra.mxu1 %v4908_v5  ;;  %4498 = vmatprep.subr.bf16.mxu0 %v4909_v8  ;;  %v4959_v5 = vld [vmem:[%s5125_s16 + $0x620] sm:$0xff]  }
  0xb2   : > { %4520 = vmatprep.subr.bf16.mxu1 %v4911_v12  ;;  %v4961_v8 = vld [vmem:[%s5125_s16 + $0x6a0] sm:$0xff]   ;;  %v4965_v12 = vld [vmem:[%s5125_s16 + $0x6a8] sm:$0xff]  }
  0xb3   : > { %3401 = vmatmul.mubr.bf16.vlgmr.msra.gmra.mrb[16].mxu0 %v922_v10  ;;  %v4963_v10 = vld [vmem:[%s5125_s16 + $0x628] sm:$0xff]  }
  0xb4   : > { %4499 = vmatpush3.bf16.msra.mxu0 %v4910_v14  ;;  %3441 = vmatmul.mubr.bf16.vlgmr.msra.gmra.mrb[16].mxu1 %v944_v16  ;;  %v4967_v14 = vld [vmem:[%s5125_s16 + $0x630] sm:$0xff]  }
  0xb5   : > { %4500 = vmatprep.subr.bf16.mxu0 %v4913_v17  ;;  %4521 = vmatpush3.bf16.msra.mxu1 %v4912_v19  ;;  %v4969_v16 = vld [vmem:[%s5125_s16 + $0x6b0] sm:$0xff]   ;;  %v4972_v17 = vld [vmem:[%s5125_s16 + $0x6f8] sm:$0xff]  }
  0xb6   : > { %3480 = vmatprep.mubr.bf16.mxu0 %v943_v20  ;;  %4522 = vmatprep.subr.bf16.mxu1 %v4915_v21  ;;  %v4971_v19 = vld [vmem:[%s5125_s16 + $0x638] sm:$0xff]   ;;  %v955_v20 = vrot.slane %v144_v18, %v5120_v6  ;;  %v948_v21 = vcombine.high %v144_v18, %v144_v18  ;;  %v5011_v18 = vld [vmem:[%s5125_s16 + $0x848] sm:$0xff]  }
  0xb7   : > { %3520 = vmatprep.mubr.bf16.mxu1 %v947_v23 }
  0xb8   : > { %4501 = vmatpush3.bf16.msra.mxu0 %v4914_v22  ;;  %v4974_v22 = vld [vmem:[%s5125_s16 + $0x740] sm:$0xff]   ;;  %v963_v23 = vcombine.high %v955_v20, %v955_v20 }
  0xb9   : > { %4502 = vmatprep.subr.bf16.mxu0 %v4917_v24  ;;  %4523 = vmatpush3.bf16.msra.mxu1 %v4916_v25  ;;  %v4973_v24 = vld [vmem:[%s5125_s16 + $0x6b8] sm:$0xff]   ;;  %v971_v25 = vrot.slane %v955_v20, %v5120_v6  ;;  %v5013_v20 = vld [vmem:[%s5125_s16 + $0x8c8] sm:$0xff]  }
  0xba   : > { %4524 = vmatprep.subr.bf16.mxu1 %v4919_v26  ;;  %v5412_v26 = vrot.slane %v948_v21, %v5120_v6  ;;  %v5014_v21 = vld [vmem:[%s5125_s16 + $0x888] sm:$0xff]  }
  0xbc   : > { %4503 = vmatpush3.bf16.msra.mxu0 %v4918_v27  ;;  %v4976_v27 = vld [vmem:[%s5125_s16 + $0x7c0] sm:$0xff]  }
  0xbd   : > { %4504 = vmatprep.subr.bf16.mxu0 %v4921_v28  ;;  %4525 = vmatpush3.bf16.msra.mxu1 %v4920_v29  ;;  %v985_v28 = vrot.slane %v963_v23, %v5120_v6  ;;  %v4975_v29 = vld [vmem:[%s5125_s16 + $0x700] sm:$0xff]   ;;  %v5016_v23 = vld [vmem:[%s5125_s16 + $0x810] sm:$0xff]  }
  0xbe   : > { %4526 = vmatprep.subr.bf16.mxu1 %v4923_v30  ;;  %v964_v30 = vcombine.high %v5412_v26, %v5412_v26 }
  0xc0   : > { %4505 = vmatpush3.bf16.msra.mxu0 %v4922_v31  ;;  %v993_v31 = vcombine.high %v971_v25, %v971_v25 }
  0xc1   : > { %4506 = vmatprep.subr.bf16.mxu0 %v4925_v32  ;;  %4527 = vmatpush3.bf16.msra.mxu1 %v4924_v33  ;;  %v4978_v32 = vld [vmem:[%s5125_s16 + $0x748] sm:$0xff]   ;;  %v995_v33 = vcombine.high %v985_v28, %v985_v28 }
  0xc2   : > { %4528 = vmatprep.subr.bf16.mxu1 %v4927_v34  ;;  %v4977_v34 = vld [vmem:[%s5125_s16 + $0x780] sm:$0xff]  }
  0xc4   : > { %4507 = vmatpush3.bf16.msra.mxu0 %v4926_v35  ;;  %v992_v35 = vrot.slane %v964_v30, %v5120_v6  ;;  %v5023_v30 = vld [vmem:[%s5125_s16 + $0x860] sm:$0xff]  }
  0xc5   : > { %4508 = vmatprep.subr.bf16.mxu0 %v4929_v36  ;;  %4529 = vmatpush3.bf16.msra.mxu1 %v4928_v37  ;;  %v4980_v36 = vld [vmem:[%s5125_s16 + $0x7c8] sm:$0xff]  }
  0xc6   : > { %4530 = vmatprep.subr.bf16.mxu1 %v4931_v38  ;;  %v4979_v37 = vld [vmem:[%s5125_s16 + $0x708] sm:$0xff]   ;;  %v996_v38 = vcombine.high %v992_v35, %v992_v35 }
  0xc8   : > { %4509 = vmatpush3.bf16.msra.mxu0 %v4930_v39  ;;  %v4982_v39 = vld [vmem:[%s5125_s16 + $0x750] sm:$0xff]  }
  0xc9   : > { %4510 = vmatprep.subr.bf16.mxu0 %v4933_v40  ;;  %4531 = vmatpush3.bf16.msra.mxu1 %v4932_v41  ;;  %v4981_v40 = vld [vmem:[%s5125_s16 + $0x788] sm:$0xff]   ;;  %v4984_v41 = vld [vmem:[%s5125_s16 + $0x7d0] sm:$0xff]  }
  0xca   : > { %4532 = vmatprep.subr.bf16.mxu1 %v4935_v42  ;;  %v4983_v42 = vld [vmem:[%s5125_s16 + $0x710] sm:$0xff]  }
  0xcc   : > { %4511 = vmatpush3.bf16.msra.mxu0 %v4934_v43  ;;  %v4986_v43 = vld [vmem:[%s5125_s16 + $0x758] sm:$0xff]  }
  0xcd   : > { %4512 = vmatprep.subr.bf16.mxu0 %v4937_v44  ;;  %4533 = vmatpush3.bf16.msra.mxu1 %v4936_v45  ;;  %v4985_v44 = vld [vmem:[%s5125_s16 + $0x790] sm:$0xff]   ;;  %v4988_v45 = vld [vmem:[%s5125_s16 + $0x7d8] sm:$0xff]  }
  0xce   : > { %4534 = vmatprep.subr.bf16.mxu1 %v4939_v46  ;;  %v4987_v46 = vld [vmem:[%s5125_s16 + $0x718] sm:$0xff]  }
  0xd0   : > { %4513 = vmatpush3.bf16.msra.mxu0 %v4938_v47  ;;  %v4990_v47 = vld [vmem:[%s5125_s16 + $0x760] sm:$0xff]  }
  0xd1   : > { %4542 = vmatprep.subr.bf16.mxu0 %v4942_v49  ;;  %4535 = vmatpush3.bf16.msra.mxu1 %v4941_v50  ;;  %v4992_v49 = vld [vmem:[%s5125_s16 + $0x7e0] sm:$0xff]  }
  0xd2   : > { %4564 = vmatprep.subr.bf16.mxu1 %v4944_v51  ;;  %v4991_v50 = vld [vmem:[%s5125_s16 + $0x720] sm:$0xff]   ;;  %v4994_v51 = vld [vmem:[%s5125_s16 + $0x768] sm:$0xff]  }
  0xd3   : > { %3481 = vmatmul.mubr.bf16.vlgmr.msra.gmra.mrb[20].mxu0 %v929_v48  ;;  %v4989_v48 = vld [vmem:[%s5125_s16 + $0x798] sm:$0xff]  }
  0xd4   : > { %4543 = vmatpush3.bf16.msra.mxu0 %v4943_v52  ;;  %3521 = vmatmul.mubr.bf16.vlgmr.msra.gmra.mrb[20].mxu1 %v945_v53  ;;  %v4993_v53 = vld [vmem:[%s5125_s16 + $0x7a0] sm:$0xff]  }
  0xd5   : > { %4544 = vmatprep.subr.bf16.mxu0 %v4946_v54  ;;  %4565 = vmatpush3.bf16.msra.mxu1 %v4945_v55 }
  0xd6   : > { %4566 = vmatprep.subr.bf16.mxu1 %v4948_v56  ;;  %3560 = vmatprep.mubr.bf16.mxu0 %v985_v28  ;;  %v4995_v56 = vld [vmem:[%s5125_s16 + $0x728] sm:$0xff]   ;;  %v5021_v28 = vld [vmem:[%s5125_s16 + $0x8d8] sm:$0xff]  }
  0xd7   : > { %3600 = vmatprep.mubr.bf16.mxu1 %v995_v33  ;;  %v5026_v33 = vld [vmem:[%s5125_s16 + $0x8a0] sm:$0xff]  }
  0xd8   : > { %4545 = vmatpush3.bf16.msra.mxu0 %v4947_v57  ;;  %v4996_v57 = vld [vmem:[%s5125_s16 + $0x7e8] sm:$0xff]  }
  0xd9   : > { %4546 = vmatprep.subr.bf16.mxu0 %v4950_v58  ;;  %4567 = vmatpush3.bf16.msra.mxu1 %v4949_v59 }
  0xda   : > { %4568 = vmatprep.subr.bf16.mxu1 %v4952_v60 }
  0xdc   : > { %4547 = vmatpush3.bf16.msra.mxu0 %v4951_v61  ;;  %v4997_v61 = vld [vmem:[%s5125_s16 + $0x7a8] sm:$0xff]  }
  0xdd   : > { %4548 = vmatprep.subr.bf16.mxu0 %v4954_v62  ;;  %4569 = vmatpush3.bf16.msra.mxu1 %v4953_v63 }
  0xde   : > { %4570 = vmatprep.subr.bf16.mxu1 %v4956_v0  ;;  %v4998_v0 = vld [vmem:[%s5125_s16 + $0x770] sm:$0xff]  }
  0xe0   : > { %4549 = vmatpush3.bf16.msra.mxu0 %v4955_v1  ;;  %v4999_v1 = vld [vmem:[%s5125_s16 + $0x730] sm:$0xff]  }
  0xe1   : > { %4550 = vmatprep.subr.bf16.mxu0 %v4958_v2  ;;  %4571 = vmatpush3.bf16.msra.mxu1 %v4957_v3 }
  0xe2   : > { %4572 = vmatprep.subr.bf16.mxu1 %v4960_v4  ;;  %v5000_v4 = vld [vmem:[%s5125_s16 + $0x7f0] sm:$0xff]  }
  0xe4   : > { %4551 = vmatpush3.bf16.msra.mxu0 %v4959_v5 }
  0xe5   : > { %4552 = vmatprep.subr.bf16.mxu0 %v4962_v7  ;;  %4573 = vmatpush3.bf16.msra.mxu1 %v4961_v8  ;;  %v5001_v7 = vld [vmem:[%s5125_s16 + $0x7b0] sm:$0xff]   ;;  %v5002_v8 = vld [vmem:[%s5125_s16 + $0x778] sm:$0xff]  }
  0xe6   : > { %4574 = vmatprep.subr.bf16.mxu1 %v4964_v9  ;;  %v5003_v9 = vld [vmem:[%s5125_s16 + $0x738] sm:$0xff]  }
  0xe8   : > { %4553 = vmatpush3.bf16.msra.mxu0 %v4963_v10  ;;  %v5004_v10 = vld [vmem:[%s5125_s16 + $0x7f8] sm:$0xff]  }
  0xe9   : > { %4554 = vmatprep.subr.bf16.mxu0 %v4966_v11  ;;  %4575 = vmatpush3.bf16.msra.mxu1 %v4965_v12  ;;  %v5006_v11 = vld [vmem:[%s5125_s16 + $0x7b8] sm:$0xff]   ;;  %v978_v12 = vrot.slane %v5412_v26, %v5120_v6 }
  0xea   : > { %4576 = vmatprep.subr.bf16.mxu1 %v4968_v13  ;;  %v5007_v13 = vld [vmem:[%s5125_s16 + $0x840] sm:$0xff]   ;;  %v5019_v26 = vld [vmem:[%s5125_s16 + $0x858] sm:$0xff]  }
  0xec   : > { %4555 = vmatpush3.bf16.msra.mxu0 %v4967_v14  ;;  %v5008_v14 = vld [vmem:[%s5125_s16 + $0x800] sm:$0xff]  }
  0xed   : > { %4556 = vmatprep.subr.bf16.mxu0 %v4970_v15  ;;  %4577 = vmatpush3.bf16.msra.mxu1 %v4969_v16  ;;  %v5009_v15 = vld [vmem:[%s5125_s16 + $0x8c0] sm:$0xff]  }
  0xee   : > { %4578 = vmatprep.subr.bf16.mxu1 %v4972_v17  ;;  %v5010_v16 = vld [vmem:[%s5125_s16 + $0x880] sm:$0xff]   ;;  %v994_v17 = vcombine.high %v978_v12, %v978_v12 }
  0xf0   : > { %4557 = vmatpush3.bf16.msra.mxu0 %v4971_v19  ;;  %v5012_v19 = vld [vmem:[%s5125_s16 + $0x808] sm:$0xff]  }
  0xf1   : > { %4586 = vmatprep.subr.bf16.mxu0 %v4974_v22  ;;  %4579 = vmatpush3.bf16.msra.mxu1 %v4973_v24  ;;  %v5015_v22 = vld [vmem:[%s5125_s16 + $0x850] sm:$0xff]  }
  0xf2   : > { %4608 = vmatprep.subr.bf16.mxu1 %v4976_v27  ;;  %v5017_v24 = vld [vmem:[%s5125_s16 + $0x8d0] sm:$0xff]   ;;  %v5020_v27 = vld [vmem:[%s5125_s16 + $0x818] sm:$0xff]  }
  0xf3   : > { %3561 = vmatmul.mubr.bf16.vlgmr.msra.gmra.mrb[24].mxu0 %v971_v25  ;;  %v5018_v25 = vld [vmem:[%s5125_s16 + $0x890] sm:$0xff]  }
  0xf4   : > { %4587 = vmatpush3.bf16.msra.mxu0 %v4975_v29  ;;  %3601 = vmatmul.mubr.bf16.vlgmr.msra.gmra.mrb[24].mxu1 %v993_v31  ;;  %v5022_v29 = vld [vmem:[%s5125_s16 + $0x898] sm:$0xff]   ;;  %v5024_v31 = vld [vmem:[%s5125_s16 + $0x820] sm:$0xff]  }
  0xf5   : > { %4588 = vmatprep.subr.bf16.mxu0 %v4978_v32  ;;  %4609 = vmatpush3.bf16.msra.mxu1 %v4977_v34  ;;  %v5025_v32 = vld [vmem:[%s5125_s16 + $0x8e0] sm:$0xff]   ;;  %v5027_v34 = vld [vmem:[%s5125_s16 + $0x868] sm:$0xff]  }
  0xf6   : > { %3640 = vmatprep.mubr.bf16.mxu0 %v992_v35  ;;  %4610 = vmatprep.subr.bf16.mxu1 %v4980_v36  ;;  %v5028_v36 = vld [vmem:[%s5125_s16 + $0x828] sm:$0xff]  }
  0xf7   : > { %3680 = vmatprep.mubr.bf16.mxu1 %v996_v38  ;;  %v5029_v38 = vld [vmem:[%s5125_s16 + $0x8e8] sm:$0xff]  }
  0xf8   : > { %4589 = vmatpush3.bf16.msra.mxu0 %v4979_v37 }
  0xf9   : > { %4590 = vmatprep.subr.bf16.mxu0 %v4982_v39  ;;  %4611 = vmatpush3.bf16.msra.mxu1 %v4981_v40 }
  0xfa   : > { %4612 = vmatprep.subr.bf16.mxu1 %v4984_v41 }
  0xfc   : > { %4591 = vmatpush3.bf16.msra.mxu0 %v4983_v42 }
  0xfd   : > { %4592 = vmatprep.subr.bf16.mxu0 %v4986_v43  ;;  %4613 = vmatpush3.bf16.msra.mxu1 %v4985_v44  ;;  %v5030_v44 = vld [vmem:[%s5125_s16 + $0x8a8] sm:$0xff]  }
  0xfe   : > { %4614 = vmatprep.subr.bf16.mxu1 %v4988_v45  ;;  %v5031_v45 = vld [vmem:[%s5125_s16 + $0x870] sm:$0xff]  }
 0x100   : > { %4593 = vmatpush3.bf16.msra.mxu0 %v4987_v46 }
 0x101   : > { %4594 = vmatprep.subr.bf16.mxu0 %v4990_v47  ;;  %4615 = vmatpush3.bf16.msra.mxu1 %v4989_v48  ;;  %v5032_v48 = vld [vmem:[%s5125_s16 + $0x830] sm:$0xff]  }
 0x102   : > { %4616 = vmatprep.subr.bf16.mxu1 %v4992_v49 }
 0x104   : > { %4595 = vmatpush3.bf16.msra.mxu0 %v4991_v50 }
 0x105   : > { %4596 = vmatprep.subr.bf16.mxu0 %v4994_v51  ;;  %4617 = vmatpush3.bf16.msra.mxu1 %v4993_v53  ;;  %v5033_v51 = vld [vmem:[%s5125_s16 + $0x8f0] sm:$0xff]  }
 0x106   : > { %v4294_v52 = vpop.f32.mrb[0].mxu0  ;;  %4618 = vmatprep.subr.bf16.mxu1 %v4996_v57  ;;  %v5034_v53 = vld [vmem:[%s5125_s16 + $0x8b0] sm:$0xff]   ;;  %v145_v57 = vld [vmem:[%s5551_s1 + $0x20] sm:$0xff] }
 0x107   : > { %v4316_v54 = vpop.f32.mrb[0].mxu1  ;;  %v4295_v55 = vpop.f32.mrb[1].mxu0 }
 0x108   : > { %v4296_v58 = vadd.f32 %v4295_v55, %v4294_v52  ;;  %v4317_v59 = vpop.f32.mrb[1].mxu1  ;;  %v4297_v60 = vpop.f32.mrb[2].mxu0  ;;  %4597 = vmatpush3.bf16.msra.mxu0 %v4995_v56  ;;  %v5036_v55 = vld [vmem:[%s5125_s16 + $0x838] sm:$0xff]  }
 0x109   : > { %v4318_v62 = vadd.f32 %v4317_v59, %v4316_v54  ;;  %v4298_v63 = vpop.f32.mrb[3].mxu0  ;;  %v4319_v2 = vpop.f32.mrb[2].mxu1  ;;  %4598 = vmatprep.subr.bf16.mxu0 %v4998_v0  ;;  %4619 = vmatpush3.bf16.msra.mxu1 %v4997_v61  ;;  %v5035_v54 = vld [vmem:[%s5125_s16 + $0x878] sm:$0xff]   ;;  %v997_v60 = vcombine.high %v145_v57, %v145_v57  ;;  %v5039_v61 = vld [vmem:[%s5125_s16 + $0x940] sm:$0xff]  }
 0x10a   : > { %v4320_v5 = vpop.f32.mrb[3].mxu1  ;;  %4620 = vmatprep.subr.bf16.mxu1 %v5000_v4  ;;  %v5037_v56 = vld [vmem:[%s5125_s16 + $0x8f8] sm:$0xff]  }
 0x10b   : > { %v5443_v3 = vadd.f32 %v4318_v62, %v4296_v58  ;;  %v1004_v58 = vrot.slane %v145_v57, %v5120_v6  ;;  %v5038_v59 = vld [vmem:[%s5125_s16 + $0x8b8] sm:$0xff]   ;;  %v5495_v0 = vrot.slane %v997_v60, %v5120_v6 }
 0x10c   : > { %4599 = vmatpush3.bf16.msra.mxu0 %v4999_v1  ;;  %v5041_v1 = vld [vmem:[%s5125_s16 + $0x9c0] sm:$0xff]   ;;  %v5075_v57 = vld [vmem:[%s5125_s16 + $0xa18] sm:$0xff]  }
 0x10d   : > { %4600 = vmatprep.subr.bf16.mxu0 %v5002_v8  ;;  %4621 = vmatpush3.bf16.msra.mxu1 %v5001_v7  ;;  %v1012_v62 = vcombine.high %v1004_v58, %v1004_v58  ;;  %v1020_v63 = vrot.slane %v1004_v58, %v5120_v6  ;;  %v1013_v4 = vcombine.high %v5495_v0, %v5495_v0  ;;  %v5043_v7 = vld [vmem:[%s5125_s16 + $0x948] sm:$0xff]  }
 0x10e   : > { %4622 = vmatprep.subr.bf16.mxu1 %v5004_v10  ;;  %v3949_v58 = vld.sshfl [vmem:[%s5551_s1 + $0x28] sm:$0x1 pattern:$0x75316420] }
 0x10f   : > { %v1034_v2 = vrot.slane %v1012_v62, %v5120_v6  ;;  %v1042_v5 = vcombine.high %v1020_v63, %v1020_v63  ;;  %v1041_v10 = vrot.slane %v1013_v4, %v5120_v6 }
 0x110   : > { %4601 = vmatpush3.bf16.msra.mxu0 %v5003_v9  ;;  %v5042_v9 = vld [vmem:[%s5125_s16 + $0x980] sm:$0xff]  }
 0x111   : > { %4630 = vmatprep.subr.bf16.mxu0 %v5007_v13  ;;  %4623 = vmatpush3.bf16.msra.mxu1 %v5006_v11  ;;  %v1044_v8 = vcombine.high %v1034_v2, %v1034_v2  ;;  %v5045_v11 = vld [vmem:[%s5125_s16 + $0x9c8] sm:$0xff]   ;;  %v1045_v13 = vcombine.high %v1041_v10, %v1041_v10 }
 0x112   : > { %4652 = vmatprep.subr.bf16.mxu1 %v5009_v15  ;;  %v5046_v15 = vld [vmem:[%s5125_s16 + $0x988] sm:$0xff]  }
 0x113   : > { %3641 = vmatmul.mubr.bf16.vlgmr.msra.gmra.mrb[28].mxu0 %v978_v12  ;;  %v5044_v12 = vld [vmem:[%s5125_s16 + $0x908] sm:$0xff]  }
 0x114   : > { %4631 = vmatpush3.bf16.msra.mxu0 %v5008_v14  ;;  %3681 = vmatmul.mubr.bf16.vlgmr.msra.gmra.mrb[28].mxu1 %v994_v17  ;;  %v5047_v14 = vld [vmem:[%s5125_s16 + $0x950] sm:$0xff]  }
 0x115   : > { %4632 = vmatprep.subr.bf16.mxu0 %v5011_v18  ;;  %4653 = vmatpush3.bf16.msra.mxu1 %v5010_v16  ;;  %v5049_v16 = vld [vmem:[%s5125_s16 + $0x9d0] sm:$0xff]   ;;  %v5051_v18 = vld [vmem:[%s5125_s16 + $0x958] sm:$0xff]  }
 0x116   : > { %4654 = vmatprep.subr.bf16.mxu1 %v5013_v20  ;;  %3720 = vmatprep.mubr.bf16.mxu0 %v1034_v2  ;;  %v5048_v17 = vld [vmem:[%s5125_s16 + $0x910] sm:$0xff]   ;;  %v5053_v20 = vld [vmem:[%s5125_s16 + $0x9d8] sm:$0xff]  }
 0x117   : > { %3760 = vmatprep.mubr.bf16.mxu1 %v1044_v8 }
 0x118   : > { %4633 = vmatpush3.bf16.msra.mxu0 %v5012_v19  ;;  %v5050_v19 = vld [vmem:[%s5125_s16 + $0x990] sm:$0xff]  }
 0x119   : > { %4634 = vmatprep.subr.bf16.mxu0 %v5015_v22  ;;  %4655 = vmatpush3.bf16.msra.mxu1 %v5014_v21  ;;  %v5052_v21 = vld [vmem:[%s5125_s16 + $0x918] sm:$0xff]   ;;  %v5055_v22 = vld [vmem:[%s5125_s16 + $0x960] sm:$0xff]  }
 0x11a   : > { %4656 = vmatprep.subr.bf16.mxu1 %v5017_v24  ;;  %v5057_v24 = vld [vmem:[%s5125_s16 + $0x9e0] sm:$0xff]  }
 0x11c   : > { %4635 = vmatpush3.bf16.msra.mxu0 %v5016_v23  ;;  %v5054_v23 = vld [vmem:[%s5125_s16 + $0x998] sm:$0xff]  }
 0x11d   : > { %4636 = vmatprep.subr.bf16.mxu0 %v5019_v26  ;;  %4657 = vmatpush3.bf16.msra.mxu1 %v5018_v25  ;;  %v5056_v25 = vld [vmem:[%s5125_s16 + $0x920] sm:$0xff]  }
 0x11e   : > { %4658 = vmatprep.subr.bf16.mxu1 %v5021_v28  ;;  %v5058_v28 = vld [vmem:[%s5125_s16 + $0x9a0] sm:$0xff]  }
 0x120   : > { %4637 = vmatpush3.bf16.msra.mxu0 %v5020_v27  ;;  %v5059_v27 = vld [vmem:[%s5125_s16 + $0x968] sm:$0xff]  }
 0x121   : > { %4638 = vmatprep.subr.bf16.mxu0 %v5023_v30  ;;  %4659 = vmatpush3.bf16.msra.mxu1 %v5022_v29 }
 0x122   : > { %4660 = vmatprep.subr.bf16.mxu1 %v5025_v32 }
 0x124   : > { %4639 = vmatpush3.bf16.msra.mxu0 %v5024_v31 }
 0x125   : > { %4640 = vmatprep.subr.bf16.mxu0 %v5027_v34  ;;  %4661 = vmatpush3.bf16.msra.mxu1 %v5026_v33  ;;  %v5060_v33 = vld [vmem:[%s5125_s16 + $0x928] sm:$0xff]  }
 0x126   : > { %v4338_v35 = vpop.f32.mrb[4].mxu0  ;;  %4662 = vmatprep.subr.bf16.mxu1 %v5029_v38  ;;  %v5061_v34 = vld [vmem:[%s5125_s16 + $0x9e8] sm:$0xff]  }
 0x127   : > { %v4339_v37 = vpop.f32.mrb[5].mxu0  ;;  %v4360_v41 = vpop.f32.mrb[4].mxu1 }
 0x128   : > { %v4340_v39 = vadd.f32 %v4339_v37, %v4338_v35  ;;  %v4341_v40 = vpop.f32.mrb[6].mxu0  ;;  %v4361_v43 = vpop.f32.mrb[5].mxu1  ;;  %4641 = vmatpush3.bf16.msra.mxu0 %v5028_v36 }
 0x129   : > { %v4342_v42 = vpop.f32.mrb[7].mxu0  ;;  %v4362_v47 = vadd.f32 %v4361_v43, %v4360_v41  ;;  %v4363_v49 = vpop.f32.mrb[6].mxu1  ;;  %4642 = vmatprep.subr.bf16.mxu0 %v5031_v45  ;;  %4663 = vmatpush3.bf16.msra.mxu1 %v5030_v44  ;;  %v5062_v41 = vld [vmem:[%s5125_s16 + $0x9a8] sm:$0xff]   ;;  %v5065_v44 = vld [vmem:[%s5125_s16 + $0x9f0] sm:$0xff]  }
 0x12a   : > { %v3163_v46 = vadd.f32 %v4340_v39, %v5443_v3  ;;  %v4364_v52 = vpop.f32.mrb[7].mxu1  ;;  %4664 = vmatprep.subr.bf16.mxu1 %v5033_v51  ;;  %v5040_v3 = vld [vmem:[%s5125_s16 + $0x900] sm:$0xff]   ;;  %v5063_v39 = vld [vmem:[%s5125_s16 + $0x970] sm:$0xff]   ;;  %v5068_v49 = vld [vmem:[%s5125_s16 + $0x938] sm:$0xff]  }
 0x12b   : > { %v5064_v45 = vld [vmem:[%s5125_s16 + $0x930] sm:$0xff]   ;;  %v5071_v51 = vld [vmem:[%s5125_s16 + $0x9b8] sm:$0xff]   ;;  %v5072_v52 = vld [vmem:[%s5125_s16 + $0xa00] sm:$0xff]  }
 0x12c   : > { %v5480_v50 = vadd.f32 %v4362_v47, %v3163_v46  ;;  %4643 = vmatpush3.bf16.msra.mxu0 %v5032_v48  ;;  %v5067_v46 = vld [vmem:[%s5125_s16 + $0x978] sm:$0xff]   ;;  %v5066_v47 = vld [vmem:[%s5125_s16 + $0x9b0] sm:$0xff]  }
 0x12d   : > { %4644 = vmatprep.subr.bf16.mxu0 %v5035_v54  ;;  %4665 = vmatpush3.bf16.msra.mxu1 %v5034_v53  ;;  %v5069_v48 = vld [vmem:[%s5125_s16 + $0x9f8] sm:$0xff]   ;;  %v5089_v53 = vmov 0.0  }
 0x12e   : > { %4666 = vmatprep.subr.bf16.mxu1 %v5037_v56  ;;  %v5074_v56 = vld [vmem:[%s5125_s16 + $0xa10] sm:$0xff]  }
 0x130   : > { %4645 = vmatpush3.bf16.msra.mxu0 %v5036_v55  ;;  %v5073_v55 = vld [vmem:[%s5125_s16 + $0xa08] sm:$0xff]  }
 0x131   : > { %4674 = vmatprep.subr.bf16.mxu0 %v5039_v61  ;;  %4667 = vmatpush3.bf16.msra.mxu1 %v5038_v59  ;;  %v1059_v59 = vrot.slane %v3949_v58, %v5120_v6 }
 0x132   : > { %4696 = vmatprep.subr.bf16.mxu1 %v5041_v1 }
 0x133   : > { %3721 = vmatmul.mubr.bf16.vlgmr.msra.gmra.mrb[32].mxu0 %v1020_v63 }
 0x134   : > { %4675 = vmatpush3.bf16.msra.mxu0 %v5040_v3  ;;  %3761 = vmatmul.mubr.bf16.vlgmr.msra.gmra.mrb[32].mxu1 %v1042_v5 }
 0x135   : > { %4676 = vmatprep.subr.bf16.mxu0 %v5043_v7  ;;  %4697 = vmatpush3.bf16.msra.mxu1 %v5042_v9 }
 0x136   : > { %3800 = vmatprep.mubr.bf16.mxu0 %v1041_v10  ;;  %4698 = vmatprep.subr.bf16.mxu1 %v5045_v11 }
 0x137   : > { %3840 = vmatprep.mubr.bf16.mxu1 %v1045_v13 }
 0x138   : > { %4677 = vmatpush3.bf16.msra.mxu0 %v5044_v12 }
 0x139   : > { %4678 = vmatprep.subr.bf16.mxu0 %v5047_v14  ;;  %4699 = vmatpush3.bf16.msra.mxu1 %v5046_v15 }
 0x13a   : > { %4700 = vmatprep.subr.bf16.mxu1 %v5049_v16 }
 0x13c   : > { %4679 = vmatpush3.bf16.msra.mxu0 %v5048_v17 }
 0x13d   : > { %4680 = vmatprep.subr.bf16.mxu0 %v5051_v18  ;;  %4701 = vmatpush3.bf16.msra.mxu1 %v5050_v19 }
 0x13e   : > { %4702 = vmatprep.subr.bf16.mxu1 %v5053_v20 }
 0x140   : > { %4681 = vmatpush3.bf16.msra.mxu0 %v5052_v21 }
 0x141   : > { %4682 = vmatprep.subr.bf16.mxu0 %v5055_v22  ;;  %4703 = vmatpush3.bf16.msra.mxu1 %v5054_v23 }
 0x142   : > { %4704 = vmatprep.subr.bf16.mxu1 %v5057_v24 }
 0x144   : > { %4683 = vmatpush3.bf16.msra.mxu0 %v5056_v25 }
 0x145   : > { %4684 = vmatprep.subr.bf16.mxu0 %v5059_v27  ;;  %4705 = vmatpush3.bf16.msra.mxu1 %v5058_v28 }
 0x146   : > { %v4382_v26 = vpop.f32.mrb[8].mxu0  ;;  %4706 = vmatprep.subr.bf16.mxu1 %v5061_v34 }
 0x147   : > { %v4383_v29 = vpop.f32.mrb[9].mxu0  ;;  %v4404_v32 = vpop.f32.mrb[8].mxu1 }
 0x148   : > { %v4384_v30 = vadd.f32 %v4383_v29, %v4382_v26  ;;  %v4385_v31 = vpop.f32.mrb[10].mxu0  ;;  %v4405_v36 = vpop.f32.mrb[9].mxu1  ;;  %4685 = vmatpush3.bf16.msra.mxu0 %v5060_v33 }
 0x149   : > { %v4386_v35 = vpop.f32.mrb[11].mxu0  ;;  %v4406_v38 = vadd.f32 %v4405_v36, %v4404_v32  ;;  %v4407_v40 = vpop.f32.mrb[10].mxu1  ;;  %4686 = vmatprep.subr.bf16.mxu0 %v5063_v39  ;;  %4707 = vmatpush3.bf16.msra.mxu1 %v5062_v41 }
 0x14a   : > { %v3243_v37 = vadd.f32 %v4384_v30, %v5480_v50  ;;  %v4408_v42 = vpop.f32.mrb[11].mxu1  ;;  %4708 = vmatprep.subr.bf16.mxu1 %v5065_v44  ;;  %v1027_v50 = vrot.slane %v5495_v0, %v5120_v6 }
 0x14c   : > { %v3283_v43 = vadd.f32 %v4406_v38, %v3243_v37  ;;  %4687 = vmatpush3.bf16.msra.mxu0 %v5064_v45  ;;  %v1043_v54 = vcombine.high %v1027_v50, %v1027_v50 }
 0x14d   : > { %4688 = vmatprep.subr.bf16.mxu0 %v5067_v46  ;;  %4709 = vmatpush3.bf16.msra.mxu1 %v5066_v47 }
 0x14e   : > { %4710 = vmatprep.subr.bf16.mxu1 %v5069_v48 }
 0x150   : > { %4689 = vmatpush3.bf16.msra.mxu0 %v5068_v49 }
 0x151   : > { %4723 = vmatprep.subr.bf16.mxu0 %v5089_v53  ;;  %4711 = vmatpush3.bf16.msra.mxu1 %v5071_v51 }
 0x153   : > { %3801 = vmatmul.mubr.bf16.vlgmr.msra.gmra.mrb[36].mxu0 %v1027_v50 }
 0x154   : > { %4724 = vmatpush3.bf16.msra.mxu0 %v5072_v52  ;;  %4731 = vmatprep.mubr.msk.bf16.mxu0 %vm5090_vm0, %v5089_v53 }
 0x155   : > { %3841 = vmatmul.mubr.bf16.vlgmr.msra.gmra.mrb[36].mxu1 %v1043_v54  ;;  %4725 = vmatprep.subr.bf16.mxu0 %v5089_v53 }
 0x158   : > { %4726 = vmatpush3.bf16.msra.mxu0 %v5073_v55 }
 0x159   : > { %4727 = vmatprep.subr.bf16.mxu0 %v5089_v53 }
 0x15c   : > { %4728 = vmatpush3.bf16.msra.mxu0 %v5074_v56 }
 0x15d   : > { %4729 = vmatprep.subr.bf16.mxu0 %v5089_v53 }
 0x160   : > { %4730 = vmatpush3.bf16.msra.mxu0 %v5075_v57 }
 0x163   : > { %4732 = vmatmul.mubr.msk.bf16.vlgmr.msra.gmra.mrb[40].mxu0 %vm3044_vm1, %v1059_v59 }
 0x166   : > { %v4426_v60 = vpop.f32.mrb[12].mxu0 }
 0x167   : > { %v4427_v61 = vpop.f32.mrb[13].mxu0  ;;  %v4448_v0 = vpop.f32.mrb[12].mxu1 }
 0x168   : > { %v4428_v62 = vadd.f32 %v4427_v61, %v4426_v60  ;;  %v4429_v63 = vpop.f32.mrb[14].mxu0  ;;  %v4449_v2 = vpop.f32.mrb[13].mxu1 }
 0x169   : > { %v4430_v1 = vpop.f32.mrb[15].mxu0  ;;  %v4450_v4 = vadd.f32 %v4449_v2, %v4448_v0  ;;  %v4451_v5 = vpop.f32.mrb[14].mxu1 }
 0x16a   : > { %v3323_v3 = vadd.f32 %v4428_v62, %v3283_v43  ;;  %v4452_v7 = vpop.f32.mrb[15].mxu1 }
 0x16c   : > { %v3363_v8 = vadd.f32 %v4450_v4, %v3323_v3 }
 0x186   : > { %v4470_v9 = vpop.f32.mrb[16].mxu0 }
 0x187   : > { %v4471_v10 = vpop.f32.mrb[17].mxu0  ;;  %v4492_v6 = vpop.f32.mrb[16].mxu1 }
 0x188   : > { %v4472_v11 = vadd.f32 %v4471_v10, %v4470_v9  ;;  %v4473_v12 = vpop.f32.mrb[18].mxu0  ;;  %v4493_v14 = vpop.f32.mrb[17].mxu1 }
 0x189   : > { %v4474_v13 = vpop.f32.mrb[19].mxu0  ;;  %v4494_v16 = vadd.f32 %v4493_v14, %v4492_v6  ;;  %v4495_v17 = vpop.f32.mrb[18].mxu1 }
 0x18a   : > { %v3403_v15 = vadd.f32 %v4472_v11, %v3363_v8  ;;  %v4496_v18 = vpop.f32.mrb[19].mxu1 }
 0x18c   : > { %v3443_v19 = vadd.f32 %v4494_v16, %v3403_v15 }
 0x1a6   : > { %v4514_v20 = vpop.f32.mrb[20].mxu0 }
 0x1a7   : > { %v4515_v21 = vpop.f32.mrb[21].mxu0  ;;  %v4536_v24 = vpop.f32.mrb[20].mxu1 }
 0x1a8   : > { %v4516_v22 = vadd.f32 %v4515_v21, %v4514_v20  ;;  %v4517_v23 = vpop.f32.mrb[22].mxu0  ;;  %v4537_v26 = vpop.f32.mrb[21].mxu1 }
 0x1a9   : > { %v4518_v25 = vpop.f32.mrb[23].mxu0  ;;  %v4538_v28 = vadd.f32 %v4537_v26, %v4536_v24  ;;  %v4539_v29 = vpop.f32.mrb[22].mxu1 }
 0x1aa   : > { %v3483_v27 = vadd.f32 %v4516_v22, %v3443_v19  ;;  %v4540_v30 = vpop.f32.mrb[23].mxu1 }
 0x1ac   : > { %v3523_v31 = vadd.f32 %v4538_v28, %v3483_v27 }
 0x1c6   : > { %v4558_v32 = vpop.f32.mrb[24].mxu0 }
 0x1c7   : > { %v4559_v33 = vpop.f32.mrb[25].mxu0  ;;  %v4580_v36 = vpop.f32.mrb[24].mxu1 }
 0x1c8   : > { %v4560_v34 = vadd.f32 %v4559_v33, %v4558_v32  ;;  %v4561_v35 = vpop.f32.mrb[26].mxu0  ;;  %v4581_v38 = vpop.f32.mrb[25].mxu1 }
 0x1c9   : > { %v4562_v37 = vpop.f32.mrb[27].mxu0  ;;  %v4582_v40 = vadd.f32 %v4581_v38, %v4580_v36  ;;  %v4583_v41 = vpop.f32.mrb[26].mxu1 }
 0x1ca   : > { %v3563_v39 = vadd.f32 %v4560_v34, %v3523_v31  ;;  %v4584_v42 = vpop.f32.mrb[27].mxu1 }
 0x1cc   : > { %v3603_v43 = vadd.f32 %v4582_v40, %v3563_v39 }
 0x1e6   : > { %v4602_v44 = vpop.f32.mrb[28].mxu0 }
 0x1e7   : > { %v4603_v45 = vpop.f32.mrb[29].mxu0  ;;  %v4624_v48 = vpop.f32.mrb[28].mxu1 }
 0x1e8   : > { %v4604_v46 = vadd.f32 %v4603_v45, %v4602_v44  ;;  %v4605_v47 = vpop.f32.mrb[30].mxu0  ;;  %v4625_v50 = vpop.f32.mrb[29].mxu1 }
 0x1e9   : > { %v4606_v49 = vpop.f32.mrb[31].mxu0  ;;  %v4626_v52 = vadd.f32 %v4625_v50, %v4624_v48  ;;  %v4627_v53 = vpop.f32.mrb[30].mxu1 }
 0x1ea   : > { %v3643_v51 = vadd.f32 %v4604_v46, %v3603_v43  ;;  %v4628_v54 = vpop.f32.mrb[31].mxu1 }
 0x1ec   : > { %v3683_v55 = vadd.f32 %v4626_v52, %v3643_v51 }
 0x206   : > { %v4646_v56 = vpop.f32.mrb[32].mxu0 }
 0x207   : > { %v4647_v57 = vpop.f32.mrb[33].mxu0  ;;  %v4668_v60 = vpop.f32.mrb[32].mxu1 }
 0x208   : > { %v4648_v58 = vadd.f32 %v4647_v57, %v4646_v56  ;;  %v4649_v59 = vpop.f32.mrb[34].mxu0  ;;  %v4669_v62 = vpop.f32.mrb[33].mxu1 }
 0x209   : > { %v4650_v61 = vpop.f32.mrb[35].mxu0  ;;  %v4670_v0 = vadd.f32 %v4669_v62, %v4668_v60  ;;  %v4671_v1 = vpop.f32.mrb[34].mxu1 }
 0x20a   : > { %v3723_v63 = vadd.f32 %v4648_v58, %v3683_v55  ;;  %v4672_v2 = vpop.f32.mrb[35].mxu1 }
 0x20c   : > { %v3763_v3 = vadd.f32 %v4670_v0, %v3723_v63 }
 0x226   : > { %v4690_v4 = vpop.f32.mrb[36].mxu0 }
 0x227   : > { %v4691_v5 = vpop.f32.mrb[37].mxu0 }
 0x228   : > { %v4692_v7 = vadd.f32 %v4691_v5, %v4690_v4  ;;  %v4693_v8 = vpop.f32.mrb[38].mxu0  ;;  %v4712_v9 = vpop.f32.mrb[36].mxu1 }
 0x229   : > { %v4694_v10 = vpop.f32.mrb[39].mxu0  ;;  %v4713_v11 = vpop.f32.mrb[37].mxu1 }
 0x22a   : > { %v3803_v12 = vadd.f32 %v4692_v7, %v3763_v3  ;;  %v4714_v6 = vadd.f32 %v4713_v11, %v4712_v9  ;;  %v4715_v13 = vpop.f32.mrb[38].mxu1 }
 0x22b   : > { %v4716_v14 = vpop.f32.mrb[39].mxu1 }
 0x22c   : > { %v3843_v15 = vadd.f32 %v4714_v6, %v3803_v12 }
 0x236   : > { %v3882_v16 = vpop.f32.mrb[40].mxu0 }
 0x237   : > { %v3883_v17 = vadd.f32 %v3882_v16, %v3843_v15  ;;  %v4733_v18 = vpop.f32.mrb[41].mxu0 }
 0x238   : > { %v3885_v19 = vpop.f32.mrb[42].mxu0 }
 0x239   : > { %v4275_v20 = vmul.f32 -1.442695, %v3883_v17  ;;  %v4734_v21 = vpop.f32.mrb[43].mxu0 }
 0x23b   : > { %5076 = vpow2.f32 %v4275_v20 }
 0x245   : > { %v5077_v22 = vpop.eup %5076 }
 0x246   : > { %v3891_v23 = vadd.f32 1.0, %v5077_v22 }
 0x248   : > { %5078 = vrcp.f32 %v3891_v23 }
 0x252   : > { %v5079_v24 = vpop.eup %5078 }
 0x253   : > { %3895 = vst.msk [vmem:[%s139_s29] sm:$0x1] %vm3894_vm2, %v5079_v24 }
 0x254 PF: > { %s12_s9 = sadd.s32 1, %s5086_s9  }
 0x255   : > { %p9_p4 = scmp.ge.s32.totalorder %s12_s9, 4  }
 0x257   :  { %11 = sbr.rel (!%p9_p4) target bundleno = 1 (0x1), region = 58 }

</bundles_post_ra>
